<compile_context>
chip_gen: v7x
topology: tpu7x:2x2x1
jax: 0.10.0
libtpu: 0.0.40
codegen_flags: <defaults>
</compile_context>

<pallas_src>
import functools

import jax
import jax.numpy as jnp
from jax.experimental import pallas as pl
from jax.experimental.pallas import tpu as pltpu


def dff_kernel(x_ref, skip_ref, wa_ref, wb_ref, w1_ref, gamma_ref, beta_ref,
               out_ref, pad_ref, *, eps):
    B, Hp2, Wp2, C = pad_ref.shape
    H, W = Hp2 - 2, Wp2 - 2
    N = B * H * W
    inv_n = 1.0 / N

    # Channel sums over the N = B*H*W rows as tile-aligned (8,N)@(N,C) MXU matmuls:
    # overlaps with the conv matmuls and keeps the XLU/VPU free.
    ones_rows = jnp.ones((8, N), jnp.float32)

    def batchnorm_relu(t, g, b):
        # nn.BatchNorm2d in training mode: per-channel batch stats over (B,H,W), biased
        # variance.  One-pass stats (var = E[t^2] - mean^2) from two independent MXU dots.
        # The reference instantiates nn.BatchNorm2d(dim, dim), i.e. eps = dim, which is
        # reproduced faithfully here (and makes the one-pass cancellation harmless).
        mean = jnp.dot(ones_rows, t, preferred_element_type=jnp.float32)[0:1, :] * inv_n
        ex2 = jnp.dot(ones_rows, t * t, preferred_element_type=jnp.float32)[0:1, :] * inv_n
        var = ex2 - mean * mean
        scale = g * jax.lax.rsqrt(var + eps)
        shift = b - mean * scale
        return jnp.maximum(t * scale + shift, 0.0)

    # ---- conv_redu: 1x1 conv (2C -> C) -> BN -> ReLU --------------------------------
    # t0 = x @ Wa + skip @ Wb replaces the concat'ed K=2C matmul exactly.  The conv bias
    # is omitted because the BN mean subtraction cancels it exactly.
    t0 = (jnp.dot(x_ref[...], wa_ref[...], preferred_element_type=jnp.float32) +
          jnp.dot(skip_ref[...], wb_ref[...], preferred_element_type=jnp.float32))
    res1 = batchnorm_relu(t0, gamma_ref[0:1, :], beta_ref[0:1, :])          # (N, C) f32

    # ---- conv1: 3x3 / pad=1 conv -> BN -> ReLU, then + res1 residual ----------------
    # Zero only the 1-pixel halo, once; the interior is fully overwritten below.
    pad_ref[:, 0:1, :, :] = jnp.zeros((B, 1, Wp2, C), jnp.float32)
    pad_ref[:, H + 1:H + 2, :, :] = jnp.zeros((B, 1, Wp2, C), jnp.float32)
    pad_ref[:, :, 0:1, :] = jnp.zeros((B, Hp2, 1, C), jnp.float32)
    pad_ref[:, :, W + 1:W + 2, :] = jnp.zeros((B, Hp2, 1, C), jnp.float32)
    pad_ref[:, 1:1 + H, 1:1 + W, :] = res1.reshape(B, H, W, C)
    # TODO(synk): a bf16 conv scratch (halves patch-read/halo bytes and cast work) needs
    # window reads at sublane offsets 1/2 on a packed (16,128)-tiled dtype; kept f32 +
    # per-patch bf16 cast as the known-good Mosaic lowering path.

    # Nine accumulating K=C bf16 MXU dots over shifted windows: no materialized (N, 9C)
    # im2col, no lane-misaligned concatenation.  All reshapes keep the lane dim (C).
    t1 = None
    for k in range(9):
        dy, dx = k // 3, k % 3
        patch = pad_ref[:, dy:dy + H, dx:dx + W, :].reshape(N, C).astype(jnp.bfloat16)
        part = jnp.dot(patch, w1_ref[k], preferred_element_type=jnp.float32)
        t1 = part if t1 is None else t1 + part

    # TODO(synk): lane-dense (N*C/128, 128) packed epilogue/output (C=32 => 1/4 lane
    # occupancy on stores) requires a lane-dim-changing reshape inside the kernel, which
    # Mosaic does not reliably lower; output stays in (N, C) layout.
    out_ref[...] = batchnorm_relu(t1, gamma_ref[1:2, :], beta_ref[1:2, :]) + res1


def init_params(key, C):
    k1, k2 = jax.random.split(key, 2)
    p = {}
    # Conv2d(2C, C, 1) weight stored as (Cin=2C, Cout=C)  (PyTorch (C, 2C, 1, 1) transposed).
    p['w_redu'] = (1.0 / jnp.sqrt(2.0 * C)) * jax.random.normal(k1, (2 * C, C), jnp.float32)
    # Conv2d(C, C, 3, padding=1) weight stored as (kh*kw, Cin, Cout).
    p['w1'] = ((1.0 / jnp.sqrt(9.0 * C)) *
               jax.random.normal(k2, (3, 3, C, C), jnp.float32)).reshape(9, C, C)
    # Conv biases intentionally omitted: training-mode BatchNorm's batch-mean subtraction
    # cancels a per-channel conv bias exactly, so they can never affect the forward output.
    # BatchNorm affine params, PyTorch default init (weight=1, bias=0).
    # rows: 0 = conv_redu BN, 1 = conv1 BN.
    p['gamma'] = jnp.ones((2, C), jnp.float32)
    p['beta'] = jnp.zeros((2, C), jnp.float32)
    return p


@jax.jit
def dff_forward(x, skip, params):
    B, H, W, C = x.shape
    N = B * H * W
    # Wrapper-side layout plumbing only (cheap, fused XLA ops): flatten to rows and cast
    # the large activations to bf16 so the kernel DMAs half the bytes and never sees a
    # materialized channel concat.
    xr = x.reshape(N, C).astype(jnp.bfloat16)
    sr = skip.reshape(N, C).astype(jnp.bfloat16)
    wa = params['w_redu'][:C, :].astype(jnp.bfloat16)   # acts on the `x` half of the concat
    wb = params['w_redu'][C:, :].astype(jnp.bfloat16)   # acts on the `skip` half
    w1 = params['w1'].astype(jnp.bfloat16)
    args = (xr, sr, wa, wb, w1, params['gamma'], params['beta'])
    vmem = pl.BlockSpec(memory_space=pltpu.MemorySpace.VMEM)
    # Whole problem fits easily in VMEM -> single-program kernel, everything resident.
    # TODO(synk): a batch/row "parallel" grid for v7x's 2nd TensorCore (two-pass BN with a
    # cross-core stats reduction) is omitted: training-mode BatchNorm needs global (B,H,W)
    # statistics; re-derive the VMEM budget (64 MiB on v7x) before scaling shapes.
    out = pl.pallas_call(
        functools.partial(dff_kernel, eps=float(C)),   # nn.BatchNorm2d(dim, dim) => eps = dim
        out_shape=jax.ShapeDtypeStruct((N, C), jnp.float32),
        in_specs=[vmem] * len(args),
        out_specs=vmem,
        scratch_shapes=[pltpu.VMEM((B, H + 2, W + 2, C), jnp.float32)],
    )(*args)
    return out.reshape(B, H, W, C)


if __name__ == "__main__":
    key = jax.random.PRNGKey(0)
    kx, ks, kp = jax.random.split(key, 3)
    # dim = 32, spatial 16x16, batch 2 (NHWC; the PyTorch reference would be NCHW).
    B, H, W, C = 2, 16, 16, 32
    x = jax.random.normal(kx, (B, H, W, C), jnp.float32)
    skip = jax.random.normal(ks, (B, H, W, C), jnp.float32)
    params = init_params(kp, C)

    out = dff_forward(x, skip, params)
    jax.block_until_ready(out)

    assert out.shape == (B, H, W, C)
    assert bool(jnp.isfinite(out).all())
    print("KERNEL_OK")
</pallas_src>

<mosaic_0001>
module attributes {stable_mosaic.version = 11 : i64} {
  func.func @dff_kernel(%arg0: memref<512x32xbf16, #tpu.memory_space<vmem>>, %arg1: memref<512x32xbf16, #tpu.memory_space<vmem>>, %arg2: memref<32x32xbf16, #tpu.memory_space<vmem>>, %arg3: memref<32x32xbf16, #tpu.memory_space<vmem>>, %arg4: memref<9x32x32xbf16, #tpu.memory_space<vmem>>, %arg5: memref<2x32xf32, #tpu.memory_space<vmem>>, %arg6: memref<2x32xf32, #tpu.memory_space<vmem>>, %arg7: memref<512x32xf32, #tpu.memory_space<vmem>>, %arg8: memref<2x18x18x32xf32, #tpu.memory_space<vmem>>) attributes {dimension_semantics = [], scalar_prefetch = 0 : i64, scratch_operands = 1 : i64, tpu.core_type = #tpu.core_type<tc>} {
    %cst = arith.constant 1.000000e+00 : f32
    %0 = vector.broadcast %cst : f32 to vector<8x512xf32>
    %c0 = arith.constant 0 : index
    %c0_0 = arith.constant 0 : index
    %1 = vector.load %arg0[%c0, %c0_0] : memref<512x32xbf16, #tpu.memory_space<vmem>>, vector<512x32xbf16>
    %c0_1 = arith.constant 0 : index
    %c0_2 = arith.constant 0 : index
    %2 = vector.load %arg2[%c0_1, %c0_2] : memref<32x32xbf16, #tpu.memory_space<vmem>>, vector<32x32xbf16>
    %cst_3 = arith.constant dense<0.000000e+00> : vector<512x32xf32>
    %3 = tpu.matmul %1, %2, %cst_3 {dimension_numbers = #tpu.dot_dimension_numbers<[1], [0], [0], [1], [0, 0, 1, 1], [], []>} : vector<512x32xbf16>, vector<32x32xbf16>, vector<512x32xf32> -> vector<512x32xf32>
    %c0_4 = arith.constant 0 : index
    %c0_5 = arith.constant 0 : index
    %4 = vector.load %arg1[%c0_4, %c0_5] : memref<512x32xbf16, #tpu.memory_space<vmem>>, vector<512x32xbf16>
    %c0_6 = arith.constant 0 : index
    %c0_7 = arith.constant 0 : index
    %5 = vector.load %arg3[%c0_6, %c0_7] : memref<32x32xbf16, #tpu.memory_space<vmem>>, vector<32x32xbf16>
    %cst_8 = arith.constant dense<0.000000e+00> : vector<512x32xf32>
    %6 = tpu.matmul %4, %5, %cst_8 {dimension_numbers = #tpu.dot_dimension_numbers<[1], [0], [0], [1], [0, 0, 1, 1], [], []>} : vector<512x32xbf16>, vector<32x32xbf16>, vector<512x32xf32> -> vector<512x32xf32>
    %7 = arith.addf %3, %6 : vector<512x32xf32>
    %c0_9 = arith.constant 0 : index
    %c0_10 = arith.constant 0 : index
    %8 = vector.load %arg5[%c0_9, %c0_10] : memref<2x32xf32, #tpu.memory_space<vmem>>, vector<1x32xf32>
    %c0_11 = arith.constant 0 : index
    %c0_12 = arith.constant 0 : index
    %9 = vector.load %arg6[%c0_11, %c0_12] : memref<2x32xf32, #tpu.memory_space<vmem>>, vector<1x32xf32>
    %cst_13 = arith.constant dense<0.000000e+00> : vector<8x32xf32>
    %10 = tpu.matmul %0, %7, %cst_13 {dimension_numbers = #tpu.dot_dimension_numbers<[1], [0], [0], [1], [0, 0, 1, 1], [], []>} : vector<8x512xf32>, vector<512x32xf32>, vector<8x32xf32> -> vector<8x32xf32>
    %11 = vector.extract_strided_slice %10 {offsets = [0, 0], sizes = [1, 32], strides = [1, 1]} : vector<8x32xf32> to vector<1x32xf32>
    %cst_14 = arith.constant 0.001953125 : f32
    %12 = vector.broadcast %cst_14 : f32 to vector<1x32xf32>
    %13 = arith.mulf %11, %12 : vector<1x32xf32>
    %14 = arith.mulf %7, %7 : vector<512x32xf32>
    %cst_15 = arith.constant dense<0.000000e+00> : vector<8x32xf32>
    %15 = tpu.matmul %0, %14, %cst_15 {dimension_numbers = #tpu.dot_dimension_numbers<[1], [0], [0], [1], [0, 0, 1, 1], [], []>} : vector<8x512xf32>, vector<512x32xf32>, vector<8x32xf32> -> vector<8x32xf32>
    %16 = vector.extract_strided_slice %15 {offsets = [0, 0], sizes = [1, 32], strides = [1, 1]} : vector<8x32xf32> to vector<1x32xf32>
    %cst_16 = arith.constant 0.001953125 : f32
    %17 = vector.broadcast %cst_16 : f32 to vector<1x32xf32>
    %18 = arith.mulf %16, %17 : vector<1x32xf32>
    %19 = arith.mulf %13, %13 : vector<1x32xf32>
    %20 = arith.subf %18, %19 : vector<1x32xf32>
    %cst_17 = arith.constant 3.200000e+01 : f32
    %21 = vector.broadcast %cst_17 : f32 to vector<1x32xf32>
    %22 = arith.addf %20, %21 : vector<1x32xf32>
    %23 = math.rsqrt %22 : vector<1x32xf32>
    %24 = arith.mulf %8, %23 : vector<1x32xf32>
    %25 = arith.mulf %13, %24 : vector<1x32xf32>
    %26 = arith.subf %9, %25 : vector<1x32xf32>
    %27 = vector.broadcast %24 : vector<1x32xf32> to vector<512x32xf32>
    %28 = arith.mulf %7, %27 : vector<512x32xf32>
    %29 = vector.broadcast %26 : vector<1x32xf32> to vector<512x32xf32>
    %30 = arith.addf %28, %29 : vector<512x32xf32>
    %cst_18 = arith.constant 0.000000e+00 : f32
    %31 = vector.broadcast %cst_18 : f32 to vector<512x32xf32>
    %32 = arith.maximumf %30, %31 : vector<512x32xf32>
    %cst_19 = arith.constant 0.000000e+00 : f32
    %33 = vector.broadcast %cst_19 : f32 to vector<2x1x18x32xf32>
    %c0_20 = arith.constant 0 : index
    %c0_21 = arith.constant 0 : index
    %c0_22 = arith.constant 0 : index
    %c0_23 = arith.constant 0 : index
    %34 = vector.load %arg8[%c0_20, %c0_21, %c0_22, %c0_23] : memref<2x18x18x32xf32, #tpu.memory_space<vmem>>, vector<2x1x18x32xf32>
    tpu.vector_store %arg8[%c0_20, %c0_21, %c0_22, %c0_23], %33 {strides = array<i32>} : memref<2x18x18x32xf32, #tpu.memory_space<vmem>>, vector<2x1x18x32xf32>,
    %cst_24 = arith.constant 0.000000e+00 : f32
    %35 = vector.broadcast %cst_24 : f32 to vector<2x1x18x32xf32>
    %c0_25 = arith.constant 0 : index
    %c17 = arith.constant 17 : index
    %c0_26 = arith.constant 0 : index
    %c0_27 = arith.constant 0 : index
    %36 = vector.load %arg8[%c0_25, %c17, %c0_26, %c0_27] : memref<2x18x18x32xf32, #tpu.memory_space<vmem>>, vector<2x1x18x32xf32>
    tpu.vector_store %arg8[%c0_25, %c17, %c0_26, %c0_27], %35 {strides = array<i32>} : memref<2x18x18x32xf32, #tpu.memory_space<vmem>>, vector<2x1x18x32xf32>,
    %cst_28 = arith.constant 0.000000e+00 : f32
    %37 = vector.broadcast %cst_28 : f32 to vector<2x18x1x32xf32>
    %c0_29 = arith.constant 0 : index
    %c0_30 = arith.constant 0 : index
    %c0_31 = arith.constant 0 : index
    %c0_32 = arith.constant 0 : index
    %38 = vector.load %arg8[%c0_29, %c0_30, %c0_31, %c0_32] : memref<2x18x18x32xf32, #tpu.memory_space<vmem>>, vector<2x18x1x32xf32>
    tpu.vector_store %arg8[%c0_29, %c0_30, %c0_31, %c0_32], %37 {strides = array<i32>} : memref<2x18x18x32xf32, #tpu.memory_space<vmem>>, vector<2x18x1x32xf32>,
    %cst_33 = arith.constant 0.000000e+00 : f32
    %39 = vector.broadcast %cst_33 : f32 to vector<2x18x1x32xf32>
    %c0_34 = arith.constant 0 : index
    %c0_35 = arith.constant 0 : index
    %c17_36 = arith.constant 17 : index
    %c0_37 = arith.constant 0 : index
    %40 = vector.load %arg8[%c0_34, %c0_35, %c17_36, %c0_37] : memref<2x18x18x32xf32, #tpu.memory_space<vmem>>, vector<2x18x1x32xf32>
    tpu.vector_store %arg8[%c0_34, %c0_35, %c17_36, %c0_37], %39 {strides = array<i32>} : memref<2x18x18x32xf32, #tpu.memory_space<vmem>>, vector<2x18x1x32xf32>,
    %41 = vector.shape_cast %32 : vector<512x32xf32> to vector<2x16x16x32xf32>
    %c0_38 = arith.constant 0 : index
    %c1 = arith.constant 1 : index
    %c1_39 = arith.constant 1 : index
    %c0_40 = arith.constant 0 : index
    %42 = vector.load %arg8[%c0_38, %c1, %c1_39, %c0_40] : memref<2x18x18x32xf32, #tpu.memory_space<vmem>>, vector<2x16x16x32xf32>
    tpu.vector_store %arg8[%c0_38, %c1, %c1_39, %c0_40], %41 {strides = array<i32>} : memref<2x18x18x32xf32, #tpu.memory_space<vmem>>, vector<2x16x16x32xf32>,
    %c0_41 = arith.constant 0 : index
    %c0_42 = arith.constant 0 : index
    %c0_43 = arith.constant 0 : index
    %c0_44 = arith.constant 0 : index
    %43 = vector.load %arg8[%c0_41, %c0_42, %c0_43, %c0_44] : memref<2x18x18x32xf32, #tpu.memory_space<vmem>>, vector<2x16x16x32xf32>
    %44 = vector.shape_cast %43 : vector<2x16x16x32xf32> to vector<512x32xf32>
    %45 = arith.truncf %44 : vector<512x32xf32> to vector<512x32xbf16>
    %c0_45 = arith.constant 0 : index
    %c0_46 = arith.constant 0 : index
    %c0_47 = arith.constant 0 : index
    %46 = vector.load %arg4[%c0_45, %c0_46, %c0_47] : memref<9x32x32xbf16, #tpu.memory_space<vmem>>, vector<1x32x32xbf16>
    %47 = vector.shape_cast %46 : vector<1x32x32xbf16> to vector<32x32xbf16>
    %cst_48 = arith.constant dense<0.000000e+00> : vector<512x32xf32>
    %48 = tpu.matmul %45, %47, %cst_48 {dimension_numbers = #tpu.dot_dimension_numbers<[1], [0], [0], [1], [0, 0, 1, 1], [], []>} : vector<512x32xbf16>, vector<32x32xbf16>, vector<512x32xf32> -> vector<512x32xf32>
    %c0_49 = arith.constant 0 : index
    %c0_50 = arith.constant 0 : index
    %c1_51 = arith.constant 1 : index
    %c0_52 = arith.constant 0 : index
    %49 = vector.load %arg8[%c0_49, %c0_50, %c1_51, %c0_52] : memref<2x18x18x32xf32, #tpu.memory_space<vmem>>, vector<2x16x16x32xf32>
    %50 = vector.shape_cast %49 : vector<2x16x16x32xf32> to vector<512x32xf32>
    %51 = arith.truncf %50 : vector<512x32xf32> to vector<512x32xbf16>
    %c1_53 = arith.constant 1 : index
    %c0_54 = arith.constant 0 : index
    %c0_55 = arith.constant 0 : index
    %52 = vector.load %arg4[%c1_53, %c0_54, %c0_55] : memref<9x32x32xbf16, #tpu.memory_space<vmem>>, vector<1x32x32xbf16>
    %53 = vector.shape_cast %52 : vector<1x32x32xbf16> to vector<32x32xbf16>
    %cst_56 = arith.constant dense<0.000000e+00> : vector<512x32xf32>
    %54 = tpu.matmul %51, %53, %cst_56 {dimension_numbers = #tpu.dot_dimension_numbers<[1], [0], [0], [1], [0, 0, 1, 1], [], []>} : vector<512x32xbf16>, vector<32x32xbf16>, vector<512x32xf32> -> vector<512x32xf32>
    %55 = arith.addf %48, %54 : vector<512x32xf32>
    %c0_57 = arith.constant 0 : index
    %c0_58 = arith.constant 0 : index
    %c2 = arith.constant 2 : index
    %c0_59 = arith.constant 0 : index
    %56 = vector.load %arg8[%c0_57, %c0_58, %c2, %c0_59] : memref<2x18x18x32xf32, #tpu.memory_space<vmem>>, vector<2x16x16x32xf32>
    %57 = vector.shape_cast %56 : vector<2x16x16x32xf32> to vector<512x32xf32>
    %58 = arith.truncf %57 : vector<512x32xf32> to vector<512x32xbf16>
    %c2_60 = arith.constant 2 : index
    %c0_61 = arith.constant 0 : index
    %c0_62 = arith.constant 0 : index
    %59 = vector.load %arg4[%c2_60, %c0_61, %c0_62] : memref<9x32x32xbf16, #tpu.memory_space<vmem>>, vector<1x32x32xbf16>
    %60 = vector.shape_cast %59 : vector<1x32x32xbf16> to vector<32x32xbf16>
    %cst_63 = arith.constant dense<0.000000e+00> : vector<512x32xf32>
    %61 = tpu.matmul %58, %60, %cst_63 {dimension_numbers = #tpu.dot_dimension_numbers<[1], [0], [0], [1], [0, 0, 1, 1], [], []>} : vector<512x32xbf16>, vector<32x32xbf16>, vector<512x32xf32> -> vector<512x32xf32>
    %62 = arith.addf %55, %61 : vector<512x32xf32>
    %c0_64 = arith.constant 0 : index
    %c1_65 = arith.constant 1 : index
    %c0_66 = arith.constant 0 : index
    %c0_67 = arith.constant 0 : index
    %63 = vector.load %arg8[%c0_64, %c1_65, %c0_66, %c0_67] : memref<2x18x18x32xf32, #tpu.memory_space<vmem>>, vector<2x16x16x32xf32>
    %64 = vector.shape_cast %63 : vector<2x16x16x32xf32> to vector<512x32xf32>
    %65 = arith.truncf %64 : vector<512x32xf32> to vector<512x32xbf16>
    %c3 = arith.constant 3 : index
    %c0_68 = arith.constant 0 : index
    %c0_69 = arith.constant 0 : index
    %66 = vector.load %arg4[%c3, %c0_68, %c0_69] : memref<9x32x32xbf16, #tpu.memory_space<vmem>>, vector<1x32x32xbf16>
    %67 = vector.shape_cast %66 : vector<1x32x32xbf16> to vector<32x32xbf16>
    %cst_70 = arith.constant dense<0.000000e+00> : vector<512x32xf32>
    %68 = tpu.matmul %65, %67, %cst_70 {dimension_numbers = #tpu.dot_dimension_numbers<[1], [0], [0], [1], [0, 0, 1, 1], [], []>} : vector<512x32xbf16>, vector<32x32xbf16>, vector<512x32xf32> -> vector<512x32xf32>
    %69 = arith.addf %62, %68 : vector<512x32xf32>
    %c0_71 = arith.constant 0 : index
    %c1_72 = arith.constant 1 : index
    %c1_73 = arith.constant 1 : index
    %c0_74 = arith.constant 0 : index
    %70 = vector.load %arg8[%c0_71, %c1_72, %c1_73, %c0_74] : memref<2x18x18x32xf32, #tpu.memory_space<vmem>>, vector<2x16x16x32xf32>
    %71 = vector.shape_cast %70 : vector<2x16x16x32xf32> to vector<512x32xf32>
    %72 = arith.truncf %71 : vector<512x32xf32> to vector<512x32xbf16>
    %c4 = arith.constant 4 : index
    %c0_75 = arith.constant 0 : index
    %c0_76 = arith.constant 0 : index
    %73 = vector.load %arg4[%c4, %c0_75, %c0_76] : memref<9x32x32xbf16, #tpu.memory_space<vmem>>, vector<1x32x32xbf16>
    %74 = vector.shape_cast %73 : vector<1x32x32xbf16> to vector<32x32xbf16>
    %cst_77 = arith.constant dense<0.000000e+00> : vector<512x32xf32>
    %75 = tpu.matmul %72, %74, %cst_77 {dimension_numbers = #tpu.dot_dimension_numbers<[1], [0], [0], [1], [0, 0, 1, 1], [], []>} : vector<512x32xbf16>, vector<32x32xbf16>, vector<512x32xf32> -> vector<512x32xf32>
    %76 = arith.addf %69, %75 : vector<512x32xf32>
    %c0_78 = arith.constant 0 : index
    %c1_79 = arith.constant 1 : index
    %c2_80 = arith.constant 2 : index
    %c0_81 = arith.constant 0 : index
    %77 = vector.load %arg8[%c0_78, %c1_79, %c2_80, %c0_81] : memref<2x18x18x32xf32, #tpu.memory_space<vmem>>, vector<2x16x16x32xf32>
    %78 = vector.shape_cast %77 : vector<2x16x16x32xf32> to vector<512x32xf32>
    %79 = arith.truncf %78 : vector<512x32xf32> to vector<512x32xbf16>
    %c5 = arith.constant 5 : index
    %c0_82 = arith.constant 0 : index
    %c0_83 = arith.constant 0 : index
    %80 = vector.load %arg4[%c5, %c0_82, %c0_83] : memref<9x32x32xbf16, #tpu.memory_space<vmem>>, vector<1x32x32xbf16>
    %81 = vector.shape_cast %80 : vector<1x32x32xbf16> to vector<32x32xbf16>
    %cst_84 = arith.constant dense<0.000000e+00> : vector<512x32xf32>
    %82 = tpu.matmul %79, %81, %cst_84 {dimension_numbers = #tpu.dot_dimension_numbers<[1], [0], [0], [1], [0, 0, 1, 1], [], []>} : vector<512x32xbf16>, vector<32x32xbf16>, vector<512x32xf32> -> vector<512x32xf32>
    %83 = arith.addf %76, %82 : vector<512x32xf32>
    %c0_85 = arith.constant 0 : index
    %c2_86 = arith.constant 2 : index
    %c0_87 = arith.constant 0 : index
    %c0_88 = arith.constant 0 : index
    %84 = vector.load %arg8[%c0_85, %c2_86, %c0_87, %c0_88] : memref<2x18x18x32xf32, #tpu.memory_space<vmem>>, vector<2x16x16x32xf32>
    %85 = vector.shape_cast %84 : vector<2x16x16x32xf32> to vector<512x32xf32>
    %86 = arith.truncf %85 : vector<512x32xf32> to vector<512x32xbf16>
    %c6 = arith.constant 6 : index
    %c0_89 = arith.constant 0 : index
    %c0_90 = arith.constant 0 : index
    %87 = vector.load %arg4[%c6, %c0_89, %c0_90] : memref<9x32x32xbf16, #tpu.memory_space<vmem>>, vector<1x32x32xbf16>
    %88 = vector.shape_cast %87 : vector<1x32x32xbf16> to vector<32x32xbf16>
    %cst_91 = arith.constant dense<0.000000e+00> : vector<512x32xf32>
    %89 = tpu.matmul %86, %88, %cst_91 {dimension_numbers = #tpu.dot_dimension_numbers<[1], [0], [0], [1], [0, 0, 1, 1], [], []>} : vector<512x32xbf16>, vector<32x32xbf16>, vector<512x32xf32> -> vector<512x32xf32>
    %90 = arith.addf %83, %89 : vector<512x32xf32>
    %c0_92 = arith.constant 0 : index
    %c2_93 = arith.constant 2 : index
    %c1_94 = arith.constant 1 : index
    %c0_95 = arith.constant 0 : index
    %91 = vector.load %arg8[%c0_92, %c2_93, %c1_94, %c0_95] : memref<2x18x18x32xf32, #tpu.memory_space<vmem>>, vector<2x16x16x32xf32>
    %92 = vector.shape_cast %91 : vector<2x16x16x32xf32> to vector<512x32xf32>
    %93 = arith.truncf %92 : vector<512x32xf32> to vector<512x32xbf16>
    %c7 = arith.constant 7 : index
    %c0_96 = arith.constant 0 : index
    %c0_97 = arith.constant 0 : index
    %94 = vector.load %arg4[%c7, %c0_96, %c0_97] : memref<9x32x32xbf16, #tpu.memory_space<vmem>>, vector<1x32x32xbf16>
    %95 = vector.shape_cast %94 : vector<1x32x32xbf16> to vector<32x32xbf16>
    %cst_98 = arith.constant dense<0.000000e+00> : vector<512x32xf32>
    %96 = tpu.matmul %93, %95, %cst_98 {dimension_numbers = #tpu.dot_dimension_numbers<[1], [0], [0], [1], [0, 0, 1, 1], [], []>} : vector<512x32xbf16>, vector<32x32xbf16>, vector<512x32xf32> -> vector<512x32xf32>
    %97 = arith.addf %90, %96 : vector<512x32xf32>
    %c0_99 = arith.constant 0 : index
    %c2_100 = arith.constant 2 : index
    %c2_101 = arith.constant 2 : index
    %c0_102 = arith.constant 0 : index
    %98 = vector.load %arg8[%c0_99, %c2_100, %c2_101, %c0_102] : memref<2x18x18x32xf32, #tpu.memory_space<vmem>>, vector<2x16x16x32xf32>
    %99 = vector.shape_cast %98 : vector<2x16x16x32xf32> to vector<512x32xf32>
    %100 = arith.truncf %99 : vector<512x32xf32> to vector<512x32xbf16>
    %c8 = arith.constant 8 : index
    %c0_103 = arith.constant 0 : index
    %c0_104 = arith.constant 0 : index
    %101 = vector.load %arg4[%c8, %c0_103, %c0_104] : memref<9x32x32xbf16, #tpu.memory_space<vmem>>, vector<1x32x32xbf16>
    %102 = vector.shape_cast %101 : vector<1x32x32xbf16> to vector<32x32xbf16>
    %cst_105 = arith.constant dense<0.000000e+00> : vector<512x32xf32>
    %103 = tpu.matmul %100, %102, %cst_105 {dimension_numbers = #tpu.dot_dimension_numbers<[1], [0], [0], [1], [0, 0, 1, 1], [], []>} : vector<512x32xbf16>, vector<32x32xbf16>, vector<512x32xf32> -> vector<512x32xf32>
    %104 = arith.addf %97, %103 : vector<512x32xf32>
    %c1_106 = arith.constant 1 : index
    %c0_107 = arith.constant 0 : index
    %105 = vector.load %arg5[%c1_106, %c0_107] : memref<2x32xf32, #tpu.memory_space<vmem>>, vector<1x32xf32>
    %c1_108 = arith.constant 1 : index
    %c0_109 = arith.constant 0 : index
    %106 = vector.load %arg6[%c1_108, %c0_109] : memref<2x32xf32, #tpu.memory_space<vmem>>, vector<1x32xf32>
    %cst_110 = arith.constant dense<0.000000e+00> : vector<8x32xf32>
    %107 = tpu.matmul %0, %104, %cst_110 {dimension_numbers = #tpu.dot_dimension_numbers<[1], [0], [0], [1], [0, 0, 1, 1], [], []>} : vector<8x512xf32>, vector<512x32xf32>, vector<8x32xf32> -> vector<8x32xf32>
    %108 = vector.extract_strided_slice %107 {offsets = [0, 0], sizes = [1, 32], strides = [1, 1]} : vector<8x32xf32> to vector<1x32xf32>
    %cst_111 = arith.constant 0.001953125 : f32
    %109 = vector.broadcast %cst_111 : f32 to vector<1x32xf32>
    %110 = arith.mulf %108, %109 : vector<1x32xf32>
    %111 = arith.mulf %104, %104 : vector<512x32xf32>
    %cst_112 = arith.constant dense<0.000000e+00> : vector<8x32xf32>
    %112 = tpu.matmul %0, %111, %cst_112 {dimension_numbers = #tpu.dot_dimension_numbers<[1], [0], [0], [1], [0, 0, 1, 1], [], []>} : vector<8x512xf32>, vector<512x32xf32>, vector<8x32xf32> -> vector<8x32xf32>
    %113 = vector.extract_strided_slice %112 {offsets = [0, 0], sizes = [1, 32], strides = [1, 1]} : vector<8x32xf32> to vector<1x32xf32>
    %cst_113 = arith.constant 0.001953125 : f32
    %114 = vector.broadcast %cst_113 : f32 to vector<1x32xf32>
    %115 = arith.mulf %113, %114 : vector<1x32xf32>
    %116 = arith.mulf %110, %110 : vector<1x32xf32>
    %117 = arith.subf %115, %116 : vector<1x32xf32>
    %cst_114 = arith.constant 3.200000e+01 : f32
    %118 = vector.broadcast %cst_114 : f32 to vector<1x32xf32>
    %119 = arith.addf %117, %118 : vector<1x32xf32>
    %120 = math.rsqrt %119 : vector<1x32xf32>
    %121 = arith.mulf %105, %120 : vector<1x32xf32>
    %122 = arith.mulf %110, %121 : vector<1x32xf32>
    %123 = arith.subf %106, %122 : vector<1x32xf32>
    %124 = vector.broadcast %121 : vector<1x32xf32> to vector<512x32xf32>
    %125 = arith.mulf %104, %124 : vector<512x32xf32>
    %126 = vector.broadcast %123 : vector<1x32xf32> to vector<512x32xf32>
    %127 = arith.addf %125, %126 : vector<512x32xf32>
    %cst_115 = arith.constant 0.000000e+00 : f32
    %128 = vector.broadcast %cst_115 : f32 to vector<512x32xf32>
    %129 = arith.maximumf %127, %128 : vector<512x32xf32>
    %130 = arith.addf %129, %32 : vector<512x32xf32>
    %c0_116 = arith.constant 0 : index
    %c0_117 = arith.constant 0 : index
    %131 = vector.load %arg7[%c0_116, %c0_117] : memref<512x32xf32, #tpu.memory_space<vmem>>, vector<512x32xf32>
    tpu.vector_store %arg7[%c0_116, %c0_117], %130 {strides = array<i32>} : memref<512x32xf32, #tpu.memory_space<vmem>>, vector<512x32xf32>,
    return
  }
}

</mosaic_0001>

<bundles_post_ra>
// kernel: dff_forward.1
= control target key start
LH: loop header
LB: loop body
LE: loop exit
PB: predicated region body
PF: predicated region fallthrough
CT: control target
= control target key end

     0   :  { %vm336_vm0 = vcmask 261120   ;;  %s14473_s0 = inlined_call_operand.vmem [shape: bf16[512,32], index: 0, kind: input, shape index: {}]   ;;  %s14474_s1 = inlined_call_operand.vmem [shape: bf16[512,32], index: 1, kind: input, shape index: {}]   ;;  %s14475_s2 = inlined_call_operand.vmem [shape: bf16[32,32], index: 2, kind: input, shape index: {}]   ;;  %s14476_s3 = inlined_call_operand.vmem [shape: bf16[32,32], index: 3, kind: input, shape index: {}]   ;;  %s14477_s4 = inlined_call_operand.vmem [shape: bf16[9,32,32], index: 4, kind: input, shape index: {}]   ;;  %s14478_s5 = inlined_call_operand.vmem [shape: f32[2,32], index: 5, kind: input, shape index: {}]   ;;  %s14479_s6 = inlined_call_operand.vmem [shape: f32[2,32], index: 6, kind: input, shape index: {}]   ;;  %s14480_s7 = inlined_call_operand.hbm [shape: f32[512,32], index: 7, kind: output, shape index: {}]  }
   0x1   :  { %v10328_v0 = vld [vmem:[%s14476_s3] sm:$0xff]   ;;  %v10329_v1 = vld [vmem:[%s14476_s3 + $0x8] sm:$0xff]   ;;  %v10332_v4 = vld [vmem:[%s14474_s1 + $0x10] sm:$0xff]  }
   0x2   :  { %8739 = vmatprep.subr.bf16.mxu0 %v10328_v0  ;;  %v10330_v2 = vld [vmem:[%s14474_s1] sm:$0xff]   ;;  %v10331_v3 = vld [vmem:[%s14474_s1 + $0x8] sm:$0xff]   ;;  %v10333_v6 = vld [vmem:[%s14474_s1 + $0x18] sm:$0xff]  }
   0x3   :  { %8740 = vmatpush3.bf16.msra.mxu0 %v10328_v0  ;;  %8743 = vmatprep.mubr.msk.bf16.mxu0 %vm336_vm0, %v10330_v2  ;;  %v10341_v5 = vld [vmem:[%s14475_s2] sm:$0xff]   ;;  %v10335_v8 = vld [vmem:[%s14474_s1 + $0x28] sm:$0xff]   ;;  %v10336_v9 = vld [vmem:[%s14474_s1 + $0x30] sm:$0xff]  }
   0x4   :  { %8741 = vmatprep.subr.bf16.mxu0 %v10329_v1  ;;  %v10334_v7 = vld [vmem:[%s14474_s1 + $0x20] sm:$0xff]   ;;  %v10337_v10 = vld [vmem:[%s14474_s1 + $0x38] sm:$0xff]   ;;  %v10358_v11 = vld [vmem:[%s14475_s2 + $0x8] sm:$0xff]  }
   0x5   :  { %v10338_v12 = vld [vmem:[%s14474_s1 + $0x40] sm:$0xff]   ;;  %v10339_v13 = vld [vmem:[%s14474_s1 + $0x48] sm:$0xff]   ;;  %v10340_v14 = vld [vmem:[%s14474_s1 + $0x50] sm:$0xff]  }
   0x6   :  { %v10342_v15 = vld [vmem:[%s14474_s1 + $0x58] sm:$0xff]   ;;  %v10343_v16 = vld [vmem:[%s14474_s1 + $0x60] sm:$0xff]   ;;  %v10344_v17 = vld [vmem:[%s14474_s1 + $0x68] sm:$0xff]  }
   0x7   :  { %8742 = vmatpush3.bf16.msra.mxu0 %v10329_v1  ;;  %v10345_v18 = vld [vmem:[%s14474_s1 + $0x70] sm:$0xff]   ;;  %v10346_v19 = vld [vmem:[%s14474_s1 + $0x78] sm:$0xff]   ;;  %v10347_v20 = vld [vmem:[%s14474_s1 + $0x80] sm:$0xff]  }
   0x8   :  { %8807 = vmatprep.subr.bf16.mxu0 %v10341_v5  ;;  %v10348_v21 = vld [vmem:[%s14474_s1 + $0x88] sm:$0xff]   ;;  %v10349_v22 = vld [vmem:[%s14474_s1 + $0x90] sm:$0xff]  }
   0xa   :  { %8744 = vmatmul.mubr.msk.bf16.vlgmr.msra.gmra.mrb[0].mxu0 %vm336_vm0, %v10331_v3 }
   0xb   :  { %8747 = vmatprep.mubr.msk.bf16.mxu0 %vm336_vm0, %v10332_v4  ;;  %8808 = vmatpush3.bf16.msra.mxu0 %v10341_v5 }
   0xc   :  { %8809 = vmatprep.subr.bf16.mxu0 %v10358_v11 }
   0xf   :  { %8810 = vmatpush3.bf16.msra.mxu0 %v10358_v11 }
  0x12   :  { %8748 = vmatmul.mubr.msk.bf16.gmra.mrb[4].mxu0 %vm336_vm0, %v10333_v6 }
  0x13   :  { %8751 = vmatprep.mubr.msk.bf16.mxu0 %vm336_vm0, %v10334_v7 }
  0x1a   :  { %8752 = vmatmul.mubr.msk.bf16.gmra.mrb[8].mxu0 %vm336_vm0, %v10335_v8 }
  0x1b   :  { %8755 = vmatprep.mubr.msk.bf16.mxu0 %vm336_vm0, %v10336_v9 }
  0x22   :  { %8756 = vmatmul.mubr.msk.bf16.gmra.mrb[12].mxu0 %vm336_vm0, %v10337_v10 }
  0x23   :  { %8759 = vmatprep.mubr.msk.bf16.mxu0 %vm336_vm0, %v10338_v12 }
  0x2a   :  { %8760 = vmatmul.mubr.msk.bf16.gmra.mrb[16].mxu0 %vm336_vm0, %v10339_v13 }
  0x2b   :  { %8763 = vmatprep.mubr.msk.bf16.mxu0 %vm336_vm0, %v10340_v14 }
  0x32   :  { %8764 = vmatmul.mubr.msk.bf16.gmra.mrb[20].mxu0 %vm336_vm0, %v10342_v15 }
  0x33   :  { %8767 = vmatprep.mubr.msk.bf16.mxu0 %vm336_vm0, %v10343_v16 }
  0x3a   :  { %8768 = vmatmul.mubr.msk.bf16.gmra.mrb[24].mxu0 %vm336_vm0, %v10344_v17 }
  0x3b   :  { %8771 = vmatprep.mubr.msk.bf16.mxu0 %vm336_vm0, %v10345_v18 }
  0x42   :  { %8772 = vmatmul.mubr.msk.bf16.gmra.mrb[28].mxu0 %vm336_vm0, %v10346_v19 }
  0x43   :  { %8775 = vmatprep.mubr.msk.bf16.mxu0 %vm336_vm0, %v10347_v20 }
  0x4a   :  { %8776 = vmatmul.mubr.msk.bf16.gmra.mrb[32].mxu0 %vm336_vm0, %v10348_v21 }
  0x4b   :  { %8779 = vmatprep.mubr.msk.bf16.mxu0 %vm336_vm0, %v10349_v22 }
  0x4c   :  { %12 = vsyncpa [#allocation4], 0  ;;  %v10350_v23 = vld [vmem:[%s14474_s1 + $0x98] sm:$0xff]   ;;  %v10351_v24 = vld [vmem:[%s14474_s1 + $0xa0] sm:$0xff]   ;;  %v14481_v15 = vmov 1.0   ;;  %vm1836_vm1 = vcmask 254976  }
  0x4d   :  { %v10352_v25 = vld [vmem:[%s14474_s1 + $0xa8] sm:$0xff]   ;;  %v10353_v26 = vld [vmem:[%s14474_s1 + $0xb0] sm:$0xff]   ;;  %v10354_v27 = vld [vmem:[%s14474_s1 + $0xb8] sm:$0xff]   ;;  %1415 = vmatprep.mubr.f32.mxu1 %v14481_v15  ;;  %vm1848_vm2 = vcmask 253952  }
  0x4e   :  { %v10355_v28 = vld [vmem:[%s14474_s1 + $0xc0] sm:$0xff]   ;;  %v10356_v29 = vld [vmem:[%s14474_s1 + $0xc8] sm:$0xff]   ;;  %v10357_v30 = vld [vmem:[%s14474_s1 + $0xd0] sm:$0xff]  }
  0x4f   :  { %v10359_v31 = vld [vmem:[%s14474_s1 + $0xd8] sm:$0xff]   ;;  %v10360_v32 = vld [vmem:[%s14474_s1 + $0xe0] sm:$0xff]   ;;  %v10361_v33 = vld [vmem:[%s14474_s1 + $0xe8] sm:$0xff]  }
  0x50   :  { %v10362_v34 = vld [vmem:[%s14474_s1 + $0xf0] sm:$0xff]   ;;  %v10363_v35 = vld [vmem:[%s14474_s1 + $0xf8] sm:$0xff]   ;;  %v10364_v36 = vld [vmem:[%s14473_s0] sm:$0xff]  }
  0x51   :  { %v10365_v37 = vld [vmem:[%s14473_s0 + $0x8] sm:$0xff]   ;;  %v10366_v38 = vld [vmem:[%s14473_s0 + $0x10] sm:$0xff]   ;;  %v10367_v39 = vld [vmem:[%s14473_s0 + $0x18] sm:$0xff]  }
  0x52   :  { %8780 = vmatmul.mubr.msk.bf16.gmra.mrb[36].mxu0 %vm336_vm0, %v10350_v23  ;;  %v10368_v40 = vld [vmem:[%s14473_s0 + $0x20] sm:$0xff]   ;;  %v10369_v41 = vld [vmem:[%s14473_s0 + $0x28] sm:$0xff]   ;;  %v10370_v42 = vld [vmem:[%s14473_s0 + $0x30] sm:$0xff]  }
  0x53   :  { %8783 = vmatprep.mubr.msk.bf16.mxu0 %vm336_vm0, %v10351_v24  ;;  %v10371_v43 = vld [vmem:[%s14473_s0 + $0x38] sm:$0xff]   ;;  %v10372_v44 = vld [vmem:[%s14473_s0 + $0x40] sm:$0xff]   ;;  %v10373_v45 = vld [vmem:[%s14473_s0 + $0x48] sm:$0xff]  }
  0x54   :  { %v10374_v46 = vld [vmem:[%s14473_s0 + $0x50] sm:$0xff]   ;;  %v10375_v47 = vld [vmem:[%s14473_s0 + $0x58] sm:$0xff]   ;;  %v10376_v48 = vld [vmem:[%s14473_s0 + $0x60] sm:$0xff]  }
  0x55   :  { %v10377_v49 = vld [vmem:[%s14473_s0 + $0x68] sm:$0xff]   ;;  %v10378_v50 = vld [vmem:[%s14473_s0 + $0x70] sm:$0xff]   ;;  %v10379_v51 = vld [vmem:[%s14473_s0 + $0x78] sm:$0xff]  }
  0x56   :  { %v10380_v52 = vld [vmem:[%s14473_s0 + $0x80] sm:$0xff]   ;;  %v10381_v53 = vld [vmem:[%s14473_s0 + $0x88] sm:$0xff]   ;;  %v10382_v54 = vld [vmem:[%s14473_s0 + $0x90] sm:$0xff]  }
  0x57   :  { %v10383_v55 = vld [vmem:[%s14473_s0 + $0x98] sm:$0xff]   ;;  %v10384_v56 = vld [vmem:[%s14473_s0 + $0xa0] sm:$0xff]   ;;  %v10385_v57 = vld [vmem:[%s14473_s0 + $0xa8] sm:$0xff]  }
  0x58   :  { %v10386_v58 = vld [vmem:[%s14473_s0 + $0xb0] sm:$0xff]   ;;  %v10387_v59 = vld [vmem:[%s14473_s0 + $0xb8] sm:$0xff]   ;;  %v10388_v60 = vld [vmem:[%s14473_s0 + $0xc0] sm:$0xff]  }
  0x59   :  { %v10389_v61 = vld [vmem:[%s14473_s0 + $0xc8] sm:$0xff]   ;;  %v10390_v62 = vld [vmem:[%s14473_s0 + $0xd0] sm:$0xff]   ;;  %v10391_v63 = vld [vmem:[%s14473_s0 + $0xd8] sm:$0xff]  }
  0x5a   :  { %8784 = vmatmul.mubr.msk.bf16.gmra.mrb[40].mxu0 %vm336_vm0, %v10352_v25  ;;  %v10392_v0 = vld [vmem:[%s14473_s0 + $0xe0] sm:$0xff]   ;;  %v10393_v1 = vld [vmem:[%s14473_s0 + $0xe8] sm:$0xff]   ;;  %v10394_v2 = vld [vmem:[%s14473_s0 + $0xf0] sm:$0xff]  }
  0x5b   :  { %8787 = vmatprep.mubr.msk.bf16.mxu0 %vm336_vm0, %v10353_v26  ;;  %v10395_v3 = vld [vmem:[%s14473_s0 + $0xf8] sm:$0xff]  }
  0x62   :  { %8788 = vmatmul.mubr.msk.bf16.gmra.mrb[44].mxu0 %vm336_vm0, %v10354_v27 }
  0x63   :  { %8791 = vmatprep.mubr.msk.bf16.mxu0 %vm336_vm0, %v10355_v28 }
  0x6a   :  { %8792 = vmatmul.mubr.msk.bf16.gmra.mrb[48].mxu0 %vm336_vm0, %v10356_v29 }
  0x6b   :  { %8795 = vmatprep.mubr.msk.bf16.mxu0 %vm336_vm0, %v10357_v30 }
  0x72   :  { %8796 = vmatmul.mubr.msk.bf16.gmra.mrb[52].mxu0 %vm336_vm0, %v10359_v31 }
  0x73   :  { %8799 = vmatprep.mubr.msk.bf16.mxu0 %vm336_vm0, %v10360_v32 }
  0x7a   :  { %8800 = vmatmul.mubr.msk.bf16.gmra.mrb[56].mxu0 %vm336_vm0, %v10361_v33 }
  0x7b   :  { %8803 = vmatprep.mubr.msk.bf16.mxu0 %vm336_vm0, %v10362_v34 }
  0x82   :  { %8804 = vmatmul.mubr.msk.bf16.gmra.mrb[60].mxu0 %vm336_vm0, %v10363_v35 }
  0x83   :  { %8811 = vmatprep.mubr.msk.bf16.mxu0 %vm336_vm0, %v10364_v36 }
  0x8a   :  { %8812 = vmatmul.mubr.msk.bf16.vlgmr.msra.gmra.mrb[0].mxu0 %vm336_vm0, %v10365_v37 }
  0x8b   :  { %8815 = vmatprep.mubr.msk.bf16.mxu0 %vm336_vm0, %v10366_v38 }
  0x92   :  { %8816 = vmatmul.mubr.msk.bf16.gmra.mrb[4].mxu0 %vm336_vm0, %v10367_v39 }
  0x93   :  { %8819 = vmatprep.mubr.msk.bf16.mxu0 %vm336_vm0, %v10368_v40 }
  0x9a   :  { %8820 = vmatmul.mubr.msk.bf16.gmra.mrb[8].mxu0 %vm336_vm0, %v10369_v41 }
  0x9b   :  { %8823 = vmatprep.mubr.msk.bf16.mxu0 %vm336_vm0, %v10370_v42 }
  0xa2   :  { %8824 = vmatmul.mubr.msk.bf16.gmra.mrb[12].mxu0 %vm336_vm0, %v10371_v43 }
  0xa3   :  { %8827 = vmatprep.mubr.msk.bf16.mxu0 %vm336_vm0, %v10372_v44 }
  0xaa   :  { %8828 = vmatmul.mubr.msk.bf16.gmra.mrb[16].mxu0 %vm336_vm0, %v10373_v45 }
  0xab   :  { %8831 = vmatprep.mubr.msk.bf16.mxu0 %vm336_vm0, %v10374_v46 }
  0xb2   :  { %8832 = vmatmul.mubr.msk.bf16.gmra.mrb[20].mxu0 %vm336_vm0, %v10375_v47 }
  0xb3   :  { %8835 = vmatprep.mubr.msk.bf16.mxu0 %vm336_vm0, %v10376_v48 }
  0xba   :  { %8836 = vmatmul.mubr.msk.bf16.gmra.mrb[24].mxu0 %vm336_vm0, %v10377_v49 }
  0xbb   :  { %8839 = vmatprep.mubr.msk.bf16.mxu0 %vm336_vm0, %v10378_v50 }
  0xc2   :  { %8840 = vmatmul.mubr.msk.bf16.gmra.mrb[28].mxu0 %vm336_vm0, %v10379_v51 }
  0xc3   :  { %8843 = vmatprep.mubr.msk.bf16.mxu0 %vm336_vm0, %v10380_v52 }
  0xca   :  { %8844 = vmatmul.mubr.msk.bf16.gmra.mrb[32].mxu0 %vm336_vm0, %v10381_v53 }
  0xcb   :  { %8847 = vmatprep.mubr.msk.bf16.mxu0 %vm336_vm0, %v10382_v54 }
  0xd2   :  { %8848 = vmatmul.mubr.msk.bf16.gmra.mrb[36].mxu0 %vm336_vm0, %v10383_v55 }
  0xd3   :  { %8851 = vmatprep.mubr.msk.bf16.mxu0 %vm336_vm0, %v10384_v56 }
  0xda   :  { %8852 = vmatmul.mubr.msk.bf16.gmra.mrb[40].mxu0 %vm336_vm0, %v10385_v57 }
  0xdb   :  { %8855 = vmatprep.mubr.msk.bf16.mxu0 %vm336_vm0, %v10386_v58 }
  0xe2   :  { %8856 = vmatmul.mubr.msk.bf16.gmra.mrb[44].mxu0 %vm336_vm0, %v10387_v59 }
  0xe3   :  { %8859 = vmatprep.mubr.msk.bf16.mxu0 %vm336_vm0, %v10388_v60 }
  0xea   :  { %8860 = vmatmul.mubr.msk.bf16.gmra.mrb[48].mxu0 %vm336_vm0, %v10389_v61 }
  0xeb   :  { %8863 = vmatprep.mubr.msk.bf16.mxu0 %vm336_vm0, %v10390_v62 }
  0xf2   :  { %8864 = vmatmul.mubr.msk.bf16.gmra.mrb[52].mxu0 %vm336_vm0, %v10391_v63 }
  0xf3   :  { %8867 = vmatprep.mubr.msk.bf16.mxu0 %vm336_vm0, %v10392_v0 }
  0xfa   :  { %8868 = vmatmul.mubr.msk.bf16.gmra.mrb[56].mxu0 %vm336_vm0, %v10393_v1 }
  0xfb   :  { %8871 = vmatprep.mubr.msk.bf16.mxu0 %vm336_vm0, %v10394_v2 }
 0x102   :  { %8872 = vmatmul.mubr.msk.bf16.gmra.mrb[60].mxu0 %vm336_vm0, %v10395_v3 }
 0x103   :  { %1345 = vmatprep.mubr.f32.mxu0 %v14481_v15 }
 0x15d   :  { %v10757_v4 = vpop.f32.mrb[0].mxu0 }
 0x15e   :  { %14713 = vst [vmem:[#allocation6_spill] sm:$0xff] %v10757_v4  ;;  %v10759_v5 = vpop.f32.mrb[1].mxu0  ;;  %v10765_v7 = vmul.f32 %v10757_v4, %v10757_v4 }
 0x15f   :  { %14714 = vst [vmem:[#allocation7_spill] sm:$0xff] %v10759_v5  ;;  %v10761_v6 = vpop.f32.mrb[2].mxu0  ;;  %v10777_v11 = vmul.f32 %v10759_v5, %v10759_v5 }
 0x160   :  { %14715 = vst [vmem:[#allocation8_spill] sm:$0xff] %v10761_v6  ;;  %v9493_v8 = vpack.c.bf16 %v10761_v6, %v10757_v4  ;;  %v10771_v9 = vmul.f32 %v10761_v6, %v10761_v6  ;;  %v10773_v10 = vpop.f32.mrb[3].mxu0 }
 0x161   :  { %14716 = vst [vmem:[#allocation9_spill] sm:$0xff] %v10773_v10  ;;  %v9489_v12 = vpack.c.bf16 %v10773_v10, %v10759_v5  ;;  %v10783_v13 = vmul.f32 %v10773_v10, %v10773_v10 }
 0x165   :  { %v10791_v17 = vpop.f32.mrb[4].mxu0 }
 0x166   :  { %14717 = vst [vmem:[#allocation10_spill] sm:$0xff] %v10791_v17  ;;  %v10793_v18 = vpop.f32.mrb[5].mxu0  ;;  %v10799_v20 = vmul.f32 %v10791_v17, %v10791_v17 }
 0x167   :  { %14718 = vst [vmem:[#allocation11_spill] sm:$0xff] %v10793_v18  ;;  %v10795_v19 = vpop.f32.mrb[6].mxu0  ;;  %v10811_v24 = vmul.f32 %v10793_v18, %v10793_v18 }
 0x168   :  { %14719 = vst [vmem:[#allocation12_spill] sm:$0xff] %v10795_v19  ;;  %v9501_v21 = vpack.c.bf16 %v10795_v19, %v10791_v17  ;;  %v10805_v22 = vmul.f32 %v10795_v19, %v10795_v19  ;;  %v10807_v23 = vpop.f32.mrb[7].mxu0 }
 0x169   :  { %14720 = vst [vmem:[#allocation13_spill] sm:$0xff] %v10807_v23  ;;  %v9497_v25 = vpack.c.bf16 %v10807_v23, %v10793_v18  ;;  %v10817_v26 = vmul.f32 %v10807_v23, %v10807_v23 }
 0x16d   :  { %v10823_v29 = vpop.f32.mrb[8].mxu0 }
 0x16e   :  { %14721 = vst [vmem:[#allocation14_spill] sm:$0xff] %v10823_v29  ;;  %v10825_v30 = vpop.f32.mrb[9].mxu0  ;;  %v10831_v32 = vmul.f32 %v10823_v29, %v10823_v29 }
 0x16f   :  { %14722 = vst [vmem:[#allocation15_spill] sm:$0xff] %v10825_v30  ;;  %v10827_v31 = vpop.f32.mrb[10].mxu0  ;;  %v10843_v36 = vmul.f32 %v10825_v30, %v10825_v30 }
 0x170   :  { %14723 = vst [vmem:[#allocation16_spill] sm:$0xff] %v10827_v31  ;;  %v10837_v34 = vmul.f32 %v10827_v31, %v10827_v31  ;;  %v10839_v35 = vpop.f32.mrb[11].mxu0 }
 0x171   :  { %14724 = vst [vmem:[#allocation17_spill] sm:$0xff] %v10839_v35  ;;  %v9505_v37 = vpack.c.bf16 %v10839_v35, %v10825_v30  ;;  %v10849_v38 = vmul.f32 %v10839_v35, %v10839_v35 }
 0x175   :  { %v10855_v41 = vpop.f32.mrb[12].mxu0 }
 0x176   :  { %14725 = vst [vmem:[#allocation18_spill] sm:$0xff] %v10855_v41  ;;  %v10857_v42 = vpop.f32.mrb[13].mxu0  ;;  %v10863_v44 = vmul.f32 %v10855_v41, %v10855_v41 }
 0x177   :  { %14726 = vst [vmem:[#allocation19_spill] sm:$0xff] %v10857_v42  ;;  %v10859_v43 = vpop.f32.mrb[14].mxu0  ;;  %v10875_v48 = vmul.f32 %v10857_v42, %v10857_v42 }
 0x178   :  { %14727 = vst [vmem:[#allocation20_spill] sm:$0xff] %v10859_v43  ;;  %v10869_v46 = vmul.f32 %v10859_v43, %v10859_v43  ;;  %v10871_v47 = vpop.f32.mrb[15].mxu0 }
 0x179   :  { %14728 = vst [vmem:[#allocation21_spill] sm:$0xff] %v10871_v47  ;;  %v10881_v50 = vmul.f32 %v10871_v47, %v10871_v47 }
 0x17d   :  { %v10887_v53 = vpop.f32.mrb[16].mxu0 }
 0x17e   :  { %14729 = vst [vmem:[#allocation22_spill] sm:$0xff] %v10887_v53  ;;  %v10889_v54 = vpop.f32.mrb[17].mxu0  ;;  %v10895_v56 = vmul.f32 %v10887_v53, %v10887_v53 }
 0x17f   :  { %14730 = vst [vmem:[#allocation23_spill] sm:$0xff] %v10889_v54  ;;  %v10891_v55 = vpop.f32.mrb[18].mxu0  ;;  %v10907_v60 = vmul.f32 %v10889_v54, %v10889_v54 }
 0x180   :  { %14731 = vst [vmem:[#allocation24_spill] sm:$0xff] %v10891_v55  ;;  %v9491_v57 = vpack.c.bf16 %v10891_v55, %v10887_v53  ;;  %v10901_v58 = vmul.f32 %v10891_v55, %v10891_v55  ;;  %v10903_v59 = vpop.f32.mrb[19].mxu0  ;;  %v14752_v55 = vmov 1.0  }
 0x181   :  { %14732 = vst [vmem:[#allocation25_spill] sm:$0xff] %v10903_v59  ;;  %v9487_v61 = vpack.c.bf16 %v10903_v59, %v10889_v54  ;;  %v10913_v62 = vmul.f32 %v10903_v59, %v10903_v59 }
 0x183   :  { %9488 = vmatprep.subr.bf16.mxu0 %v9487_v61 }
 0x184   :  { %9490 = vmatpush3.bf16.msra.mxu0 %v9489_v12 }
 0x185   :  { %v10919_v1 = vpop.f32.mrb[20].mxu0  ;;  %9492 = vmatprep.subr.bf16.mxu0 %v9491_v57 }
 0x186   :  { %14733 = vst [vmem:[#allocation26_spill] sm:$0xff] %v10919_v1  ;;  %v10921_v2 = vpop.f32.mrb[21].mxu0  ;;  %v10927_v51 = vmul.f32 %v10919_v1, %v10919_v1 }
 0x187   :  { %14734 = vst [vmem:[#allocation27_spill] sm:$0xff] %v10921_v2  ;;  %v10923_v3 = vpop.f32.mrb[22].mxu0  ;;  %v10942_v12 = vmul.f32 %v10921_v2, %v10921_v2 }
 0x188   :  { %14735 = vst [vmem:[#allocation28_spill] sm:$0xff] %v10923_v3  ;;  %v9499_v52 = vpack.c.bf16 %v10923_v3, %v10919_v1  ;;  %v10933_v61 = vmul.f32 %v10923_v3, %v10923_v3  ;;  %v10935_v39 = vpop.f32.mrb[23].mxu0  ;;  %9494 = vmatpush3.bf16.msra.mxu0 %v9493_v8 }
 0x189   :  { %14736 = vst [vmem:[#allocation29_spill] sm:$0xff] %v10935_v39  ;;  %v9495_v57 = vpack.c.bf16 %v10935_v39, %v10921_v2  ;;  %v10948_v40 = vmul.f32 %v10935_v39, %v10935_v39 }
 0x18b   :  { %9496 = vmatprep.subr.bf16.mxu0 %v9495_v57 }
 0x18c   :  { %9498 = vmatpush3.bf16.msra.mxu0 %v9497_v25 }
 0x18d   :  { %v10954_v8 = vpop.f32.mrb[24].mxu0  ;;  %9500 = vmatprep.subr.bf16.mxu0 %v9499_v52 }
 0x18e   :  { %14737 = vst [vmem:[#allocation30_spill] sm:$0xff] %v10954_v8  ;;  %v10956_v14 = vpop.f32.mrb[25].mxu0  ;;  %v10962_v16 = vmul.f32 %v10954_v8, %v10954_v8 }
 0x18f   :  { %14738 = vst [vmem:[#allocation31_spill] sm:$0xff] %v10956_v14  ;;  %v10958_v63 = vpop.f32.mrb[26].mxu0  ;;  %v10977_v25 = vmul.f32 %v10956_v14, %v10956_v14 }
 0x190   :  { %14739 = vst [vmem:[#allocation32_spill] sm:$0xff] %v10958_v63  ;;  %v9507_v0 = vpack.c.bf16 %v10958_v63, %v10954_v8  ;;  %v10968_v57 = vmul.f32 %v10958_v63, %v10958_v63  ;;  %v10970_v27 = vpop.f32.mrb[27].mxu0  ;;  %9502 = vmatpush3.bf16.msra.mxu0 %v9501_v21 }
 0x191   :  { %14740 = vst [vmem:[#allocation33_spill] sm:$0xff] %v10970_v27  ;;  %v9503_v52 = vpack.c.bf16 %v10970_v27, %v10956_v14  ;;  %v10983_v28 = vmul.f32 %v10970_v27, %v10970_v27 }
 0x193   :  { %9504 = vmatprep.subr.bf16.mxu0 %v9503_v52 }
 0x194   :  { %9506 = vmatpush3.bf16.msra.mxu0 %v9505_v37  ;;  %v14745_v37 = vpack.c.bf16 %v10827_v31, %v10823_v29 }
 0x195   :  { %v10989_v21 = vpop.f32.mrb[28].mxu0  ;;  %9508 = vmatprep.subr.bf16.mxu0 %v9507_v0 }
 0x196   :  { %14741 = vst [vmem:[#allocation34_spill] sm:$0xff] %v10989_v21  ;;  %v10991_v49 = vpop.f32.mrb[29].mxu0  ;;  %v10997_v63 = vmul.f32 %v10989_v21, %v10989_v21 }
 0x197   :  { %14742 = vst [vmem:[#allocation35_spill] sm:$0xff] %v10991_v49  ;;  %v10993_v33 = vpop.f32.mrb[30].mxu0  ;;  %v11012_v0 = vmul.f32 %v10991_v49, %v10991_v49 }
 0x198   :  { %14743 = vst [vmem:[#allocation36_spill] sm:$0xff] %v10993_v33  ;;  %v9515_v8 = vpack.c.bf16 %v10993_v33, %v10989_v21  ;;  %v11003_v52 = vmul.f32 %v10993_v33, %v10993_v33  ;;  %v11005_v15 = vpop.f32.mrb[31].mxu0  ;;  %9510 = vmatpush3.bf16.msra.mxu0 %v14745_v37  ;;  %v14746_v37 = vpack.c.bf16 %v10871_v47, %v10857_v42 }
 0x199   :  { %14744 = vst [vmem:[#allocation37_spill] sm:$0xff] %v11005_v15  ;;  %v9511_v45 = vpack.c.bf16 %v11005_v15, %v10991_v49  ;;  %v11018_v21 = vmul.f32 %v11005_v15, %v11005_v15 }
 0x19b   :  { %9512 = vmatprep.subr.bf16.mxu0 %v9511_v45 }
 0x19c   :  { %9514 = vmatpush3.bf16.msra.mxu0 %v14746_v37 }
 0x19d   :  { %v11027_v14 = vpop.f32.mrb[32].mxu0  ;;  %9516 = vmatprep.subr.bf16.mxu0 %v9515_v8  ;;  %v14751_v8 = vpack.c.bf16 %v10859_v43, %v10855_v41 }
 0x19e   :  { %14747 = vst [vmem:[#allocation38_spill] sm:$0xff] %v11027_v14  ;;  %v11029_v3 = vpop.f32.mrb[33].mxu0  ;;  %v11035_v15 = vmul.f32 %v11027_v14, %v11027_v14 }
 0x19f   :  { %14748 = vst [vmem:[#allocation39_spill] sm:$0xff] %v11029_v3  ;;  %v11031_v49 = vpop.f32.mrb[34].mxu0  ;;  %v11050_v37 = vmul.f32 %v11029_v3, %v11029_v3 }
 0x1a0   :  { %14749 = vst [vmem:[#allocation40_spill] sm:$0xff] %v11031_v49  ;;  %v11041_v33 = vmul.f32 %v11031_v49, %v11031_v49  ;;  %v11043_v27 = vpop.f32.mrb[35].mxu0  ;;  %9518 = vmatpush3.bf16.msra.mxu0 %v14751_v8 }
 0x1a1   :  { %14750 = vst [vmem:[#allocation41_spill] sm:$0xff] %v11043_v27  ;;  %v11054_v1 = vmul.f32 %v11043_v27, %v11043_v27  ;;  %v9521_v45 = vpack.c.bf16 %v11043_v27, %v11029_v3 }
 0x1a3   :  { %1346 = vmatmul.mubr.f32.vlgmr.msra.gmra.mrb[64].mxu0 %v14752_v55 }
 0x1a5   :  { %v11063_v8 = vpop.f32.mrb[36].mxu0 }
 0x1a6   :  { %v11065_v53 = vpop.f32.mrb[37].mxu0  ;;  %v11071_v54 = vmul.f32 %v11063_v8, %v11063_v8 }
 0x1a7   :  { %14753 = vst [vmem:[#allocation42_spill] sm:$0xff] %v11065_v53  ;;  %v11067_v59 = vpop.f32.mrb[38].mxu0  ;;  %v11083_v3 = vmul.f32 %v11065_v53, %v11065_v53 }
 0x1a8   :  { %14754 = vst [vmem:[#allocation43_spill] sm:$0xff] %v11067_v59  ;;  %14755 = vst [vmem:[#allocation44_spill] sm:$0xff] %v11071_v54  ;;  %v11077_v39 = vmul.f32 %v11067_v59, %v11067_v59  ;;  %v11079_v2 = vpop.f32.mrb[39].mxu0 }
 0x1a9   :  { %14757 = vst [vmem:[#allocation46_spill] sm:$0xff] %v11079_v2  ;;  %14758 = vst [vmem:[#allocation47_spill] sm:$0xff] %v11083_v3  ;;  %v9529_v43 = vpack.c.bf16 %v11079_v2, %v11065_v53  ;;  %v11089_v41 = vmul.f32 %v11079_v2, %v11079_v2 }
 0x1aa   :  { %14756 = vst [vmem:[#allocation45_spill] sm:$0xff] %v11077_v39 }
 0x1ab   :  { %14759 = vst [vmem:[#allocation48_spill] sm:$0xff] %v11089_v41 }
 0x1ad   :  { %v11095_v42 = vpop.f32.mrb[40].mxu0 }
 0x1ae   :  { %v11097_v31 = vpop.f32.mrb[41].mxu0  ;;  %v11103_v35 = vmul.f32 %v11095_v42, %v11095_v42 }
 0x1af   :  { %14760 = vst [vmem:[#allocation49_spill] sm:$0xff] %v11097_v31  ;;  %v11099_v29 = vpop.f32.mrb[42].mxu0  ;;  %v11115_v47 = vmul.f32 %v11097_v31, %v11097_v31 }
 0x1b0   :  { %14761 = vst [vmem:[#allocation50_spill] sm:$0xff] %v11103_v35  ;;  %v11109_v53 = vmul.f32 %v11099_v29, %v11099_v29  ;;  %v11111_v27 = vpop.f32.mrb[43].mxu0 }
 0x1b1   :  { %14763 = vst [vmem:[#allocation52_spill] sm:$0xff] %v11111_v27  ;;  %14764 = vst [vmem:[#allocation53_spill] sm:$0xff] %v11115_v47  ;;  %v9537_v30 = vpack.c.bf16 %v11111_v27, %v11097_v31  ;;  %v11121_v19 = vmul.f32 %v11111_v27, %v11111_v27 }
 0x1b2   :  { %14762 = vst [vmem:[#allocation51_spill] sm:$0xff] %v11109_v53 }
 0x1b3   :  { %14765 = vst [vmem:[#allocation54_spill] sm:$0xff] %v11121_v19 }
 0x1b5   :  { %v11127_v23 = vpop.f32.mrb[44].mxu0 }
 0x1b6   :  { %v11129_v18 = vpop.f32.mrb[45].mxu0  ;;  %v11135_v4 = vmul.f32 %v11127_v23, %v11127_v23 }
 0x1b7   :  { %v11131_v6 = vpop.f32.mrb[46].mxu0  ;;  %v11147_v17 = vmul.f32 %v11129_v18, %v11129_v18 }
 0x1b8   :  { %14766 = vst [vmem:[#allocation55_spill] sm:$0xff] %v11135_v4  ;;  %v11141_v31 = vmul.f32 %v11131_v6, %v11131_v6  ;;  %v11143_v2 = vpop.f32.mrb[47].mxu0 }
 0x1b9   :  { %14768 = vst [vmem:[#allocation57_spill] sm:$0xff] %v11147_v17  ;;  %v11153_v5 = vmul.f32 %v11143_v2, %v11143_v2 }
 0x1ba   :  { %14767 = vst [vmem:[#allocation56_spill] sm:$0xff] %v11141_v31 }
 0x1bb   :  { %14769 = vst [vmem:[#allocation58_spill] sm:$0xff] %v11153_v5 }
 0x1bd   :  { %v11159_v53 = vpop.f32.mrb[48].mxu0 }
 0x1be   :  { %14770 = vst [vmem:[#allocation59_spill] sm:$0xff] %v11159_v53  ;;  %v11161_v47 = vpop.f32.mrb[49].mxu0  ;;  %v11167_v54 = vmul.f32 %v11159_v53, %v11159_v53 }
 0x1bf   :  { %14771 = vst [vmem:[#allocation60_spill] sm:$0xff] %v11161_v47  ;;  %v11163_v19 = vpop.f32.mrb[50].mxu0  ;;  %v11179_v35 = vmul.f32 %v11161_v47, %v11161_v47 }
 0x1c0   :  { %14772 = vst [vmem:[#allocation61_spill] sm:$0xff] %v11163_v19  ;;  %v9523_v10 = vpack.c.bf16 %v11163_v19, %v11159_v53  ;;  %v11173_v39 = vmul.f32 %v11163_v19, %v11163_v19  ;;  %v11175_v27 = vpop.f32.mrb[51].mxu0 }
 0x1c1   :  { %14773 = vst [vmem:[#allocation62_spill] sm:$0xff] %v11175_v27  ;;  %v11183_v4 = vmul.f32 %v11175_v27, %v11175_v27  ;;  %v9519_v31 = vpack.c.bf16 %v11175_v27, %v11161_v47 }
 0x1c3   :  { %9520 = vmatprep.subr.bf16.mxu1 %v9519_v31 }
 0x1c4   :  { %9522 = vmatpush3.bf16.msra.mxu1 %v9521_v45 }
 0x1c5   :  { %v11191_v17 = vpop.f32.mrb[52].mxu0  ;;  %9524 = vmatprep.subr.bf16.mxu1 %v9523_v10  ;;  %v14780_v10 = vpack.c.bf16 %v11031_v49, %v11027_v14 }
 0x1c6   :  { %14774 = vst [vmem:[#allocation63_spill] sm:$0xff] %v11191_v17  ;;  %v11193_v5 = vpop.f32.mrb[53].mxu0  ;;  %v11199_v41 = vmul.f32 %v11191_v17, %v11191_v17 }
 0x1c7   :  { %14775 = vst [vmem:[#allocation64_spill] sm:$0xff] %v11193_v5  ;;  %v11195_v3 = vpop.f32.mrb[54].mxu0  ;;  %v11214_v45 = vmul.f32 %v11193_v5, %v11193_v5 }
 0x1c8   :  { %14776 = vst [vmem:[#allocation65_spill] sm:$0xff] %v11195_v3  ;;  %14777 = vst [vmem:[#allocation66_spill] sm:$0xff] %v11199_v41  ;;  %v9531_v27 = vpack.c.bf16 %v11195_v3, %v11191_v17  ;;  %v11205_v31 = vmul.f32 %v11195_v3, %v11195_v3  ;;  %v11207_v53 = vpop.f32.mrb[55].mxu0  ;;  %9526 = vmatpush3.bf16.msra.mxu1 %v14780_v10 }
 0x1c9   :  { %14779 = vst [vmem:[#allocation68_spill] sm:$0xff] %v11207_v53  ;;  %v9527_v19 = vpack.c.bf16 %v11207_v53, %v11193_v5  ;;  %v11220_v17 = vmul.f32 %v11207_v53, %v11207_v53 }
 0x1ca   :  { %14778 = vst [vmem:[#allocation67_spill] sm:$0xff] %v11205_v31 }
 0x1cb   :  { %9528 = vmatprep.subr.bf16.mxu1 %v9527_v19  ;;  %v9591_v47 = vpack.c.bf16 %v11220_v17, %v11214_v45  ;;  %v14785_v17 = vpack.c.bf16 %v11067_v59, %v11063_v8 }
 0x1cc   :  { %9530 = vmatpush3.bf16.msra.mxu1 %v9529_v43 }
 0x1cd   :  { %v11226_v10 = vpop.f32.mrb[56].mxu0  ;;  %9532 = vmatprep.subr.bf16.mxu1 %v9531_v27 }
 0x1ce   :  { %14781 = vst [vmem:[#allocation69_spill] sm:$0xff] %v11226_v10  ;;  %v11228_v49 = vpop.f32.mrb[57].mxu0  ;;  %v1480_v5 = vmul.f32 %v11226_v10, %v11226_v10 }
 0x1cf   :  { %14782 = vst [vmem:[#allocation70_spill] sm:$0xff] %v11228_v49  ;;  %v11230_v14 = vpop.f32.mrb[58].mxu0  ;;  %v1478_v27 = vmul.f32 %v11228_v49, %v11228_v49 }
 0x1d0   :  { %14783 = vst [vmem:[#allocation71_spill] sm:$0xff] %v11230_v14  ;;  %v9539_v53 = vpack.c.bf16 %v11230_v14, %v11226_v10  ;;  %v1481_v19 = vmul.f32 %v11230_v14, %v11230_v14  ;;  %v11238_v3 = vpop.f32.mrb[59].mxu0  ;;  %9534 = vmatpush3.bf16.msra.mxu1 %v14785_v17 }
 0x1d1   :  { %14784 = vst [vmem:[#allocation72_spill] sm:$0xff] %v11238_v3  ;;  %v9535_v43 = vpack.c.bf16 %v11238_v3, %v11228_v49  ;;  %v1479_v45 = vmul.f32 %v11238_v3, %v11238_v3 }
 0x1d2   :  { %v9603_v41 = vpack.c.bf16 %v1481_v19, %v1480_v5 }
 0x1d3   :  { %9536 = vmatprep.subr.bf16.mxu1 %v9535_v43  ;;  %v9599_v10 = vpack.c.bf16 %v1479_v45, %v1478_v27 }
 0x1d4   :  { %9538 = vmatpush3.bf16.msra.mxu1 %v9537_v30  ;;  %v14788_v30 = vpack.c.bf16 %v11099_v29, %v11095_v42 }
 0x1d5   :  { %v11249_v14 = vpop.f32.mrb[60].mxu0  ;;  %9540 = vmatprep.subr.bf16.mxu1 %v9539_v53 }
 0x1d6   :  { %14786 = vst [vmem:[#allocation73_spill] sm:$0xff] %v11249_v14  ;;  %v11251_v31 = vpop.f32.mrb[61].mxu0  ;;  %v1484_v17 = vmul.f32 %v11249_v14, %v11249_v14 }
 0x1d7   :  { %v11253_v59 = vpop.f32.mrb[62].mxu0  ;;  %v1482_v53 = vmul.f32 %v11251_v31, %v11251_v31 }
 0x1d8   :  { %14787 = vst [vmem:[#allocation74_spill] sm:$0xff] %v11253_v59  ;;  %v9547_v49 = vpack.c.bf16 %v11253_v59, %v11249_v14  ;;  %v1485_v3 = vmul.f32 %v11253_v59, %v11253_v59  ;;  %v11261_v5 = vpop.f32.mrb[63].mxu0  ;;  %9542 = vmatpush3.bf16.msra.mxu1 %v14788_v30  ;;  %v14789_v59 = vpack.c.bf16 %v11143_v2, %v11129_v18 }
 0x1d9   :  { %v9543_v19 = vpack.c.bf16 %v11261_v5, %v11251_v31  ;;  %v1483_v27 = vmul.f32 %v11261_v5, %v11261_v5  ;;  %v14790_v30 = vpack.c.bf16 %v11131_v6, %v11127_v23  ;;  %v14791_v14 = vpack.c.bf16 %v10913_v62, %v10907_v60  ;;  %v14826_v62 = vld [vmem:[#allocation58_spill] sm:$0xff] }
 0x1da   :  { %v9611_v43 = vpack.c.bf16 %v1485_v3, %v1484_v17  ;;  %v14792_v3 = vpack.c.bf16 %v10783_v13, %v10777_v11  ;;  %v14795_v60 = vpack.c.bf16 %v10948_v40, %v10942_v12  ;;  %v14797_v11 = vpack.c.bf16 %v10933_v61, %v10927_v51  ;;  %v14811_v40 = vld [vmem:[#allocation48_spill] sm:$0xff]  ;;  %v14830_v12 = vld [vmem:[#allocation55_spill] sm:$0xff] }
 0x1db   :  { %9544 = vmatprep.subr.bf16.mxu1 %v9543_v19  ;;  %v9607_v45 = vpack.c.bf16 %v1483_v27, %v1482_v53  ;;  %v14798_v13 = vpack.c.bf16 %v10805_v22, %v10799_v20  ;;  %v14803_v20 = vpack.c.bf16 %v11018_v21, %v11012_v0  ;;  %v14804_v22 = vpack.c.bf16 %v10881_v50, %v10875_v48  ;;  %v14817_v50 = vld [vmem:[#allocation45_spill] sm:$0xff]  ;;  %v14818_v51 = vld [vmem:[#allocation44_spill] sm:$0xff] }
 0x1dc   :  { %9546 = vmatpush3.bf16.msra.mxu1 %v14789_v59  ;;  %v14793_v59 = vpack.c.bf16 %v10901_v58, %v10895_v56  ;;  %v14819_v56 = vpack.c.bf16 %v14817_v50, %v14818_v51  ;;  %v14829_v61 = vld [vmem:[#allocation56_spill] sm:$0xff]  ;;  %v10445_v17 = vmov 0.0   ;;  %v11399_v27 = vld [vmem:[%s14477_s4 + $0x18] sm:$0xff]  }
 0x1dd   :  { %9548 = vmatprep.subr.bf16.mxu1 %v9547_v49  ;;  %v14794_v49 = vpack.c.bf16 %v10771_v9, %v10765_v7  ;;  %v14799_v7 = vpack.c.bf16 %v10983_v28, %v10977_v25  ;;  %v14800_v9 = vpack.c.bf16 %v10849_v38, %v10843_v36  ;;  %v14805_v28 = vpack.c.bf16 %v11003_v52, %v10997_v63  ;;  %v14827_v63 = vld [vmem:[#allocation57_spill] sm:$0xff]  ;;  %v11389_v53 = vld [vmem:[%s14477_s4 + $0x10] sm:$0xff]  }
 0x1de   :  { %v14809_v36 = vpack.c.bf16 %v11173_v39, %v11167_v54  ;;  %v14810_v38 = vpack.c.bf16 %v11041_v33, %v11035_v15  ;;  %v14820_v39 = vld [vmem:[#allocation54_spill] sm:$0xff]  ;;  %v14821_v54 = vld [vmem:[#allocation53_spill] sm:$0xff]  ;;  %v14823_v15 = vld [vmem:[#allocation51_spill] sm:$0xff]  ;;  %1834 = vst.msk [vmem:[#allocation2] sm:$0xff] %vm336_vm0, %v10445_v17  ;;  %8875 = vmatprep.subr.bf16.mxu0 %v11389_v53 }
 0x1df   :  { %v14822_v58 = vpack.c.bf16 %v14820_v39, %v14821_v54  ;;  %v14824_v33 = vld [vmem:[#allocation50_spill] sm:$0xff]  ;;  %1835 = vst.msk [vmem:[#allocation2 + $0x8] sm:$0xff] %vm336_vm0, %v10445_v17  ;;  %1838 = vst.msk [vmem:[#allocation2 + $0x1b0] sm:$0xff] %vm336_vm0, %v10445_v17  ;;  %v11394_v19 = vld [vmem:[%s14477_s4 + $0x30] sm:$0xff]   ;;  %8876 = vmatpush3.bf16.msra.mxu0 %v11389_v53 }
 0x1e0   :  { %9550 = vmatpush3.bf16.msra.mxu1 %v14790_v30  ;;  %1837 = vst.msk [vmem:[#allocation2 + $0x10] sm:$0x3] %vm1836_vm1, %v10445_v17  ;;  %1840 = vst.msk [vmem:[#allocation2 + $0x1c0] sm:$0x3] %vm1836_vm1, %v10445_v17  ;;  %8877 = vmatprep.subr.bf16.mxu0 %v11399_v27  ;;  %v14835_v51 = vld [vmem:[#allocation9_spill] sm:$0xff]  ;;  %v14836_v39 = vld [vmem:[#allocation6_spill] sm:$0xff] }
 0x1e1   :  { %9552 = vmatprep.subr.bf16.mxu1 %v14791_v14  ;;  %v14796_v14 = vpack.c.bf16 %v10817_v26, %v10811_v24  ;;  %v14801_v24 = vpack.c.bf16 %v10968_v57, %v10962_v16  ;;  %v14802_v26 = vpack.c.bf16 %v10837_v34, %v10831_v32  ;;  %v14806_v16 = vpack.c.bf16 %v10869_v46, %v10863_v44  ;;  %v14814_v44 = vld [vmem:[#allocation67_spill] sm:$0xff]  ;;  %v14815_v46 = vld [vmem:[#allocation66_spill] sm:$0xff] }
 0x1e2   :  { %v14807_v32 = vpack.c.bf16 %v11183_v4, %v11179_v35  ;;  %v14808_v34 = vpack.c.bf16 %v11054_v1, %v11050_v37  ;;  %v14812_v4 = vld [vmem:[#allocation47_spill] sm:$0xff]  ;;  %v14816_v48 = vpack.c.bf16 %v14814_v44, %v14815_v46  ;;  %v14828_v1 = vpack.c.bf16 %v14826_v62, %v14827_v63  ;;  %1839 = vst.msk [vmem:[#allocation2 + $0x1b8] sm:$0xff] %vm336_vm0, %v10445_v17  ;;  %v14839_v62 = vld [vmem:[#allocation13_spill] sm:$0xff] }
 0x1e3   :  { %1416 = vmatmul.mubr.f32.vlgmr.msra.gmra.mrb[0].mxu1 %v14752_v55  ;;  %v14813_v35 = vpack.c.bf16 %v14811_v40, %v14812_v4  ;;  %v14831_v57 = vpack.c.bf16 %v14829_v61, %v14830_v12  ;;  %1842 = vst.msk [vmem:[#allocation2 + $0x198] sm:$0xff] %vm336_vm0, %v10445_v17  ;;  %1843 = vst.msk [vmem:[#allocation2 + $0x1a0] sm:$0xff] %vm336_vm0, %v10445_v17  ;;  %8878 = vmatpush3.bf16.msra.mxu0 %v11399_v27  ;;  %v1280_v4 = vld [vmem:[%s14479_s6] sm:$0x1] }
 0x1e4   :  { %9554 = vmatpush3.bf16.msra.mxu1 %v14792_v3  ;;  %1550 = vmatprep.mubr.f32.mxu1 %v14752_v55  ;;  %1844 = vst.msk [vmem:[#allocation2 + $0x1a8] sm:$0x3] %vm1836_vm1, %v10445_v17  ;;  %1847 = vst.msk [vmem:[#allocation2 + $0x358] sm:$0x3] %vm1836_vm1, %v10445_v17 }
 0x1e5   :  { %9556 = vmatprep.subr.bf16.mxu1 %v14793_v59  ;;  %1845 = vst.msk [vmem:[#allocation2 + $0x348] sm:$0xff] %vm336_vm0, %v10445_v17  ;;  %1846 = vst.msk [vmem:[#allocation2 + $0x350] sm:$0xff] %vm336_vm0, %v10445_v17 }
 0x1e6   :  { %1870 = vst.msk [vmem:[#allocation2 + $0x1f8] sm:$0x1] %vm1848_vm2, %v10445_v17  ;;  %1849 = vst.msk [vmem:[#allocation2] sm:$0x1] %vm1848_vm2, %v10445_v17 }
 0x1e7   :  { %1850 = vst.msk [vmem:[#allocation2 + $0x18] sm:$0x1] %vm1848_vm2, %v10445_v17  ;;  %1851 = vst.msk [vmem:[#allocation2 + $0x30] sm:$0x1] %vm1848_vm2, %v10445_v17  ;;  %v2087_v30 = vld [vmem:[#allocation2 + $0x9] sm:$0xff] }
 0x1e8   :  { %9558 = vmatpush3.bf16.msra.mxu1 %v14794_v49  ;;  %1852 = vst.msk [vmem:[#allocation2 + $0x48] sm:$0x1] %vm1848_vm2, %v10445_v17  ;;  %1853 = vst.msk [vmem:[#allocation2 + $0x60] sm:$0x1] %vm1848_vm2, %v10445_v17 }
 0x1e9   :  { %9560 = vmatprep.subr.bf16.mxu1 %v14795_v60  ;;  %1854 = vst.msk [vmem:[#allocation2 + $0x78] sm:$0x1] %vm1848_vm2, %v10445_v17  ;;  %1855 = vst.msk [vmem:[#allocation2 + $0x90] sm:$0x1] %vm1848_vm2, %v10445_v17 }
 0x1ea   :  { %1856 = vst.msk [vmem:[#allocation2 + $0xa8] sm:$0x1] %vm1848_vm2, %v10445_v17  ;;  %1857 = vst.msk [vmem:[#allocation2 + $0xc0] sm:$0x1] %vm1848_vm2, %v10445_v17 }
 0x1eb   :  { %1858 = vst.msk [vmem:[#allocation2 + $0xd8] sm:$0x1] %vm1848_vm2, %v10445_v17  ;;  %1859 = vst.msk [vmem:[#allocation2 + $0xf0] sm:$0x1] %vm1848_vm2, %v10445_v17 }
 0x1ec   :  { %9562 = vmatpush3.bf16.msra.mxu1 %v14796_v14  ;;  %1860 = vst.msk [vmem:[#allocation2 + $0x108] sm:$0x1] %vm1848_vm2, %v10445_v17  ;;  %1861 = vst.msk [vmem:[#allocation2 + $0x120] sm:$0x1] %vm1848_vm2, %v10445_v17  ;;  %v11558_v14 = vld [vmem:[%s14477_s4 + $0x40] sm:$0xff]  }
 0x1ed   :  { %9564 = vmatprep.subr.bf16.mxu1 %v14797_v11  ;;  %1862 = vst.msk [vmem:[#allocation2 + $0x138] sm:$0x1] %vm1848_vm2, %v10445_v17  ;;  %1863 = vst.msk [vmem:[#allocation2 + $0x150] sm:$0x1] %vm1848_vm2, %v10445_v17 }
 0x1ee   :  { %1864 = vst.msk [vmem:[#allocation2 + $0x168] sm:$0x1] %vm1848_vm2, %v10445_v17  ;;  %1865 = vst.msk [vmem:[#allocation2 + $0x180] sm:$0x1] %vm1848_vm2, %v10445_v17 }
 0x1ef   :  { %1866 = vst.msk [vmem:[#allocation2 + $0x198] sm:$0x1] %vm1848_vm2, %v10445_v17  ;;  %1867 = vst.msk [vmem:[#allocation2 + $0x1b0] sm:$0x1] %vm1848_vm2, %v10445_v17 }
 0x1f0   :  { %9566 = vmatpush3.bf16.msra.mxu1 %v14798_v13  ;;  %1868 = vst.msk [vmem:[#allocation2 + $0x1c8] sm:$0x1] %vm1848_vm2, %v10445_v17  ;;  %1869 = vst.msk [vmem:[#allocation2 + $0x1e0] sm:$0x1] %vm1848_vm2, %v10445_v17 }
 0x1f1   :  { %9568 = vmatprep.subr.bf16.mxu1 %v14799_v7  ;;  %1871 = vst.msk [vmem:[#allocation2 + $0x210] sm:$0x1] %vm1848_vm2, %v10445_v17  ;;  %1872 = vst.msk [vmem:[#allocation2 + $0x228] sm:$0x1] %vm1848_vm2, %v10445_v17 }
 0x1f2   :  { %1873 = vst.msk [vmem:[#allocation2 + $0x240] sm:$0x1] %vm1848_vm2, %v10445_v17  ;;  %1874 = vst.msk [vmem:[#allocation2 + $0x258] sm:$0x1] %vm1848_vm2, %v10445_v17 }
 0x1f3   :  { %1875 = vst.msk [vmem:[#allocation2 + $0x270] sm:$0x1] %vm1848_vm2, %v10445_v17  ;;  %1876 = vst.msk [vmem:[#allocation2 + $0x288] sm:$0x1] %vm1848_vm2, %v10445_v17 }
 0x1f4   :  { %9570 = vmatpush3.bf16.msra.mxu1 %v14800_v9  ;;  %1877 = vst.msk [vmem:[#allocation2 + $0x2a0] sm:$0x1] %vm1848_vm2, %v10445_v17  ;;  %1878 = vst.msk [vmem:[#allocation2 + $0x2b8] sm:$0x1] %vm1848_vm2, %v10445_v17 }
 0x1f5   :  { %9572 = vmatprep.subr.bf16.mxu1 %v14801_v24  ;;  %1879 = vst.msk [vmem:[#allocation2 + $0x2d0] sm:$0x1] %vm1848_vm2, %v10445_v17  ;;  %1880 = vst.msk [vmem:[#allocation2 + $0x2e8] sm:$0x1] %vm1848_vm2, %v10445_v17 }
 0x1f6   :  { %1881 = vst.msk [vmem:[#allocation2 + $0x300] sm:$0x1] %vm1848_vm2, %v10445_v17  ;;  %1882 = vst.msk [vmem:[#allocation2 + $0x318] sm:$0x1] %vm1848_vm2, %v10445_v17 }
 0x1f7   :  { %1883 = vst.msk [vmem:[#allocation2 + $0x330] sm:$0x1] %vm1848_vm2, %v10445_v17  ;;  %1884 = vst.msk [vmem:[#allocation2 + $0x348] sm:$0x1] %vm1848_vm2, %v10445_v17 }
 0x1f8   :  { %9574 = vmatpush3.bf16.msra.mxu1 %v14802_v26  ;;  %1885 = vst.msk [vmem:[#allocation2 + $0x11] sm:$0x1] %vm1848_vm2, %v10445_v17  ;;  %1886 = vst.msk [vmem:[#allocation2 + $0x29] sm:$0x1] %vm1848_vm2, %v10445_v17 }
 0x1f9   :  { %9576 = vmatprep.subr.bf16.mxu1 %v14803_v20  ;;  %1887 = vst.msk [vmem:[#allocation2 + $0x41] sm:$0x1] %vm1848_vm2, %v10445_v17  ;;  %1888 = vst.msk [vmem:[#allocation2 + $0x59] sm:$0x1] %vm1848_vm2, %v10445_v17 }
 0x1fa   :  { %1889 = vst.msk [vmem:[#allocation2 + $0x71] sm:$0x1] %vm1848_vm2, %v10445_v17  ;;  %1890 = vst.msk [vmem:[#allocation2 + $0x89] sm:$0x1] %vm1848_vm2, %v10445_v17 }
 0x1fb   :  { %1891 = vst.msk [vmem:[#allocation2 + $0xa1] sm:$0x1] %vm1848_vm2, %v10445_v17  ;;  %1892 = vst.msk [vmem:[#allocation2 + $0xb9] sm:$0x1] %vm1848_vm2, %v10445_v17 }
 0x1fc   :  { %9578 = vmatpush3.bf16.msra.mxu1 %v14804_v22  ;;  %1893 = vst.msk [vmem:[#allocation2 + $0xd1] sm:$0x1] %vm1848_vm2, %v10445_v17  ;;  %1894 = vst.msk [vmem:[#allocation2 + $0xe9] sm:$0x1] %vm1848_vm2, %v10445_v17 }
 0x1fd   :  { %9580 = vmatprep.subr.bf16.mxu1 %v14805_v28  ;;  %1895 = vst.msk [vmem:[#allocation2 + $0x101] sm:$0x1] %vm1848_vm2, %v10445_v17  ;;  %1896 = vst.msk [vmem:[#allocation2 + $0x119] sm:$0x1] %vm1848_vm2, %v10445_v17 }
 0x1fe   :  { %1897 = vst.msk [vmem:[#allocation2 + $0x131] sm:$0x1] %vm1848_vm2, %v10445_v17  ;;  %1898 = vst.msk [vmem:[#allocation2 + $0x149] sm:$0x1] %vm1848_vm2, %v10445_v17 }
 0x1ff   :  { %1899 = vst.msk [vmem:[#allocation2 + $0x161] sm:$0x1] %vm1848_vm2, %v10445_v17  ;;  %1900 = vst.msk [vmem:[#allocation2 + $0x179] sm:$0x1] %vm1848_vm2, %v10445_v17 }
 0x200   :  { %9582 = vmatpush3.bf16.msra.mxu1 %v14806_v16  ;;  %1901 = vst.msk [vmem:[#allocation2 + $0x191] sm:$0x1] %vm1848_vm2, %v10445_v17  ;;  %1902 = vst.msk [vmem:[#allocation2 + $0x1a9] sm:$0x1] %vm1848_vm2, %v10445_v17  ;;  %v1634_v16 = vlaneseq }
 0x201   :  { %9584 = vmatprep.subr.bf16.mxu1 %v14807_v32  ;;  %1903 = vst.msk [vmem:[#allocation2 + $0x1c1] sm:$0x1] %vm1848_vm2, %v10445_v17  ;;  %1904 = vst.msk [vmem:[#allocation2 + $0x1d9] sm:$0x1] %vm1848_vm2, %v10445_v17 }
 0x202   :  { %1905 = vst.msk [vmem:[#allocation2 + $0x1f1] sm:$0x1] %vm1848_vm2, %v10445_v17  ;;  %1906 = vst.msk [vmem:[#allocation2 + $0x209] sm:$0x1] %vm1848_vm2, %v10445_v17  ;;  %v1635_v32 = vshrl.u32 %v1634_v16, 7  ;;  %v14855_v16 = vld [vmem:[#allocation29_spill] sm:$0xff] }
 0x203   :  { %1551 = vmatmul.mubr.f32.vlgmr.msra.gmra.mrb[2].mxu1 %v14752_v55  ;;  %1907 = vst.msk [vmem:[#allocation2 + $0x221] sm:$0x1] %vm1848_vm2, %v10445_v17  ;;  %1908 = vst.msk [vmem:[#allocation2 + $0x239] sm:$0x1] %vm1848_vm2, %v10445_v17 }
 0x204   :  { %9586 = vmatpush3.bf16.msra.mxu1 %v14808_v34  ;;  %1620 = vmatprep.mubr.f32.mxu1 %v14752_v55  ;;  %1909 = vst.msk [vmem:[#allocation2 + $0x251] sm:$0x1] %vm1848_vm2, %v10445_v17  ;;  %1910 = vst.msk [vmem:[#allocation2 + $0x269] sm:$0x1] %vm1848_vm2, %v10445_v17  ;;  %v1279_v34 = vld [vmem:[%s14478_s5] sm:$0x1] }
 0x205   :  { %9588 = vmatprep.subr.bf16.mxu1 %v14809_v36  ;;  %1911 = vst.msk [vmem:[#allocation2 + $0x281] sm:$0x1] %vm1848_vm2, %v10445_v17  ;;  %1912 = vst.msk [vmem:[#allocation2 + $0x299] sm:$0x1] %vm1848_vm2, %v10445_v17  ;;  %v11565_v36 = vsub.s32 0, %v1635_v32 }
 0x206   :  { %1913 = vst.msk [vmem:[#allocation2 + $0x2b1] sm:$0x1] %vm1848_vm2, %v10445_v17  ;;  %1914 = vst.msk [vmem:[#allocation2 + $0x2c9] sm:$0x1] %vm1848_vm2, %v10445_v17 }
 0x207   :  { %1915 = vst.msk [vmem:[#allocation2 + $0x2e1] sm:$0x1] %vm1848_vm2, %v10445_v17  ;;  %1916 = vst.msk [vmem:[#allocation2 + $0x2f9] sm:$0x1] %vm1848_vm2, %v10445_v17 }
 0x208   :  { %9590 = vmatpush3.bf16.msra.mxu1 %v14810_v38  ;;  %1917 = vst.msk [vmem:[#allocation2 + $0x311] sm:$0x1] %vm1848_vm2, %v10445_v17  ;;  %1918 = vst.msk [vmem:[#allocation2 + $0x329] sm:$0x1] %vm1848_vm2, %v10445_v17 }
 0x209   :  { %9592 = vmatprep.subr.bf16.mxu1 %v9591_v47  ;;  %v14825_v47 = vpack.c.bf16 %v14823_v15, %v14824_v33  ;;  %1919 = vst.msk [vmem:[#allocation2 + $0x341] sm:$0x1] %vm1848_vm2, %v10445_v17  ;;  %1920 = vst.msk [vmem:[#allocation2 + $0x359] sm:$0x1] %vm1848_vm2, %v10445_v17  ;;  %v14838_v33 = vld [vmem:[#allocation11_spill] sm:$0xff]  ;;  %v14845_v17 = vld [vmem:[#allocation16_spill] sm:$0xff] }
 0x20a   :  { %14832 = vst [vmem:[#allocation48_spill] sm:$0xff] %v11558_v14  ;;  %14833 = vst [vmem:[#allocation47_spill] sm:$0xff] %v11565_v36 }
 0x20c   :  { %9594 = vmatpush3.bf16.msra.mxu1 %v14813_v35 }
 0x20d   :  { %9596 = vmatprep.subr.bf16.mxu1 %v14816_v48  ;;  %v14834_v48 = vld [vmem:[#allocation7_spill] sm:$0xff] }
 0x210   :  { %9598 = vmatpush3.bf16.msra.mxu1 %v14819_v56 }
 0x211   :  { %9600 = vmatprep.subr.bf16.mxu1 %v9599_v10 }
 0x214   :  { %9602 = vmatpush3.bf16.msra.mxu1 %v14822_v58  ;;  %v14837_v58 = vld [vmem:[#allocation8_spill] sm:$0xff] }
 0x215   :  { %9604 = vmatprep.subr.bf16.mxu1 %v9603_v41 }
 0x218   :  { %9606 = vmatpush3.bf16.msra.mxu1 %v14825_v47 }
 0x219   :  { %9608 = vmatprep.subr.bf16.mxu1 %v9607_v45  ;;  %v2086_v45 = vld [vmem:[#allocation2 + $0x1] sm:$0xff] }
 0x21a   :  { %v2150_v3 = vpack.c.bf16 %v2087_v30, %v2086_v45  ;;  %v14848_v30 = vld [vmem:[#allocation18_spill] sm:$0xff] }
 0x21c   :  { %9610 = vmatpush3.bf16.msra.mxu1 %v14828_v1  ;;  %8879 = vmatprep.mubr.msk.bf16.mxu0 %vm336_vm0, %v2150_v3  ;;  %v14840_v1 = vld [vmem:[#allocation10_spill] sm:$0xff] }
 0x21d   :  { %9612 = vmatprep.subr.bf16.mxu1 %v9611_v43  ;;  %v10399_v43 = vld [vmem:[%s14477_s4 + $0x38] sm:$0xff]  }
 0x220   :  { %9614 = vmatpush3.bf16.msra.mxu1 %v14831_v57  ;;  %v14841_v57 = vld [vmem:[#allocation12_spill] sm:$0xff] }
 0x221   :  { %9743 = vmatprep.subr.bf16.mxu1 %v11394_v19 }
 0x223   :  { %1621 = vmatmul.mubr.f32.vlgmr.msra.gmra.mrb[4].mxu1 %v14752_v55  ;;  %v14884_v55 = vld [vmem:[#allocation68_spill] sm:$0xff] }
 0x224   :  { %9745 = vmatpush3.bf16.msra.mxu1 %v11394_v19  ;;  %v14846_v19 = vld [vmem:[#allocation19_spill] sm:$0xff] }
 0x225   :  { %9744 = vmatprep.subr.bf16.mxu1 %v10399_v43 }
 0x228   :  { %9746 = vmatpush3.bf16.msra.mxu1 %v10399_v43  ;;  %v14847_v43 = vld [vmem:[#allocation21_spill] sm:$0xff] }
 0x229   :  { %9147 = vmatprep.subr.bf16.mxu1 %v11558_v14  ;;  %v14886_v14 = vld [vmem:[#allocation63_spill] sm:$0xff] }
 0x276   :  { %v8185_v25 = vpop.f32.mrb[64].mxu0 }
 0x277   :  { %v8186_v21 = vpop.f32.mrb[65].mxu0 }
 0x278   :  { %v8187_v52 = vadd.f32 %v8186_v21, %v8185_v25  ;;  %v14842_v21 = vld [vmem:[#allocation15_spill] sm:$0xff] }
 0x2b6   :  { %v8220_v41 = vpop.f32.mrb[0].mxu1 }
 0x2b7   :  { %v8221_v0 = vpop.f32.mrb[1].mxu1 }
 0x2b8   :  { %v8222_v37 = vadd.f32 %v8221_v0, %v8220_v41  ;;  %v14843_v41 = vld [vmem:[#allocation17_spill] sm:$0xff] }
 0x2ba   :  { %v11364_v10 = vadd.f32 %v8222_v37, %v8187_v52  ;;  %v14844_v37 = vld [vmem:[#allocation14_spill] sm:$0xff] }
 0x2bc   :  { %v1421_v7 = vmul.f32 0.001953125, %v11364_v10 }
 0x2be   :  { %v1627_v26 = vmul.f32 %v1421_v7, %v1421_v7 }
 0x2d6   :  { %v8255_v59 = vpop.f32.mrb[2].mxu1 }
 0x2d7   :  { %v8256_v49 = vpop.f32.mrb[3].mxu1 }
 0x2d8   :  { %v8257_v60 = vadd.f32 %v8256_v49, %v8255_v59  ;;  %v14849_v59 = vld [vmem:[#allocation20_spill] sm:$0xff] }
 0x2f6   :  { %v8290_v11 = vpop.f32.mrb[4].mxu1 }
 0x2f7   :  { %v8291_v13 = vpop.f32.mrb[5].mxu1 }
 0x2f8   :  { %v8292_v9 = vadd.f32 %v8291_v13, %v8290_v11  ;;  %v14851_v13 = vld [vmem:[#allocation25_spill] sm:$0xff] }
 0x2fa   :  { %v1623_v24 = vadd.f32 %v8292_v9, %v8257_v60  ;;  %v14850_v60 = vld [vmem:[#allocation23_spill] sm:$0xff]  ;;  %v14852_v9 = vld [vmem:[#allocation22_spill] sm:$0xff] }
 0x2fc   :  { %v1626_v20 = vmul.f32 0.001953125, %v1623_v24 }
 0x2fe   :  { %v1628_v22 = vsub.f32 %v1626_v20, %v1627_v26  ;;  %v14853_v26 = vld [vmem:[#allocation24_spill] sm:$0xff] }
 0x300   :  { %v1629_v28 = vadd.f32 32.0, %v1628_v22  ;;  %v14854_v22 = vld [vmem:[#allocation27_spill] sm:$0xff] }
 0x302   :  { %10414 = vrsqrt.f32 %v1629_v28 }
 0x30c   :  { %v10415_v38 = vpop.eup %10414 }
 0x30d   :  { %v1631_v40 = vmul.f32 %v10415_v38, %v1279_v34  ;;  %v14856_v34 = vld [vmem:[#allocation26_spill] sm:$0xff] }
 0x30f   :  { %v1632_v35 = vmul.f32 %v1631_v40, %v1421_v7  ;;  %v11571_v44 = vrot.slane %v1631_v40, %v11565_v36  ;;  %v14857_v40 = vld [vmem:[#allocation28_spill] sm:$0xff] }
 0x311   :  { %v1633_v46 = vsub.f32 %v1280_v4, %v1632_v35  ;;  %v11575_v50 = vmul.f32 %v11571_v44, %v14834_v48  ;;  %v11579_v56 = vmul.f32 %v11571_v44, %v14835_v51  ;;  %v11583_v54 = vmul.f32 %v14836_v39, %v11571_v44  ;;  %v14858_v35 = vld [vmem:[#allocation31_spill] sm:$0xff]  ;;  %v14859_v48 = vld [vmem:[#allocation33_spill] sm:$0xff]  ;;  %v14860_v39 = vld [vmem:[#allocation30_spill] sm:$0xff] }
 0x312   :  { %v11587_v15 = vmul.f32 %v14837_v58, %v11571_v44  ;;  %v11591_v47 = vmul.f32 %v11571_v44, %v14838_v33  ;;  %v11595_v63 = vmul.f32 %v11571_v44, %v14839_v62  ;;  %v11599_v61 = vmul.f32 %v14840_v1, %v11571_v44  ;;  %v14861_v33 = vld [vmem:[#allocation32_spill] sm:$0xff]  ;;  %v14862_v1 = vld [vmem:[#allocation35_spill] sm:$0xff] }
 0x313   :  { %v11602_v12 = vrot.slane %v1633_v46, %v11565_v36  ;;  %v11606_v25 = vmul.f32 %v14841_v57, %v11571_v44  ;;  %v11610_v52 = vmul.f32 %v11571_v44, %v14842_v21  ;;  %v11614_v0 = vmul.f32 %v11571_v44, %v14843_v41  ;;  %v14863_v21 = vld [vmem:[#allocation37_spill] sm:$0xff]  ;;  %v14882_v36 = vld [vmem:[#allocation64_spill] sm:$0xff] }
 0x314   :  { %v11618_v10 = vmul.f32 %v14844_v37, %v11571_v44  ;;  %v11622_v53 = vmul.f32 %v14845_v17, %v11571_v44  ;;  %v11626_v27 = vmul.f32 %v11571_v44, %v14846_v19  ;;  %v11630_v45 = vmul.f32 %v11571_v44, %v14847_v43  ;;  %v14864_v37 = vld [vmem:[#allocation34_spill] sm:$0xff]  ;;  %v14865_v19 = vld [vmem:[#allocation36_spill] sm:$0xff] }
 0x315   :  { %v11634_v3 = vmul.f32 %v14848_v30, %v11571_v44  ;;  %v11638_v49 = vmul.f32 %v14849_v59, %v11571_v44  ;;  %v11642_v11 = vmul.f32 %v11571_v44, %v14850_v60  ;;  %v11646_v7 = vmul.f32 %v11571_v44, %v14851_v13  ;;  %v14866_v30 = vld [vmem:[#allocation39_spill] sm:$0xff]  ;;  %v14867_v60 = vld [vmem:[#allocation41_spill] sm:$0xff] }
 0x316   :  { %v11650_v24 = vmul.f32 %v14852_v9, %v11571_v44  ;;  %v11654_v20 = vmul.f32 %v14853_v26, %v11571_v44  ;;  %v11658_v28 = vmul.f32 %v11571_v44, %v14854_v22  ;;  %v11662_v32 = vmul.f32 %v11571_v44, %v14855_v16  ;;  %v14868_v9 = vld [vmem:[#allocation38_spill] sm:$0xff]  ;;  %v14869_v22 = vld [vmem:[#allocation40_spill] sm:$0xff] }
 0x317   :  { %v11666_v38 = vmul.f32 %v14856_v34, %v11571_v44  ;;  %v11670_v4 = vmul.f32 %v14857_v40, %v11571_v44  ;;  %v11674_v46 = vmul.f32 %v11571_v44, %v14858_v35  ;;  %v11678_v51 = vmul.f32 %v11571_v44, %v14859_v48  ;;  %v14870_v34 = vld [vmem:[#allocation42_spill] sm:$0xff] }
 0x318   :  { %v11682_v58 = vmul.f32 %v14860_v39, %v11571_v44  ;;  %v11686_v62 = vmul.f32 %v14861_v33, %v11571_v44  ;;  %v11690_v57 = vmul.f32 %v11571_v44, %v14862_v1  ;;  %v11694_v41 = vmul.f32 %v11571_v44, %v14863_v21  ;;  %v14871_v35 = vld [vmem:[#allocation46_spill] sm:$0xff]  ;;  %v14872_v33 = vld [vmem:[#allocation43_spill] sm:$0xff]  ;;  %v14873_v21 = vld [vmem:[#allocation49_spill] sm:$0xff] }
 0x319   :  { %v11698_v17 = vmul.f32 %v14864_v37, %v11571_v44  ;;  %v11702_v43 = vmul.f32 %v14865_v19, %v11571_v44  ;;  %v11706_v59 = vmul.f32 %v11571_v44, %v14866_v30  ;;  %v11710_v13 = vmul.f32 %v11571_v44, %v14867_v60  ;;  %v14874_v19 = vld [vmem:[#allocation52_spill] sm:$0xff] }
 0x31a   :  { %v11714_v26 = vmul.f32 %v14868_v9, %v11571_v44  ;;  %v11718_v16 = vmul.f32 %v14869_v22, %v11571_v44  ;;  %v11722_v40 = vmul.f32 %v11571_v44, %v14870_v34  ;;  %v11726_v48 = vmul.f32 %v11571_v44, %v14871_v35  ;;  %v14875_v35 = vld [vmem:[#allocation60_spill] sm:$0xff] }
 0x31b   :  { %v11730_v39 = vmul.f32 %v11063_v8, %v11571_v44  ;;  %v11734_v1 = vmul.f32 %v14872_v33, %v11571_v44  ;;  %v11738_v37 = vmul.f32 %v11571_v44, %v14873_v21  ;;  %v11742_v30 = vmul.f32 %v11571_v44, %v14874_v19  ;;  %v14876_v33 = vld [vmem:[#allocation62_spill] sm:$0xff]  ;;  %v14878_v21 = vld [vmem:[#allocation59_spill] sm:$0xff]  ;;  %v14880_v19 = vld [vmem:[#allocation61_spill] sm:$0xff] }
 0x31c   :  { %v11746_v60 = vmul.f32 %v11095_v42, %v11571_v44  ;;  %v11750_v8 = vmul.f32 %v11099_v29, %v11571_v44  ;;  %v11754_v9 = vmul.f32 %v11571_v44, %v11129_v18  ;;  %v11758_v22 = vmul.f32 %v11571_v44, %v11143_v2 }
 0x31d   :  { %v11762_v34 = vmul.f32 %v11127_v23, %v11571_v44  ;;  %v11766_v42 = vmul.f32 %v11131_v6, %v11571_v44  ;;  %v11770_v29 = vmul.f32 %v11571_v44, %v14875_v35  ;;  %v11774_v18 = vmul.f32 %v11571_v44, %v14876_v33 }
 0x31e   :  { %v11778_v2 = vmul.f32 %v14878_v21, %v11571_v44  ;;  %v11782_v23 = vmul.f32 %v14880_v19, %v11571_v44  ;;  %v11786_v6 = vmul.f32 %v11571_v44, %v14882_v36  ;;  %v11790_v35 = vmul.f32 %v11571_v44, %v14884_v55 }
 0x31f   :  { %14877 = vst [vmem:[#allocation67_spill] sm:$0xff] %v11774_v18  ;;  %v11794_v33 = vmul.f32 %v14886_v14, %v11571_v44  ;;  %v14887_v18 = vld [vmem:[#allocation65_spill] sm:$0xff] }
 0x320   :  { %14879 = vst [vmem:[#allocation66_spill] sm:$0xff] %v11778_v2  ;;  %14881 = vst [vmem:[#allocation45_spill] sm:$0xff] %v11782_v23  ;;  %v11798_v21 = vmul.f32 %v14887_v18, %v11571_v44  ;;  %v14888_v2 = vld [vmem:[#allocation70_spill] sm:$0xff]  ;;  %v14890_v23 = vld [vmem:[#allocation72_spill] sm:$0xff]  ;;  %v11818_v18 = vmul.f32 %v11571_v44, %v11251_v31  ;;  %v11838_v31 = vadd.f32 %v11602_v12, %v11579_v56 }
 0x321   :  { %14883 = vst [vmem:[#allocation44_spill] sm:$0xff] %v11786_v6  ;;  %14885 = vst [vmem:[#allocation54_spill] sm:$0xff] %v11790_v35  ;;  %v11802_v19 = vmul.f32 %v11571_v44, %v14888_v2  ;;  %v11806_v36 = vmul.f32 %v11571_v44, %v14890_v23  ;;  %v14892_v6 = vld [vmem:[#allocation69_spill] sm:$0xff]  ;;  %v14893_v35 = vld [vmem:[#allocation71_spill] sm:$0xff]  ;;  %v11822_v2 = vmul.f32 %v11571_v44, %v11261_v5 }
 0x322   :  { %v11810_v55 = vmul.f32 %v14892_v6, %v11571_v44  ;;  %v11814_v14 = vmul.f32 %v14893_v35, %v11571_v44  ;;  %v11834_v35 = vadd.f32 %v11602_v12, %v11575_v50  ;;  %14897 = vst [vmem:[#allocation58_spill] sm:$0xff] %v11838_v31  ;;  %v11842_v5 = vadd.f32 %v11602_v12, %v11583_v54 }
 0x323   :  { %14889 = vst [vmem:[#allocation53_spill] sm:$0xff] %v11802_v19  ;;  %14891 = vst [vmem:[#allocation51_spill] sm:$0xff] %v11806_v36  ;;  %v14894_v19 = vld [vmem:[#allocation73_spill] sm:$0xff]  ;;  %v14895_v36 = vld [vmem:[#allocation74_spill] sm:$0xff]  ;;  %v11854_v50 = vadd.f32 %v11602_v12, %v11595_v63  ;;  %v11858_v56 = vadd.f32 %v11602_v12, %v11599_v61  ;;  %v11862_v54 = vadd.f32 %v11602_v12, %v11606_v25 }
 0x324   :  { %v11826_v23 = vmul.f32 %v14894_v19, %v11571_v44  ;;  %v11830_v6 = vmul.f32 %v14895_v36, %v11571_v44  ;;  %14896 = vst [vmem:[#allocation50_spill] sm:$0xff] %v11834_v35  ;;  %14898 = vst [vmem:[#allocation57_spill] sm:$0xff] %v11842_v5  ;;  %v11846_v19 = vadd.f32 %v11602_v12, %v11587_v15 }
 0x325   :  { %v11850_v44 = vadd.f32 %v11602_v12, %v11591_v47  ;;  %14901 = vst [vmem:[#allocation7_spill] sm:$0xff] %v11854_v50  ;;  %14902 = vst [vmem:[#allocation9_spill] sm:$0xff] %v11858_v56  ;;  %v11866_v15 = vadd.f32 %v11602_v12, %v11610_v52  ;;  %v11870_v47 = vadd.f32 %v11602_v12, %v11614_v0 }
 0x326   :  { %14899 = vst [vmem:[#allocation56_spill] sm:$0xff] %v11846_v19  ;;  %14903 = vst [vmem:[#allocation6_spill] sm:$0xff] %v11862_v54  ;;  %v11874_v63 = vadd.f32 %v11602_v12, %v11618_v10  ;;  %v11878_v61 = vadd.f32 %v11602_v12, %v11622_v53  ;;  %v11882_v25 = vadd.f32 %v11602_v12, %v11626_v27  ;;  %v14945_v36 = vld [vmem:[#allocation67_spill] sm:$0xff] }
 0x327   :  { %14900 = vst [vmem:[#allocation55_spill] sm:$0xff] %v11850_v44  ;;  %14904 = vst [vmem:[#allocation8_spill] sm:$0xff] %v11866_v15  ;;  %v11886_v52 = vadd.f32 %v11602_v12, %v11630_v45  ;;  %v11890_v0 = vadd.f32 %v11602_v12, %v11634_v3  ;;  %v11894_v10 = vadd.f32 %v11602_v12, %v11638_v49 }
 0x328   :  { %14905 = vst [vmem:[#allocation11_spill] sm:$0xff] %v11870_v47  ;;  %14906 = vst [vmem:[#allocation13_spill] sm:$0xff] %v11874_v63  ;;  %v11898_v53 = vadd.f32 %v11602_v12, %v11642_v11  ;;  %v11902_v27 = vadd.f32 %v11602_v12, %v11646_v7  ;;  %v11906_v45 = vadd.f32 %v11602_v12, %v11650_v24 }
 0x329   :  { %14907 = vst [vmem:[#allocation10_spill] sm:$0xff] %v11878_v61  ;;  %14908 = vst [vmem:[#allocation12_spill] sm:$0xff] %v11882_v25  ;;  %v11910_v3 = vadd.f32 %v11602_v12, %v11654_v20  ;;  %v11914_v49 = vadd.f32 %v11602_v12, %v11658_v28  ;;  %v11918_v11 = vadd.f32 %v11602_v12, %v11662_v32 }
 0x32a   :  { %14909 = vst [vmem:[#allocation15_spill] sm:$0xff] %v11886_v52  ;;  %14910 = vst [vmem:[#allocation17_spill] sm:$0xff] %v11890_v0  ;;  %v11922_v7 = vadd.f32 %v11602_v12, %v11666_v38  ;;  %v11926_v24 = vadd.f32 %v11602_v12, %v11670_v4  ;;  %v11930_v20 = vadd.f32 %v11602_v12, %v11674_v46 }
 0x32b   :  { %14911 = vst [vmem:[#allocation14_spill] sm:$0xff] %v11894_v10  ;;  %14912 = vst [vmem:[#allocation16_spill] sm:$0xff] %v11898_v53  ;;  %v11934_v28 = vadd.f32 %v11602_v12, %v11678_v51  ;;  %v11938_v32 = vadd.f32 %v11602_v12, %v11682_v58  ;;  %v11942_v38 = vadd.f32 %v11602_v12, %v11686_v62 }
 0x32c   :  { %14913 = vst [vmem:[#allocation19_spill] sm:$0xff] %v11902_v27  ;;  %14914 = vst [vmem:[#allocation21_spill] sm:$0xff] %v11906_v45  ;;  %v11946_v4 = vadd.f32 %v11602_v12, %v11690_v57  ;;  %v11950_v46 = vadd.f32 %v11602_v12, %v11694_v41  ;;  %v11954_v51 = vadd.f32 %v11602_v12, %v11698_v17 }
 0x32d   :  { %14915 = vst [vmem:[#allocation18_spill] sm:$0xff] %v11910_v3  ;;  %14916 = vst [vmem:[#allocation20_spill] sm:$0xff] %v11914_v49  ;;  %v11958_v58 = vadd.f32 %v11602_v12, %v11702_v43  ;;  %v11962_v62 = vadd.f32 %v11602_v12, %v11706_v59  ;;  %v11966_v57 = vadd.f32 %v11602_v12, %v11710_v13 }
 0x32e   :  { %14917 = vst [vmem:[#allocation23_spill] sm:$0xff] %v11918_v11  ;;  %14918 = vst [vmem:[#allocation25_spill] sm:$0xff] %v11922_v7  ;;  %v11970_v41 = vadd.f32 %v11602_v12, %v11714_v26  ;;  %v11974_v17 = vadd.f32 %v11602_v12, %v11718_v16  ;;  %v11978_v43 = vadd.f32 %v11602_v12, %v11722_v40 }
 0x32f   :  { %14919 = vst [vmem:[#allocation22_spill] sm:$0xff] %v11926_v24  ;;  %14920 = vst [vmem:[#allocation24_spill] sm:$0xff] %v11930_v20  ;;  %v11982_v59 = vadd.f32 %v11602_v12, %v11726_v48  ;;  %v11986_v13 = vadd.f32 %v11602_v12, %v11730_v39  ;;  %v11990_v26 = vadd.f32 %v11602_v12, %v11734_v1 }
 0x330   :  { %14921 = vst [vmem:[#allocation27_spill] sm:$0xff] %v11934_v28  ;;  %14922 = vst [vmem:[#allocation29_spill] sm:$0xff] %v11938_v32  ;;  %v11994_v16 = vadd.f32 %v11602_v12, %v11738_v37  ;;  %v11998_v40 = vadd.f32 %v11602_v12, %v11742_v30  ;;  %v12002_v48 = vadd.f32 %v11602_v12, %v11746_v60 }
 0x331   :  { %14923 = vst [vmem:[#allocation26_spill] sm:$0xff] %v11942_v38  ;;  %14924 = vst [vmem:[#allocation28_spill] sm:$0xff] %v11946_v4  ;;  %v12006_v39 = vadd.f32 %v11602_v12, %v11750_v8  ;;  %v12010_v1 = vadd.f32 %v11602_v12, %v11754_v9  ;;  %v12014_v37 = vadd.f32 %v11602_v12, %v11758_v22 }
 0x332   :  { %14925 = vst [vmem:[#allocation31_spill] sm:$0xff] %v11950_v46  ;;  %14926 = vst [vmem:[#allocation33_spill] sm:$0xff] %v11954_v51  ;;  %v12018_v30 = vadd.f32 %v11602_v12, %v11762_v34  ;;  %v12022_v60 = vadd.f32 %v11602_v12, %v11766_v42  ;;  %v12026_v8 = vadd.f32 %v11602_v12, %v11770_v29 }
 0x333   :  { %14927 = vst [vmem:[#allocation30_spill] sm:$0xff] %v11958_v58  ;;  %14928 = vst [vmem:[#allocation32_spill] sm:$0xff] %v11962_v62  ;;  %v12030_v9 = vadd.f32 %v11602_v12, %v14945_v36  ;;  %v12050_v36 = vadd.f32 %v11602_v12, %v11794_v33  ;;  %v12070_v33 = vadd.f32 %v11602_v12, %v11814_v14  ;;  %v14567_v14 = vmax.f32 %v11838_v31, 0.0 }
 0x334   :  { %14929 = vst [vmem:[#allocation35_spill] sm:$0xff] %v11966_v57  ;;  %14930 = vst [vmem:[#allocation37_spill] sm:$0xff] %v11970_v41 }
 0x335   :  { %14931 = vst [vmem:[#allocation34_spill] sm:$0xff] %v11974_v17  ;;  %14932 = vst [vmem:[#allocation36_spill] sm:$0xff] %v11978_v43 }
 0x336   :  { %14933 = vst [vmem:[#allocation39_spill] sm:$0xff] %v11982_v59  ;;  %14934 = vst [vmem:[#allocation41_spill] sm:$0xff] %v11986_v13 }
 0x337   :  { %14935 = vst [vmem:[#allocation38_spill] sm:$0xff] %v11990_v26  ;;  %14936 = vst [vmem:[#allocation40_spill] sm:$0xff] %v11994_v16 }
 0x338   :  { %14937 = vst [vmem:[#allocation42_spill] sm:$0xff] %v11998_v40  ;;  %14938 = vst [vmem:[#allocation46_spill] sm:$0xff] %v12002_v48 }
 0x339   :  { %14939 = vst [vmem:[#allocation43_spill] sm:$0xff] %v12006_v39  ;;  %14940 = vst [vmem:[#allocation49_spill] sm:$0xff] %v12010_v1  ;;  %v14947_v1 = vld [vmem:[#allocation66_spill] sm:$0xff] }
 0x33a   :  { %14941 = vst [vmem:[#allocation52_spill] sm:$0xff] %v12014_v37  ;;  %14942 = vst [vmem:[#allocation60_spill] sm:$0xff] %v12018_v30  ;;  %v12034_v22 = vadd.f32 %v11602_v12, %v14947_v1  ;;  %v14949_v37 = vld [vmem:[#allocation45_spill] sm:$0xff]  ;;  %v14951_v30 = vld [vmem:[#allocation44_spill] sm:$0xff]  ;;  %v12054_v1 = vadd.f32 %v11602_v12, %v11798_v21  ;;  %v12074_v21 = vadd.f32 %v11602_v12, %v11818_v18  ;;  %v14570_v18 = vmax.f32 %v11846_v19, 0.0 }
 0x33b   :  { %14943 = vst [vmem:[#allocation62_spill] sm:$0xff] %v12022_v60  ;;  %14944 = vst [vmem:[#allocation59_spill] sm:$0xff] %v12026_v8  ;;  %v12038_v34 = vadd.f32 %v11602_v12, %v14949_v37  ;;  %v12042_v42 = vadd.f32 %v11602_v12, %v14951_v30  ;;  %v14953_v60 = vld [vmem:[#allocation54_spill] sm:$0xff] }
 0x33c   :  { %14946 = vst [vmem:[#allocation61_spill] sm:$0xff] %v12030_v9  ;;  %14948 = vst [vmem:[#allocation64_spill] sm:$0xff] %v12034_v22  ;;  %v12046_v29 = vadd.f32 %v11602_v12, %v14953_v60  ;;  %v14957_v22 = vld [vmem:[#allocation53_spill] sm:$0xff]  ;;  %v12066_v60 = vadd.f32 %v11602_v12, %v11810_v55  ;;  %v12086_v55 = vadd.f32 %v11602_v12, %v11830_v6  ;;  %v14574_v6 = vmax.f32 %v11874_v63, 0.0 }
 0x33d   :  { %14950 = vst [vmem:[#allocation68_spill] sm:$0xff] %v12038_v34  ;;  %14952 = vst [vmem:[#allocation63_spill] sm:$0xff] %v12042_v42  ;;  %v12058_v37 = vadd.f32 %v11602_v12, %v14957_v22  ;;  %v14959_v34 = vld [vmem:[#allocation51_spill] sm:$0xff]  ;;  %v12078_v22 = vadd.f32 %v11602_v12, %v11822_v2  ;;  %v14968_v2 = vmax.f32 %v11858_v56, 0.0 }
 0x33e   :  { %14954 = vst [vmem:[#allocation65_spill] sm:$0xff] %v12046_v29  ;;  %14955 = vst [vmem:[#allocation70_spill] sm:$0xff] %v12050_v36  ;;  %v12062_v30 = vadd.f32 %v11602_v12, %v14959_v34  ;;  %v12082_v34 = vadd.f32 %v11602_v12, %v11826_v23  ;;  %v14573_v12 = vmax.f32 %v11870_v47, 0.0  ;;  %v14576_v23 = vmax.f32 %v11894_v10, 0.0 }
 0x33f   :  { %14956 = vst [vmem:[#allocation72_spill] sm:$0xff] %v12054_v1  ;;  %14958 = vst [vmem:[#allocation69_spill] sm:$0xff] %v12058_v37 }
 0x340   :  { %14960 = vst [vmem:[#allocation71_spill] sm:$0xff] %v12062_v30  ;;  %14961 = vst [vmem:[#allocation73_spill] sm:$0xff] %v12066_v60  ;;  %v14568_v60 = vmax.f32 %v11834_v35, 0.0 }
 0x341   :  { %14962 = vst [vmem:[#allocation74_spill] sm:$0xff] %v12070_v33  ;;  %14963 = vst [vmem:[#allocation67_spill] sm:$0xff] %v12074_v21  ;;  %v14569_v33 = vmax.f32 %v11842_v5, 0.0  ;;  %v14571_v21 = vmax.f32 %v11850_v44, 0.0 }
 0x342   :  { %14964 = vst [vmem:[#allocation66_spill] sm:$0xff] %v12078_v22  ;;  %14965 = vst [vmem:[#allocation45_spill] sm:$0xff] %v12082_v34  ;;  %v14572_v34 = vmax.f32 %v11866_v15, 0.0  ;;  %v14577_v22 = vmax.f32 %v11898_v53, 0.0 }
 0x343   :  { %14966 = vst [vmem:[#allocation44_spill] sm:$0xff] %v12086_v55  ;;  %1922 = vst.msk [vmem:[#allocation2 + $0x19] sm:$0xff] %vm336_vm0, %v14568_v60  ;;  %v14575_v60 = vmax.f32 %v11890_v0, 0.0 }
 0x344   :  { %1923 = vst.msk [vmem:[#allocation2 + $0x21] sm:$0xff] %vm336_vm0, %v14567_v14  ;;  %1924 = vst.msk [vmem:[#allocation2 + $0x31] sm:$0xff] %vm336_vm0, %v14569_v33  ;;  %v14967_v14 = vmax.f32 %v11854_v50, 0.0  ;;  %v14579_v33 = vmax.f32 %v11922_v7, 0.0 }
 0x345   :  { %1925 = vst.msk [vmem:[#allocation2 + $0x39] sm:$0xff] %vm336_vm0, %v14570_v18  ;;  %1926 = vst.msk [vmem:[#allocation2 + $0x49] sm:$0xff] %vm336_vm0, %v14571_v21  ;;  %v14969_v18 = vmax.f32 %v11862_v54, 0.0  ;;  %v14581_v21 = vmax.f32 %v11930_v20, 0.0 }
 0x346   :  { %1927 = vst.msk [vmem:[#allocation2 + $0x51] sm:$0xff] %vm336_vm0, %v14967_v14  ;;  %1928 = vst.msk [vmem:[#allocation2 + $0x61] sm:$0xff] %vm336_vm0, %v14968_v2  ;;  %v14578_v14 = vmax.f32 %v11906_v45, 0.0  ;;  %v14580_v2 = vmax.f32 %v11926_v24, 0.0 }
 0x347   :  { %1929 = vst.msk [vmem:[#allocation2 + $0x69] sm:$0xff] %vm336_vm0, %v14969_v18  ;;  %1930 = vst.msk [vmem:[#allocation2 + $0x79] sm:$0xff] %vm336_vm0, %v14572_v34  ;;  %v14970_v18 = vmax.f32 %v11878_v61, 0.0  ;;  %v14971_v34 = vmax.f32 %v11882_v25, 0.0 }
 0x348   :  { %1931 = vst.msk [vmem:[#allocation2 + $0x81] sm:$0xff] %vm336_vm0, %v14573_v12  ;;  %1932 = vst.msk [vmem:[#allocation2 + $0x91] sm:$0xff] %vm336_vm0, %v14574_v6  ;;  %v14972_v12 = vmax.f32 %v11886_v52, 0.0  ;;  %v14583_v6 = vmax.f32 %v11954_v51, 0.0 }
 0x349   :  { %1933 = vst.msk [vmem:[#allocation2 + $0x99] sm:$0xff] %vm336_vm0, %v14970_v18  ;;  %1934 = vst.msk [vmem:[#allocation2 + $0xa9] sm:$0xff] %vm336_vm0, %v14971_v34  ;;  %v14973_v34 = vmax.f32 %v11902_v27, 0.0  ;;  %v14585_v18 = vmax.f32 %v11962_v62, 0.0 }
 0x34a   :  { %1935 = vst.msk [vmem:[#allocation2 + $0xb1] sm:$0xff] %vm336_vm0, %v14972_v12  ;;  %1936 = vst.msk [vmem:[#allocation2 + $0xc1] sm:$0xff] %vm336_vm0, %v14575_v60  ;;  %v14582_v12 = vmax.f32 %v11938_v32, 0.0  ;;  %v14584_v60 = vmax.f32 %v11958_v58, 0.0 }
 0x34b   :  { %1937 = vst.msk [vmem:[#allocation2 + $0xc9] sm:$0xff] %vm336_vm0, %v14576_v23  ;;  %1938 = vst.msk [vmem:[#allocation2 + $0xd9] sm:$0xff] %vm336_vm0, %v14577_v22  ;;  %v14974_v23 = vmax.f32 %v11910_v3, 0.0  ;;  %v14975_v22 = vmax.f32 %v11914_v49, 0.0 }
 0x34c   :  { %1939 = vst.msk [vmem:[#allocation2 + $0xe1] sm:$0xff] %vm336_vm0, %v14973_v34  ;;  %1940 = vst.msk [vmem:[#allocation2 + $0xf1] sm:$0xff] %vm336_vm0, %v14578_v14  ;;  %v14976_v34 = vmax.f32 %v11918_v11, 0.0  ;;  %v2089_v14 = vld [vmem:[#allocation2 + $0x21] sm:$0xff] }
 0x34d   :  { %1941 = vst.msk [vmem:[#allocation2 + $0xf9] sm:$0xff] %vm336_vm0, %v14974_v23  ;;  %1942 = vst.msk [vmem:[#allocation2 + $0x109] sm:$0xff] %vm336_vm0, %v14975_v22  ;;  %v14977_v22 = vmax.f32 %v11934_v28, 0.0  ;;  %v14586_v23 = vmax.f32 %v11970_v41, 0.0  ;;  %v4670_v7 = vld [vmem:[#allocation2 + $0x3a] sm:$0xff] }
 0x34e   :  { %1943 = vst.msk [vmem:[#allocation2 + $0x111] sm:$0xff] %vm336_vm0, %v14976_v34  ;;  %1944 = vst.msk [vmem:[#allocation2 + $0x121] sm:$0xff] %vm336_vm0, %v14579_v33  ;;  %v14983_v33 = vld [vmem:[#allocation52_spill] sm:$0xff] }
 0x34f   :  { %1945 = vst.msk [vmem:[#allocation2 + $0x129] sm:$0xff] %vm336_vm0, %v14580_v2  ;;  %1946 = vst.msk [vmem:[#allocation2 + $0x139] sm:$0xff] %vm336_vm0, %v14581_v21  ;;  %v14978_v2 = vmax.f32 %v11942_v38, 0.0  ;;  %v14979_v21 = vmax.f32 %v11946_v4, 0.0  ;;  %v14993_v34 = vld [vmem:[#allocation64_spill] sm:$0xff] }
 0x350   :  { %1947 = vst.msk [vmem:[#allocation2 + $0x141] sm:$0xff] %vm336_vm0, %v14977_v22  ;;  %1948 = vst.msk [vmem:[#allocation2 + $0x151] sm:$0xff] %vm336_vm0, %v14582_v12  ;;  %v14980_v22 = vmax.f32 %v11950_v46, 0.0  ;;  %v14982_v12 = vld [vmem:[#allocation49_spill] sm:$0xff]  ;;  %v4674_v11 = vld [vmem:[#allocation2 + $0x6a] sm:$0xff] }
 0x351   :  { %1949 = vst.msk [vmem:[#allocation2 + $0x159] sm:$0xff] %vm336_vm0, %v14978_v2  ;;  %1950 = vst.msk [vmem:[#allocation2 + $0x169] sm:$0xff] %vm336_vm0, %v14979_v21  ;;  %v14981_v21 = vmax.f32 %v11966_v57, 0.0  ;;  %v14988_v2 = vld [vmem:[#allocation62_spill] sm:$0xff] }
 0x352   :  { %1951 = vst.msk [vmem:[#allocation2 + $0x171] sm:$0xff] %vm336_vm0, %v14980_v22  ;;  %1952 = vst.msk [vmem:[#allocation2 + $0x181] sm:$0xff] %vm336_vm0, %v14583_v6  ;;  %v14987_v22 = vld [vmem:[#allocation60_spill] sm:$0xff]  ;;  %v2088_v6 = vld [vmem:[#allocation2 + $0x19] sm:$0xff] }
 0x353   :  { %1953 = vst.msk [vmem:[#allocation2 + $0x189] sm:$0xff] %vm336_vm0, %v14584_v60  ;;  %1954 = vst.msk [vmem:[#allocation2 + $0x1c9] sm:$0xff] %vm336_vm0, %v14585_v18  ;;  %v14984_v60 = vmax.f32 %v11974_v17, 0.0  ;;  %v14985_v18 = vmax.f32 %v11978_v43, 0.0  ;;  %v14989_v17 = vmax.f32 %v11986_v13, 0.0  ;;  %v2090_v13 = vld [vmem:[#allocation2 + $0x31] sm:$0xff] }
 0x354   :  { %1955 = vst.msk [vmem:[#allocation2 + $0x1d1] sm:$0xff] %vm336_vm0, %v14981_v21  ;;  %1956 = vst.msk [vmem:[#allocation2 + $0x1e1] sm:$0xff] %vm336_vm0, %v14586_v23  ;;  %v14986_v21 = vmax.f32 %v11982_v59, 0.0  ;;  %v14994_v59 = vld [vmem:[#allocation68_spill] sm:$0xff]  ;;  %v14998_v23 = vmax.f32 %v14983_v33, 0.0  ;;  %v15004_v33 = vld [vmem:[#allocation74_spill] sm:$0xff] }
 0x355   :  { %1957 = vst.msk [vmem:[#allocation2 + $0x1e9] sm:$0xff] %vm336_vm0, %v14984_v60  ;;  %1958 = vst.msk [vmem:[#allocation2 + $0x1f9] sm:$0xff] %vm336_vm0, %v14985_v18  ;;  %v14990_v60 = vmax.f32 %v11990_v26, 0.0  ;;  %v14991_v18 = vmax.f32 %v11994_v16, 0.0  ;;  %v15002_v26 = vmax.f32 %v12030_v9, 0.0  ;;  %v2107_v16 = vld [vmem:[#allocation2 + $0xf9] sm:$0xff] }
 0x356   :  { %1959 = vst.msk [vmem:[#allocation2 + $0x201] sm:$0xff] %vm336_vm0, %v14986_v21  ;;  %1960 = vst.msk [vmem:[#allocation2 + $0x211] sm:$0xff] %vm336_vm0, %v14989_v17  ;;  %v14992_v21 = vmax.f32 %v11998_v40, 0.0  ;;  %v2091_v17 = vld [vmem:[#allocation2 + $0x39] sm:$0xff]  ;;  %v2108_v62 = vld [vmem:[#allocation2 + $0x109] sm:$0xff] }
 0x357   :  { %1961 = vst.msk [vmem:[#allocation2 + $0x219] sm:$0xff] %vm336_vm0, %v14990_v60  ;;  %1962 = vst.msk [vmem:[#allocation2 + $0x229] sm:$0xff] %vm336_vm0, %v14991_v18  ;;  %v14995_v60 = vmax.f32 %v12002_v48, 0.0  ;;  %v14996_v18 = vmax.f32 %v12006_v39, 0.0  ;;  %v15003_v48 = vld [vmem:[#allocation73_spill] sm:$0xff]  ;;  %v15006_v40 = vld [vmem:[#allocation66_spill] sm:$0xff] }
 0x358   :  { %1963 = vst.msk [vmem:[#allocation2 + $0x231] sm:$0xff] %vm336_vm0, %v14992_v21  ;;  %v14997_v21 = vmax.f32 %v14982_v12, 0.0  ;;  %1967 = vst.msk [vmem:[#allocation2 + $0x261] sm:$0xff] %vm336_vm0, %v14998_v23  ;;  %v15001_v23 = vmax.f32 %v12026_v8, 0.0  ;;  %v15005_v12 = vld [vmem:[#allocation67_spill] sm:$0xff]  ;;  %v15011_v39 = vld [vmem:[#allocation45_spill] sm:$0xff] }
 0x359   :  { %1964 = vst.msk [vmem:[#allocation2 + $0x241] sm:$0xff] %vm336_vm0, %v14995_v60  ;;  %1965 = vst.msk [vmem:[#allocation2 + $0x249] sm:$0xff] %vm336_vm0, %v14996_v18  ;;  %v14999_v18 = vmax.f32 %v14987_v22, 0.0  ;;  %v15012_v60 = vmax.f32 %v12050_v36, 0.0  ;;  %v12328_v22 = vpack.c.bf16 %v2091_v17, %v2090_v13  ;;  %v15021_v13 = vmax.f32 %v12086_v55, 0.0  ;;  %v2106_v8 = vld [vmem:[#allocation2 + $0xf1] sm:$0xff] }
 0x35a   :  { %1966 = vst.msk [vmem:[#allocation2 + $0x259] sm:$0xff] %vm336_vm0, %v14997_v21  ;;  %v15000_v21 = vmax.f32 %v14988_v2, 0.0  ;;  %1970 = vst.msk [vmem:[#allocation2 + $0x289] sm:$0xff] %vm336_vm0, %v15001_v23  ;;  %v15007_v2 = vmax.f32 %v14993_v34, 0.0  ;;  %v15009_v23 = vmax.f32 %v12042_v42, 0.0  ;;  %v2100_v42 = vld [vmem:[#allocation2 + $0xa9] sm:$0xff]  ;;  %v12430_v41 = vpack.c.bf16 %v2107_v16, %v2106_v8 }
 0x35b   :  { %1968 = vst.msk [vmem:[#allocation2 + $0x271] sm:$0xff] %vm336_vm0, %v14999_v18  ;;  %1971 = vst.msk [vmem:[#allocation2 + $0x291] sm:$0xff] %vm336_vm0, %v15002_v26  ;;  %v15010_v26 = vmax.f32 %v12046_v29, 0.0  ;;  %v15016_v18 = vmax.f32 %v15003_v48, 0.0  ;;  %v2110_v16 = vld [vmem:[#allocation2 + $0x121] sm:$0xff]  ;;  %v2111_v8 = vld [vmem:[#allocation2 + $0x129] sm:$0xff] }
 0x35c   :  { %1969 = vst.msk [vmem:[#allocation2 + $0x279] sm:$0xff] %vm336_vm0, %v15000_v21  ;;  %1972 = vst.msk [vmem:[#allocation2 + $0x2a1] sm:$0xff] %vm336_vm0, %v15007_v2  ;;  %v15008_v21 = vmax.f32 %v14994_v59, 0.0  ;;  %v15013_v2 = vmax.f32 %v12054_v1, 0.0  ;;  %v2101_v59 = vld [vmem:[#allocation2 + $0xb1] sm:$0xff]  ;;  %v2112_v46 = vld [vmem:[#allocation2 + $0x139] sm:$0xff] }
 0x35d   :  { %1974 = vst.msk [vmem:[#allocation2 + $0x2b9] sm:$0xff] %vm336_vm0, %v15009_v23  ;;  %1975 = vst.msk [vmem:[#allocation2 + $0x2c1] sm:$0xff] %vm336_vm0, %v15010_v26  ;;  %v15015_v23 = vmax.f32 %v12062_v30, 0.0  ;;  %v12326_v26 = vpack.c.bf16 %v2089_v14, %v2088_v6  ;;  %v15020_v6 = vmax.f32 %v15011_v39, 0.0  ;;  %v3579_v14 = vld [vmem:[#allocation2 + $0x1f8] sm:$0xff]  ;;  %v3580_v17 = vld [vmem:[#allocation2 + $0x200] sm:$0xff] }
 0x35e   :  { %1973 = vst.msk [vmem:[#allocation2 + $0x2a9] sm:$0xff] %vm336_vm0, %v15008_v21  ;;  %1976 = vst.msk [vmem:[#allocation2 + $0x2d1] sm:$0xff] %vm336_vm0, %v15012_v60  ;;  %v15014_v21 = vmax.f32 %v12058_v37, 0.0  ;;  %v15017_v60 = vmax.f32 %v15004_v33, 0.0  ;;  %v2094_v39 = vld [vmem:[#allocation2 + $0x61] sm:$0xff]  ;;  %v2099_v37 = vld [vmem:[#allocation2 + $0x99] sm:$0xff] }
 0x35f   :  { %1977 = vst.msk [vmem:[#allocation2 + $0x2d9] sm:$0xff] %vm336_vm0, %v15013_v2  ;;  %1979 = vst.msk [vmem:[#allocation2 + $0x2f1] sm:$0xff] %vm336_vm0, %v15015_v23  ;;  %v15018_v2 = vmax.f32 %v15005_v12, 0.0  ;;  %8880 = vmatmul.mubr.msk.bf16.vlgmr.msra.gmra.mrb[68].mxu0 %vm336_vm0, %v12326_v26  ;;  %v3581_v23 = vld [vmem:[#allocation2 + $0x210] sm:$0xff]  ;;  %v2113_v4 = vld [vmem:[#allocation2 + $0x141] sm:$0xff] }
 0x360   :  { %1978 = vst.msk [vmem:[#allocation2 + $0x2e9] sm:$0xff] %vm336_vm0, %v15014_v21  ;;  %1980 = vst.msk [vmem:[#allocation2 + $0x301] sm:$0xff] %vm336_vm0, %v15016_v18  ;;  %v15019_v21 = vmax.f32 %v15006_v40, 0.0  ;;  %v12350_v18 = vpack.c.bf16 %v3580_v17, %v3579_v14  ;;  %8883 = vmatprep.mubr.msk.bf16.mxu0 %vm336_vm0, %v12328_v22  ;;  %v2092_v14 = vld [vmem:[#allocation2 + $0x49] sm:$0xff]  ;;  %v2093_v17 = vld [vmem:[#allocation2 + $0x51] sm:$0xff] }
 0x361   :  { %1981 = vst.msk [vmem:[#allocation2 + $0x309] sm:$0xff] %vm336_vm0, %v15017_v60  ;;  %1982 = vst.msk [vmem:[#allocation2 + $0x319] sm:$0xff] %vm336_vm0, %v15018_v2  ;;  %v3582_v60 = vld [vmem:[#allocation2 + $0x218] sm:$0xff]  ;;  %v3583_v2 = vld [vmem:[#allocation2 + $0x228] sm:$0xff] }
 0x362   :  { %1983 = vst.msk [vmem:[#allocation2 + $0x321] sm:$0xff] %vm336_vm0, %v15019_v21  ;;  %1984 = vst.msk [vmem:[#allocation2 + $0x331] sm:$0xff] %vm336_vm0, %v15020_v6  ;;  %v12354_v21 = vpack.c.bf16 %v3582_v60, %v3581_v23  ;;  %v3584_v6 = vld [vmem:[#allocation2 + $0x230] sm:$0xff]  ;;  %9119 = vmatprep.mubr.msk.bf16.mxu1 %vm336_vm0, %v12350_v18  ;;  %v12368_v60 = vpack.c.bf16 %v2093_v17, %v2092_v14  ;;  %v3585_v12 = vld [vmem:[#allocation2 + $0x240] sm:$0xff] }
 0x363   :  { %1985 = vst.msk [vmem:[#allocation2 + $0x339] sm:$0xff] %vm336_vm0, %v15021_v13  ;;  %v10401_v13 = vld [vmem:[%s14477_s4 + $0x48] sm:$0xff]   ;;  %v12361_v55 = vpack.c.bf16 %v3584_v6, %v3583_v2  ;;  %v15022_v23 = vld [vmem:[#allocation48_spill] sm:$0xff]  ;;  %v3587_v48 = vld [vmem:[#allocation2 + $0x258] sm:$0xff] }
 0x364   :  { %9120 = vmatmul.mubr.msk.bf16.vlgmr.msra.gmra.mrb[8].mxu1 %vm336_vm0, %v12354_v21  ;;  %v2095_v40 = vld [vmem:[#allocation2 + $0x69] sm:$0xff]  ;;  %v3588_v30 = vld [vmem:[#allocation2 + $0x260] sm:$0xff]  ;;  %v2117_v28 = vld [vmem:[#allocation2 + $0x171] sm:$0xff] }
 0x365   :  { %9123 = vmatprep.mubr.msk.bf16.mxu1 %vm336_vm0, %v12361_v55  ;;  %9148 = vmatpush3.bf16.msra.mxu1 %v15022_v23  ;;  %v12373_v2 = vld [vmem:[%s14477_s4 + $0x50] sm:$0xff]   ;;  %v12375_v6 = vpack.c.bf16 %v2095_v40, %v2094_v39  ;;  %v3586_v33 = vld [vmem:[#allocation2 + $0x248] sm:$0xff]  ;;  %v12384_v17 = vpack.c.bf16 %v3588_v30, %v3587_v48  ;;  %v2096_v23 = vld [vmem:[#allocation2 + $0x79] sm:$0xff] }
 0x366   :  { %9149 = vmatprep.subr.bf16.mxu1 %v10401_v13  ;;  %v12381_v14 = vpack.c.bf16 %v3586_v33, %v3585_v12  ;;  %v2097_v40 = vld [vmem:[#allocation2 + $0x81] sm:$0xff]  ;;  %v2098_v39 = vld [vmem:[#allocation2 + $0x91] sm:$0xff] }
 0x367   :  { %8884 = vmatmul.mubr.msk.bf16.gmra.mrb[72].mxu0 %vm336_vm0, %v12368_v60  ;;  %v12390_v1 = vpack.c.bf16 %v2097_v40, %v2096_v23  ;;  %v12392_v36 = vpack.c.bf16 %v2099_v37, %v2098_v39  ;;  %v3589_v33 = vld [vmem:[#allocation2 + $0x270] sm:$0xff]  ;;  %v3590_v12 = vld [vmem:[#allocation2 + $0x278] sm:$0xff]  ;;  %v3591_v48 = vld [vmem:[#allocation2 + $0x288] sm:$0xff]  ;;  %v12406_v40 = vpack.c.bf16 %v2101_v59, %v2100_v42 }
 0x368   :  { %8887 = vmatprep.mubr.msk.bf16.mxu0 %vm336_vm0, %v12375_v6  ;;  %v3592_v30 = vld [vmem:[#allocation2 + $0x290] sm:$0xff]  ;;  %v2102_v37 = vld [vmem:[#allocation2 + $0xc1] sm:$0xff] }
 0x369   :  { %9150 = vmatpush3.bf16.msra.mxu1 %v10401_v13  ;;  %v12398_v13 = vpack.c.bf16 %v3590_v12, %v3589_v33  ;;  %v12400_v29 = vpack.c.bf16 %v3592_v30, %v3591_v48  ;;  %v2103_v23 = vld [vmem:[#allocation2 + $0xc9] sm:$0xff]  ;;  %v3593_v39 = vld [vmem:[#allocation2 + $0x2a0] sm:$0xff]  ;;  %v3595_v48 = vld [vmem:[#allocation2 + $0x2b8] sm:$0xff] }
 0x36a   :  { %9215 = vmatprep.subr.bf16.mxu1 %v12373_v2  ;;  %v12408_v34 = vpack.c.bf16 %v2103_v23, %v2102_v37  ;;  %v3594_v9 = vld [vmem:[#allocation2 + $0x2a8] sm:$0xff]  ;;  %v10403_v33 = vld [vmem:[%s14477_s4] sm:$0xff]   ;;  %v3605_v38 = vld [vmem:[#allocation2 + $0x330] sm:$0xff] }
 0x36b   :  { %v10404_v12 = vld [vmem:[%s14477_s4 + $0x8] sm:$0xff]   ;;  %v3596_v30 = vld [vmem:[#allocation2 + $0x2c0] sm:$0xff]  ;;  %8943 = vmatprep.subr.bf16.mxu0 %v10403_v33  ;;  %v12420_v59 = vpack.c.bf16 %v3594_v9, %v3593_v39  ;;  %v3597_v9 = vld [vmem:[#allocation2 + $0x2d0] sm:$0xff] }
 0x36c   :  { %9124 = vmatmul.mubr.msk.bf16.gmra.mrb[12].mxu1 %vm336_vm0, %v12381_v14  ;;  %8944 = vmatpush3.bf16.msra.mxu0 %v10403_v33  ;;  %v12422_v42 = vpack.c.bf16 %v3596_v30, %v3595_v48  ;;  %v2104_v37 = vld [vmem:[#allocation2 + $0xd9] sm:$0xff]  ;;  %v2105_v23 = vld [vmem:[#allocation2 + $0xe1] sm:$0xff]  ;;  %v3600_v48 = vld [vmem:[#allocation2 + $0x2f0] sm:$0xff] }
 0x36d   :  { %9127 = vmatprep.mubr.msk.bf16.mxu1 %vm336_vm0, %v12384_v17  ;;  %8945 = vmatprep.subr.bf16.mxu0 %v10404_v12  ;;  %v12428_v43 = vpack.c.bf16 %v2105_v23, %v2104_v37  ;;  %v3598_v39 = vld [vmem:[#allocation2 + $0x2d8] sm:$0xff]  ;;  %v3599_v33 = vld [vmem:[#allocation2 + $0x2e8] sm:$0xff]  ;;  %v12446_v23 = vpack.c.bf16 %v2111_v8, %v2110_v16  ;;  %v3601_v58 = vld [vmem:[#allocation2 + $0x300] sm:$0xff]  ;;  %v12460_v16 = vpack.c.bf16 %v2113_v4, %v2112_v46 }
 0x36e   :  { %v12436_v30 = vpack.c.bf16 %v3598_v39, %v3597_v9  ;;  %v12438_v57 = vpack.c.bf16 %v3600_v48, %v3599_v33  ;;  %v2109_v37 = vld [vmem:[#allocation2 + $0x111] sm:$0xff]  ;;  %v3602_v51 = vld [vmem:[#allocation2 + $0x308] sm:$0xff]  ;;  %v3604_v39 = vld [vmem:[#allocation2 + $0x320] sm:$0xff] }
 0x36f   :  { %8888 = vmatmul.mubr.msk.bf16.gmra.mrb[76].mxu0 %vm336_vm0, %v12390_v1  ;;  %v3603_v9 = vld [vmem:[#allocation2 + $0x318] sm:$0xff]  ;;  %v12452_v33 = vpack.c.bf16 %v3602_v51, %v3601_v58  ;;  %v2149_v20 = vld [vmem:[#allocation2 + $0x321] sm:$0xff]  ;;  %v4702_v45 = vld [vmem:[#allocation2 + $0x1ea] sm:$0xff] }
 0x370   :  { %8891 = vmatprep.mubr.msk.bf16.mxu0 %vm336_vm0, %v12392_v36  ;;  %8946 = vmatpush3.bf16.msra.mxu0 %v10404_v12  ;;  %v12444_v12 = vpack.c.bf16 %v2109_v37, %v2108_v62  ;;  %v12454_v48 = vpack.c.bf16 %v3604_v39, %v3603_v9  ;;  %v2114_v62 = vld [vmem:[#allocation2 + $0x151] sm:$0xff]  ;;  %v2115_v37 = vld [vmem:[#allocation2 + $0x159] sm:$0xff]  ;;  %v2116_v39 = vld [vmem:[#allocation2 + $0x169] sm:$0xff] }
 0x371   :  { %v12462_v8 = vpack.c.bf16 %v2115_v37, %v2114_v62  ;;  %v3606_v32 = vld [vmem:[#allocation2 + $0x338] sm:$0xff]  ;;  %v12471_v46 = vpack.c.bf16 %v2117_v28, %v2116_v39  ;;  %v2122_v37 = vld [vmem:[#allocation2 + $0x1e1] sm:$0xff]  ;;  %v6383_v52 = vld [vmem:[#allocation2 + $0x18a] sm:$0xff] }
 0x372   :  { %v3638_v51 = vpack.c.bf16 %v3606_v32, %v3605_v38  ;;  %v2118_v58 = vld [vmem:[#allocation2 + $0x1b1] sm:$0xff]  ;;  %v2119_v9 = vld [vmem:[#allocation2 + $0x1b9] sm:$0xff]  ;;  %v2120_v38 = vld [vmem:[#allocation2 + $0x1c9] sm:$0xff] }
 0x373   :  { %v2166_v4 = vpack.c.bf16 %v2119_v9, %v2118_v58  ;;  %v10405_v32 = vld [vmem:[%s14477_s4 + $0x58] sm:$0xff]   ;;  %v2125_v58 = vld [vmem:[#allocation2 + $0x201] sm:$0xff]  ;;  %v6387_v15 = vld [vmem:[#allocation2 + $0x1ea] sm:$0xff] }
 0x374   :  { %9128 = vmatmul.mubr.msk.bf16.gmra.mrb[16].mxu1 %vm336_vm0, %v12398_v13  ;;  %v2121_v62 = vld [vmem:[#allocation2 + $0x1d1] sm:$0xff]  ;;  %v2127_v9 = vld [vmem:[#allocation2 + $0x219] sm:$0xff]  ;;  %v4704_v27 = vld [vmem:[#allocation2 + $0x202] sm:$0xff] }
 0x375   :  { %9131 = vmatprep.mubr.msk.bf16.mxu1 %vm336_vm0, %v12400_v29  ;;  %v12484_v28 = vpack.c.bf16 %v2121_v62, %v2120_v38  ;;  %v2131_v38 = vld [vmem:[#allocation2 + $0x249] sm:$0xff]  ;;  %v6390_v56 = vld [vmem:[#allocation2 + $0x212] sm:$0xff]  ;;  %v6391_v50 = vld [vmem:[#allocation2 + $0x21a] sm:$0xff] }
 0x376   :  { %v6382_v0 = vld [vmem:[#allocation2 + $0x182] sm:$0xff]  ;;  %v6393_v19 = vld [vmem:[#allocation2 + $0x232] sm:$0xff]  ;;  %v6395_v31 = vld [vmem:[#allocation2 + $0x24a] sm:$0xff] }
 0x377   :  { %8892 = vmatmul.mubr.msk.bf16.gmra.mrb[80].mxu0 %vm336_vm0, %v12406_v40  ;;  %v6432_v61 = vpack.c.bf16 %v6383_v52, %v6382_v0  ;;  %v6386_v47 = vld [vmem:[#allocation2 + $0x1e2] sm:$0xff]  ;;  %v6388_v0 = vld [vmem:[#allocation2 + $0x1fa] sm:$0xff] }
 0x378   :  { %8895 = vmatprep.mubr.msk.bf16.mxu0 %vm336_vm0, %v12408_v34  ;;  %v6434_v54 = vpack.c.bf16 %v6387_v15, %v6386_v47  ;;  %v6394_v5 = vld [vmem:[#allocation2 + $0x242] sm:$0xff] }
 0x37c   :  { %9132 = vmatmul.mubr.msk.bf16.gmra.mrb[20].mxu1 %vm336_vm0, %v12420_v59 }
 0x37d   :  { %9135 = vmatprep.mubr.msk.bf16.mxu1 %vm336_vm0, %v12422_v42 }
 0x37f   :  { %8896 = vmatmul.mubr.msk.bf16.gmra.mrb[84].mxu0 %vm336_vm0, %v12428_v43 }
 0x380   :  { %8899 = vmatprep.mubr.msk.bf16.mxu0 %vm336_vm0, %v12430_v41 }
 0x384   :  { %9136 = vmatmul.mubr.msk.bf16.gmra.mrb[24].mxu1 %vm336_vm0, %v12436_v30 }
 0x385   :  { %9139 = vmatprep.mubr.msk.bf16.mxu1 %vm336_vm0, %v12438_v57 }
 0x387   :  { %8900 = vmatmul.mubr.msk.bf16.gmra.mrb[88].mxu0 %vm336_vm0, %v12444_v12 }
 0x388   :  { %8903 = vmatprep.mubr.msk.bf16.mxu0 %vm336_vm0, %v12446_v23 }
 0x38c   :  { %9140 = vmatmul.mubr.msk.bf16.gmra.mrb[28].mxu1 %vm336_vm0, %v12452_v33 }
 0x38d   :  { %9143 = vmatprep.mubr.msk.bf16.mxu1 %vm336_vm0, %v12454_v48 }
 0x38f   :  { %8904 = vmatmul.mubr.msk.bf16.gmra.mrb[92].mxu0 %vm336_vm0, %v12460_v16 }
 0x390   :  { %8907 = vmatprep.mubr.msk.bf16.mxu0 %vm336_vm0, %v12462_v8 }
 0x394   :  { %9144 = vmatmul.mubr.msk.bf16.gmra.mrb[32].mxu1 %vm336_vm0, %v3638_v51  ;;  %v2123_v51 = vld [vmem:[#allocation2 + $0x1e9] sm:$0xff] }
 0x395   :  { %9151 = vmatprep.mubr.msk.bf16.mxu1 %vm336_vm0, %v12326_v26  ;;  %v12486_v26 = vpack.c.bf16 %v2123_v51, %v2122_v37  ;;  %v2132_v37 = vld [vmem:[#allocation2 + $0x259] sm:$0xff]  ;;  %v2133_v51 = vld [vmem:[#allocation2 + $0x261] sm:$0xff] }
 0x397   :  { %8908 = vmatmul.mubr.msk.bf16.gmra.mrb[96].mxu0 %vm336_vm0, %v12471_v46 }
 0x398   :  { %8911 = vmatprep.mubr.msk.bf16.mxu0 %vm336_vm0, %v2166_v4  ;;  %v2128_v4 = vld [vmem:[#allocation2 + $0x229] sm:$0xff] }
 0x39c   :  { %9152 = vmatmul.mubr.msk.bf16.vlgmr.msra.gmra.mrb[36].mxu1 %vm336_vm0, %v12328_v22  ;;  %v2124_v22 = vld [vmem:[#allocation2 + $0x1f9] sm:$0xff] }
 0x39d   :  { %9155 = vmatprep.mubr.msk.bf16.mxu1 %vm336_vm0, %v12368_v60  ;;  %9216 = vmatpush3.bf16.msra.mxu1 %v12373_v2  ;;  %v2126_v60 = vld [vmem:[#allocation2 + $0x211] sm:$0xff]  ;;  %v12496_v2 = vpack.c.bf16 %v2125_v58, %v2124_v22  ;;  %v2135_v22 = vld [vmem:[#allocation2 + $0x279] sm:$0xff] }
 0x39e   :  { %9217 = vmatprep.subr.bf16.mxu1 %v10405_v32  ;;  %v12498_v39 = vpack.c.bf16 %v2127_v9, %v2126_v60  ;;  %v2136_v60 = vld [vmem:[#allocation2 + $0x289] sm:$0xff]  ;;  %v2137_v9 = vld [vmem:[#allocation2 + $0x291] sm:$0xff] }
 0x39f   :  { %8912 = vmatmul.mubr.msk.bf16.gmra.mrb[100].mxu0 %vm336_vm0, %v12484_v28 }
 0x3a0   :  { %8915 = vmatprep.mubr.msk.bf16.mxu0 %vm336_vm0, %v12486_v26 }
 0x3a1   :  { %9218 = vmatpush3.bf16.msra.mxu1 %v10405_v32  ;;  %v2129_v32 = vld [vmem:[#allocation2 + $0x231] sm:$0xff] }
 0x3a4   :  { %9156 = vmatmul.mubr.msk.bf16.gmra.mrb[40].mxu1 %vm336_vm0, %v12375_v6  ;;  %v2130_v6 = vld [vmem:[#allocation2 + $0x241] sm:$0xff] }
 0x3a5   :  { %9159 = vmatprep.mubr.msk.bf16.mxu1 %vm336_vm0, %v12390_v1  ;;  %v12508_v1 = vpack.c.bf16 %v2129_v32, %v2128_v4  ;;  %v12510_v62 = vpack.c.bf16 %v2131_v38, %v2130_v6  ;;  %v2139_v4 = vld [vmem:[#allocation2 + $0x2a9] sm:$0xff]  ;;  %v12541_v6 = vld [vmem:[%s14477_s4 + $0x60] sm:$0xff]  }
 0x3a6   :  { %9283 = vmatprep.subr.bf16.mxu1 %v12541_v6  ;;  %v2141_v38 = vld [vmem:[#allocation2 + $0x2c1] sm:$0xff] }
 0x3a7   :  { %8916 = vmatmul.mubr.msk.bf16.gmra.mrb[104].mxu0 %vm336_vm0, %v12496_v2 }
 0x3a8   :  { %8919 = vmatprep.mubr.msk.bf16.mxu0 %vm336_vm0, %v12498_v39 }
 0x3ac   :  { %9160 = vmatmul.mubr.msk.bf16.gmra.mrb[44].mxu1 %vm336_vm0, %v12392_v36  ;;  %v2134_v36 = vld [vmem:[#allocation2 + $0x271] sm:$0xff] }
 0x3ad   :  { %9163 = vmatprep.mubr.msk.bf16.mxu1 %vm336_vm0, %v12406_v40  ;;  %v12520_v40 = vpack.c.bf16 %v2133_v51, %v2132_v37  ;;  %v12522_v58 = vpack.c.bf16 %v2135_v22, %v2134_v36  ;;  %v2143_v37 = vld [vmem:[#allocation2 + $0x2d9] sm:$0xff]  ;;  %v2144_v22 = vld [vmem:[#allocation2 + $0x2e9] sm:$0xff] }
 0x3af   :  { %8920 = vmatmul.mubr.msk.bf16.gmra.mrb[108].mxu0 %vm336_vm0, %v12508_v1 }
 0x3b0   :  { %8923 = vmatprep.mubr.msk.bf16.mxu0 %vm336_vm0, %v12510_v62 }
 0x3b4   :  { %9164 = vmatmul.mubr.msk.bf16.gmra.mrb[48].mxu1 %vm336_vm0, %v12408_v34  ;;  %v2138_v34 = vld [vmem:[#allocation2 + $0x2a1] sm:$0xff] }
 0x3b5   :  { %9167 = vmatprep.mubr.msk.bf16.mxu1 %vm336_vm0, %v12428_v43  ;;  %v12532_v43 = vpack.c.bf16 %v2137_v9, %v2136_v60  ;;  %v12534_v32 = vpack.c.bf16 %v2139_v4, %v2138_v34  ;;  %v2145_v60 = vld [vmem:[#allocation2 + $0x2f1] sm:$0xff]  ;;  %v2147_v9 = vld [vmem:[#allocation2 + $0x309] sm:$0xff]  ;;  %v4135_v4 = vld [vmem:[#allocation2 + $0x181] sm:$0xff] }
 0x3b7   :  { %8924 = vmatmul.mubr.msk.bf16.gmra.mrb[112].mxu0 %vm336_vm0, %v12520_v40 }
 0x3b8   :  { %8927 = vmatprep.mubr.msk.bf16.mxu0 %vm336_vm0, %v12522_v58 }
 0x3bc   :  { %9168 = vmatmul.mubr.msk.bf16.gmra.mrb[52].mxu1 %vm336_vm0, %v12430_v41  ;;  %v2140_v41 = vld [vmem:[#allocation2 + $0x2b9] sm:$0xff] }
 0x3bd   :  { %9171 = vmatprep.mubr.msk.bf16.mxu1 %vm336_vm0, %v12444_v12  ;;  %v2142_v12 = vld [vmem:[#allocation2 + $0x2d1] sm:$0xff]  ;;  %v12550_v51 = vpack.c.bf16 %v2141_v38, %v2140_v41  ;;  %v4136_v41 = vld [vmem:[#allocation2 + $0x189] sm:$0xff] }
 0x3be   :  { %v12552_v36 = vpack.c.bf16 %v2143_v37, %v2142_v12  ;;  %v4184_v38 = vpack.c.bf16 %v4136_v41, %v4135_v4  ;;  %v1986_v12 = vld [vmem:[#allocation2] sm:$0xff]  ;;  %v1990_v4 = vld [vmem:[#allocation2 + $0x30] sm:$0xff]  ;;  %v10408_v41 = vld [vmem:[%s14477_s4 + $0x28] sm:$0xff]  }
 0x3bf   :  { %8928 = vmatmul.mubr.msk.bf16.gmra.mrb[116].mxu0 %vm336_vm0, %v12532_v43  ;;  %v2148_v37 = vld [vmem:[#allocation2 + $0x319] sm:$0xff] }
 0x3c0   :  { %8931 = vmatprep.mubr.msk.bf16.mxu0 %vm336_vm0, %v12534_v32 }
 0x3c4   :  { %9172 = vmatmul.mubr.msk.bf16.gmra.mrb[56].mxu1 %vm336_vm0, %v12446_v23  ;;  %v2146_v23 = vld [vmem:[#allocation2 + $0x301] sm:$0xff] }
 0x3c5   :  { %9175 = vmatprep.mubr.msk.bf16.mxu1 %vm336_vm0, %v12460_v16  ;;  %v12562_v16 = vpack.c.bf16 %v2145_v60, %v2144_v22  ;;  %v12564_v34 = vpack.c.bf16 %v2147_v9, %v2146_v23  ;;  %v12573_v22 = vpack.c.bf16 %v2149_v20, %v2148_v37  ;;  %v10407_v60 = vld [vmem:[%s14477_s4 + $0x20] sm:$0xff]   ;;  %v1988_v23 = vld [vmem:[#allocation2 + $0x18] sm:$0xff] }
 0x3c6   :  { %9011 = vmatprep.subr.bf16.mxu0 %v10407_v60  ;;  %v1989_v9 = vld [vmem:[#allocation2 + $0x20] sm:$0xff] }
 0x3c7   :  { %8932 = vmatmul.mubr.msk.bf16.gmra.mrb[120].mxu0 %vm336_vm0, %v12550_v51  ;;  %v2051_v20 = vpack.c.bf16 %v1989_v9, %v1988_v23  ;;  %v1998_v23 = vld [vmem:[#allocation2 + $0x90] sm:$0xff]  ;;  %v1999_v9 = vld [vmem:[#allocation2 + $0x98] sm:$0xff] }
 0x3c8   :  { %8935 = vmatprep.mubr.msk.bf16.mxu0 %vm336_vm0, %v12552_v36 }
 0x3cc   :  { %9176 = vmatmul.mubr.msk.bf16.gmra.mrb[60].mxu1 %vm336_vm0, %v12462_v8  ;;  %v1987_v8 = vld [vmem:[#allocation2 + $0x8] sm:$0xff] }
 0x3cd   :  { %9179 = vmatprep.mubr.msk.bf16.mxu1 %vm336_vm0, %v12471_v46  ;;  %v2050_v46 = vpack.c.bf16 %v1987_v8, %v1986_v12  ;;  %v1993_v12 = vld [vmem:[#allocation2 + $0x50] sm:$0xff]  ;;  %v1995_v8 = vld [vmem:[#allocation2 + $0x68] sm:$0xff] }
 0x3cf   :  { %8936 = vmatmul.mubr.msk.bf16.gmra.mrb[124].mxu0 %vm336_vm0, %v12562_v16 }
 0x3d0   :  { %8939 = vmatprep.mubr.msk.bf16.mxu0 %vm336_vm0, %v12564_v34 }
 0x3d4   :  { %9180 = vmatmul.mubr.msk.bf16.gmra.mrb[64].mxu1 %vm336_vm0, %v4184_v38 }
 0x3d5   :  { %9183 = vmatprep.mubr.msk.bf16.mxu1 %vm336_vm0, %v12484_v28  ;;  %v1991_v28 = vld [vmem:[#allocation2 + $0x38] sm:$0xff] }
 0x3d6   :  { %v12588_v38 = vpack.c.bf16 %v1991_v28, %v1990_v4  ;;  %v12617_v28 = vpack.c.bf16 %v1999_v9, %v1998_v23  ;;  %v2008_v23 = vld [vmem:[#allocation2 + $0x108] sm:$0xff]  ;;  %v2009_v9 = vld [vmem:[#allocation2 + $0x110] sm:$0xff] }
 0x3d7   :  { %8940 = vmatmul.mubr.msk.bf16.gmra.mrb[128].mxu0 %vm336_vm0, %v12573_v22 }
 0x3d8   :  { %8947 = vmatprep.mubr.msk.bf16.mxu0 %vm336_vm0, %v2050_v46  ;;  %v12602_v46 = vld [vmem:[%s14477_s4 + $0x30] sm:$0xff]  }
 0x3dc   :  { %9184 = vmatmul.mubr.msk.bf16.gmra.mrb[68].mxu1 %vm336_vm0, %v12486_v26  ;;  %v1992_v26 = vld [vmem:[#allocation2 + $0x48] sm:$0xff] }
 0x3dd   :  { %9187 = vmatprep.mubr.msk.bf16.mxu1 %vm336_vm0, %v12496_v2  ;;  %v1994_v2 = vld [vmem:[#allocation2 + $0x60] sm:$0xff]  ;;  %v12597_v37 = vpack.c.bf16 %v1993_v12, %v1992_v26  ;;  %v2003_v26 = vld [vmem:[#allocation2 + $0xc8] sm:$0xff] }
 0x3df   :  { %8948 = vmatmul.mubr.msk.bf16.vlgmr.msra.gmra.mrb[68].mxu0 %vm336_vm0, %v2051_v20  ;;  %v2000_v20 = vld [vmem:[#allocation2 + $0xa8] sm:$0xff] }
 0x3e0   :  { %8951 = vmatprep.mubr.msk.bf16.mxu0 %vm336_vm0, %v12588_v38  ;;  %9012 = vmatpush3.bf16.msra.mxu0 %v10407_v60  ;;  %v12605_v60 = vpack.c.bf16 %v1995_v8, %v1994_v2  ;;  %v2004_v2 = vld [vmem:[#allocation2 + $0xd8] sm:$0xff]  ;;  %v2005_v8 = vld [vmem:[#allocation2 + $0xe0] sm:$0xff] }
 0x3e1   :  { %9013 = vmatprep.subr.bf16.mxu0 %v10408_v41 }
 0x3e4   :  { %9188 = vmatmul.mubr.msk.bf16.gmra.mrb[8].mxu1 %vm336_vm0, %v12498_v39  ;;  %9014 = vmatpush3.bf16.msra.mxu0 %v10408_v41  ;;  %v1996_v39 = vld [vmem:[#allocation2 + $0x78] sm:$0xff]  ;;  %v2001_v41 = vld [vmem:[#allocation2 + $0xb0] sm:$0xff] }
 0x3e5   :  { %9191 = vmatprep.mubr.msk.bf16.mxu1 %vm336_vm0, %v12508_v1  ;;  %9079 = vmatprep.subr.bf16.mxu0 %v12602_v46  ;;  %v1997_v1 = vld [vmem:[#allocation2 + $0x80] sm:$0xff] }
 0x3e6   :  { %v12615_v4 = vpack.c.bf16 %v1997_v1, %v1996_v39  ;;  %v2007_v39 = vld [vmem:[#allocation2 + $0xf8] sm:$0xff] }
 0x3e7   :  { %8952 = vmatmul.mubr.msk.bf16.gmra.mrb[72].mxu0 %vm336_vm0, %v12597_v37 }
 0x3e8   :  { %8955 = vmatprep.mubr.msk.bf16.mxu0 %vm336_vm0, %v12605_v60 }
 0x3ec   :  { %9192 = vmatmul.mubr.msk.bf16.gmra.mrb[12].mxu1 %vm336_vm0, %v12510_v62  ;;  %v2002_v62 = vld [vmem:[#allocation2 + $0xc0] sm:$0xff] }
 0x3ed   :  { %9195 = vmatprep.mubr.msk.bf16.mxu1 %vm336_vm0, %v12520_v40  ;;  %v12627_v40 = vpack.c.bf16 %v2001_v41, %v2000_v20  ;;  %v12629_v12 = vpack.c.bf16 %v2003_v26, %v2002_v62  ;;  %v2011_v20 = vld [vmem:[#allocation2 + $0x128] sm:$0xff]  ;;  %v2012_v62 = vld [vmem:[#allocation2 + $0x138] sm:$0xff]  ;;  %v2013_v26 = vld [vmem:[#allocation2 + $0x140] sm:$0xff] }
 0x3ef   :  { %8956 = vmatmul.mubr.msk.bf16.gmra.mrb[76].mxu0 %vm336_vm0, %v12615_v4 }
 0x3f0   :  { %8959 = vmatprep.mubr.msk.bf16.mxu0 %vm336_vm0, %v12617_v28 }
 0x3f4   :  { %9196 = vmatmul.mubr.msk.bf16.gmra.mrb[16].mxu1 %vm336_vm0, %v12522_v58  ;;  %v2006_v58 = vld [vmem:[#allocation2 + $0xf0] sm:$0xff] }
 0x3f5   :  { %9199 = vmatprep.mubr.msk.bf16.mxu1 %vm336_vm0, %v12532_v43  ;;  %v12639_v43 = vpack.c.bf16 %v2005_v8, %v2004_v2  ;;  %v12641_v1 = vpack.c.bf16 %v2007_v39, %v2006_v58  ;;  %v2015_v2 = vld [vmem:[#allocation2 + $0x158] sm:$0xff] }
 0x3f6   :  { %v4167_v58 = vld [vmem:[#allocation2 + $0x331] sm:$0xff]  ;;  %v4168_v39 = vld [vmem:[#allocation2 + $0x339] sm:$0xff] }
 0x3f7   :  { %8960 = vmatmul.mubr.msk.bf16.gmra.mrb[80].mxu0 %vm336_vm0, %v12627_v40 }
 0x3f8   :  { %8963 = vmatprep.mubr.msk.bf16.mxu0 %vm336_vm0, %v12629_v12 }
 0x3fc   :  { %9200 = vmatmul.mubr.msk.bf16.gmra.mrb[20].mxu1 %vm336_vm0, %v12534_v32  ;;  %v2010_v32 = vld [vmem:[#allocation2 + $0x120] sm:$0xff] }
 0x3fd   :  { %9203 = vmatprep.mubr.msk.bf16.mxu1 %vm336_vm0, %v12550_v51  ;;  %v12651_v51 = vpack.c.bf16 %v2009_v9, %v2008_v23  ;;  %v12653_v41 = vpack.c.bf16 %v2011_v20, %v2010_v32  ;;  %v4667_v23 = vld [vmem:[#allocation2 + $0x1a] sm:$0xff]  ;;  %v4668_v9 = vld [vmem:[#allocation2 + $0x22] sm:$0xff]  ;;  %v2018_v32 = vld [vmem:[#allocation2 + $0x1b0] sm:$0xff] }
 0x3fe   :  { %v2019_v20 = vld [vmem:[#allocation2 + $0x1b8] sm:$0xff]  ;;  %v12671_v24 = vpack.c.bf16 %v4668_v9, %v4667_v23  ;;  %v10409_v9 = vld [vmem:[%s14477_s4 + $0x68] sm:$0xff]  }
 0x3ff   :  { %8964 = vmatmul.mubr.msk.bf16.gmra.mrb[84].mxu0 %vm336_vm0, %v12639_v43 }
 0x400   :  { %8967 = vmatprep.mubr.msk.bf16.mxu0 %vm336_vm0, %v12641_v1 }
 0x404   :  { %9204 = vmatmul.mubr.msk.bf16.gmra.mrb[24].mxu1 %vm336_vm0, %v12552_v36  ;;  %v2014_v36 = vld [vmem:[#allocation2 + $0x150] sm:$0xff] }
 0x405   :  { %9207 = vmatprep.mubr.msk.bf16.mxu1 %vm336_vm0, %v12562_v16  ;;  %v12663_v16 = vpack.c.bf16 %v2013_v26, %v2012_v62  ;;  %v12665_v8 = vpack.c.bf16 %v2015_v2, %v2014_v36  ;;  %v2017_v62 = vld [vmem:[#allocation2 + $0x170] sm:$0xff]  ;;  %v2066_v26 = vpack.c.bf16 %v2019_v20, %v2018_v32  ;;  %v2020_v32 = vld [vmem:[#allocation2 + $0x1c8] sm:$0xff] }
 0x406   :  { %v4669_v2 = vld [vmem:[#allocation2 + $0x32] sm:$0xff] }
 0x407   :  { %8968 = vmatmul.mubr.msk.bf16.gmra.mrb[88].mxu0 %vm336_vm0, %v12651_v51  ;;  %v12681_v23 = vpack.c.bf16 %v4670_v7, %v4669_v2  ;;  %v2021_v20 = vld [vmem:[#allocation2 + $0x1d0] sm:$0xff]  ;;  %v4673_v2 = vld [vmem:[#allocation2 + $0x62] sm:$0xff] }
 0x408   :  { %8971 = vmatprep.mubr.msk.bf16.mxu0 %vm336_vm0, %v12653_v41  ;;  %v2067_v7 = vpack.c.bf16 %v2021_v20, %v2020_v32  ;;  %v12698_v49 = vpack.c.bf16 %v4674_v11, %v4673_v2  ;;  %v4678_v32 = vld [vmem:[#allocation2 + $0x9a] sm:$0xff]  ;;  %v4679_v20 = vld [vmem:[#allocation2 + $0xaa] sm:$0xff]  ;;  %v4684_v2 = vld [vmem:[#allocation2 + $0xe2] sm:$0xff] }
 0x40c   :  { %9208 = vmatmul.mubr.msk.bf16.gmra.mrb[28].mxu1 %vm336_vm0, %v12564_v34  ;;  %v4200_v34 = vpack.c.bf16 %v4168_v39, %v4167_v58  ;;  %v4671_v58 = vld [vmem:[#allocation2 + $0x4a] sm:$0xff]  ;;  %v4672_v39 = vld [vmem:[#allocation2 + $0x52] sm:$0xff] }
 0x40d   :  { %9211 = vmatprep.mubr.msk.bf16.mxu1 %vm336_vm0, %v12573_v22  ;;  %v2016_v22 = vld [vmem:[#allocation2 + $0x168] sm:$0xff] }
 0x40e   :  { %v12676_v36 = vpack.c.bf16 %v2017_v62, %v2016_v22  ;;  %v2022_v22 = vld [vmem:[#allocation2 + $0x1e0] sm:$0xff]  ;;  %v2023_v62 = vld [vmem:[#allocation2 + $0x1e8] sm:$0xff] }
 0x40f   :  { %8972 = vmatmul.mubr.msk.bf16.gmra.mrb[92].mxu0 %vm336_vm0, %v12663_v16 }
 0x410   :  { %8975 = vmatprep.mubr.msk.bf16.mxu0 %vm336_vm0, %v12665_v8 }
 0x414   :  { %9212 = vmatmul.mubr.msk.bf16.gmra.mrb[32].mxu1 %vm336_vm0, %v4200_v34  ;;  %v12686_v34 = vpack.c.bf16 %v4672_v39, %v4671_v58  ;;  %v4675_v58 = vld [vmem:[#allocation2 + $0x7a] sm:$0xff]  ;;  %v4676_v39 = vld [vmem:[#allocation2 + $0x82] sm:$0xff] }
 0x415   :  { %9219 = vmatprep.mubr.msk.bf16.mxu1 %vm336_vm0, %v12671_v24  ;;  %v12700_v3 = vpack.c.bf16 %v4676_v39, %v4675_v58  ;;  %v4685_v39 = vld [vmem:[#allocation2 + $0xf2] sm:$0xff] }
 0x417   :  { %8976 = vmatmul.mubr.msk.bf16.gmra.mrb[96].mxu0 %vm336_vm0, %v12676_v36 }
 0x418   :  { %8979 = vmatprep.mubr.msk.bf16.mxu0 %vm336_vm0, %v2066_v26  ;;  %v12693_v26 = vpack.c.bf16 %v2023_v62, %v2022_v22  ;;  %v4680_v22 = vld [vmem:[#allocation2 + $0xb2] sm:$0xff]  ;;  %v4681_v62 = vld [vmem:[#allocation2 + $0xc2] sm:$0xff] }
 0x41c   :  { %9220 = vmatmul.mubr.msk.bf16.vlgmr.msra.gmra.mrb[36].mxu1 %vm336_vm0, %v12681_v23 }
 0x41d   :  { %9223 = vmatprep.mubr.msk.bf16.mxu1 %vm336_vm0, %v12686_v34  ;;  %9284 = vmatpush3.bf16.msra.mxu1 %v12541_v6  ;;  %v4677_v6 = vld [vmem:[#allocation2 + $0x92] sm:$0xff] }
 0x41e   :  { %9285 = vmatprep.subr.bf16.mxu1 %v10409_v9  ;;  %v12710_v11 = vpack.c.bf16 %v4678_v32, %v4677_v6  ;;  %v4686_v6 = vld [vmem:[#allocation2 + $0xfa] sm:$0xff]  ;;  %v4688_v32 = vld [vmem:[#allocation2 + $0x112] sm:$0xff] }
 0x41f   :  { %8980 = vmatmul.mubr.msk.bf16.gmra.mrb[100].mxu0 %vm336_vm0, %v2067_v7  ;;  %v4682_v7 = vld [vmem:[#allocation2 + $0xca] sm:$0xff] }
 0x420   :  { %8983 = vmatprep.mubr.msk.bf16.mxu0 %vm336_vm0, %v12693_v26 }
 0x421   :  { %9286 = vmatpush3.bf16.msra.mxu1 %v10409_v9  ;;  %v12712_v9 = vpack.c.bf16 %v4680_v22, %v4679_v20  ;;  %v4689_v22 = vld [vmem:[#allocation2 + $0x122] sm:$0xff] }
 0x424   :  { %9224 = vmatmul.mubr.msk.bf16.gmra.mrb[40].mxu1 %vm336_vm0, %v12698_v49 }
 0x425   :  { %9227 = vmatprep.mubr.msk.bf16.mxu1 %vm336_vm0, %v12700_v3 }
 0x427   :  { %8984 = vmatmul.mubr.msk.bf16.gmra.mrb[104].mxu0 %vm336_vm0, %v12350_v18  ;;  %v4683_v18 = vld [vmem:[#allocation2 + $0xda] sm:$0xff] }
 0x428   :  { %8987 = vmatprep.mubr.msk.bf16.mxu0 %vm336_vm0, %v12354_v21  ;;  %v12722_v21 = vpack.c.bf16 %v4682_v7, %v4681_v62  ;;  %v12724_v58 = vpack.c.bf16 %v4684_v2, %v4683_v18  ;;  %v4690_v62 = vld [vmem:[#allocation2 + $0x12a] sm:$0xff]  ;;  %v4692_v7 = vld [vmem:[#allocation2 + $0x142] sm:$0xff] }
 0x429   :  { %v12751_v18 = vpack.c.bf16 %v4690_v62, %v4689_v22  ;;  %v4697_v22 = vld [vmem:[#allocation2 + $0x182] sm:$0xff]  ;;  %v4698_v62 = vld [vmem:[#allocation2 + $0x18a] sm:$0xff] }
 0x42c   :  { %9228 = vmatmul.mubr.msk.bf16.gmra.mrb[44].mxu1 %vm336_vm0, %v12710_v11 }
 0x42d   :  { %9231 = vmatprep.mubr.msk.bf16.mxu1 %vm336_vm0, %v12712_v9 }
 0x42f   :  { %8988 = vmatmul.mubr.msk.bf16.gmra.mrb[108].mxu0 %vm336_vm0, %v12361_v55  ;;  %v4687_v55 = vld [vmem:[#allocation2 + $0x10a] sm:$0xff] }
 0x430   :  { %8991 = vmatprep.mubr.msk.bf16.mxu0 %vm336_vm0, %v12381_v14  ;;  %v12734_v14 = vpack.c.bf16 %v4686_v6, %v4685_v39  ;;  %v12736_v20 = vpack.c.bf16 %v4688_v32, %v4687_v55  ;;  %v4694_v39 = vld [vmem:[#allocation2 + $0x15a] sm:$0xff]  ;;  %v4695_v6 = vld [vmem:[#allocation2 + $0x16a] sm:$0xff]  ;;  %v4696_v55 = vld [vmem:[#allocation2 + $0x172] sm:$0xff] }
 0x431   :  { %v12766_v32 = vpack.c.bf16 %v4696_v55, %v4695_v6  ;;  %v4701_v55 = vld [vmem:[#allocation2 + $0x1e2] sm:$0xff] }
 0x434   :  { %9232 = vmatmul.mubr.msk.bf16.gmra.mrb[48].mxu1 %vm336_vm0, %v12722_v21 }
 0x435   :  { %9235 = vmatprep.mubr.msk.bf16.mxu1 %vm336_vm0, %v12724_v58 }
 0x437   :  { %8992 = vmatmul.mubr.msk.bf16.gmra.mrb[112].mxu0 %vm336_vm0, %v12384_v17  ;;  %v4691_v17 = vld [vmem:[#allocation2 + $0x13a] sm:$0xff] }
 0x438   :  { %8995 = vmatprep.mubr.msk.bf16.mxu0 %vm336_vm0, %v12398_v13  ;;  %v12747_v13 = vld [vmem:[%s14477_s4 + $0x70] sm:$0xff]   ;;  %v12754_v2 = vpack.c.bf16 %v4692_v7, %v4691_v17  ;;  %v2981_v7 = vld [vmem:[#allocation2 + $0x2] sm:$0xff] }
 0x439   :  { %9351 = vmatprep.subr.bf16.mxu1 %v12747_v13  ;;  %v4700_v17 = vld [vmem:[#allocation2 + $0x1d2] sm:$0xff] }
 0x43c   :  { %9236 = vmatmul.mubr.msk.bf16.gmra.mrb[52].mxu1 %vm336_vm0, %v12734_v14 }
 0x43d   :  { %9239 = vmatprep.mubr.msk.bf16.mxu1 %vm336_vm0, %v12736_v20 }
 0x43f   :  { %8996 = vmatmul.mubr.msk.bf16.gmra.mrb[116].mxu0 %vm336_vm0, %v12400_v29  ;;  %v4693_v29 = vld [vmem:[#allocation2 + $0x152] sm:$0xff] }
 0x440   :  { %8999 = vmatprep.mubr.msk.bf16.mxu0 %vm336_vm0, %v12420_v59  ;;  %v12764_v59 = vpack.c.bf16 %v4694_v39, %v4693_v29  ;;  %v2982_v29 = vld [vmem:[#allocation2 + $0xa] sm:$0xff] }
 0x441   :  { %v3045_v6 = vpack.c.bf16 %v2982_v29, %v2981_v7  ;;  %v4712_v7 = vld [vmem:[#allocation2 + $0x262] sm:$0xff] }
 0x444   :  { %9240 = vmatmul.mubr.msk.bf16.gmra.mrb[56].mxu1 %vm336_vm0, %v12751_v18 }
 0x445   :  { %9243 = vmatprep.mubr.msk.bf16.mxu1 %vm336_vm0, %v12754_v2 }
 0x447   :  { %9000 = vmatmul.mubr.msk.bf16.gmra.mrb[120].mxu0 %vm336_vm0, %v12422_v42  ;;  %v4699_v42 = vld [vmem:[#allocation2 + $0x1ca] sm:$0xff] }
 0x448   :  { %9003 = vmatprep.mubr.msk.bf16.mxu0 %vm336_vm0, %v12436_v30  ;;  %v4746_v30 = vpack.c.bf16 %v4698_v62, %v4697_v22  ;;  %v12776_v39 = vpack.c.bf16 %v4700_v17, %v4699_v42  ;;  %v4705_v62 = vld [vmem:[#allocation2 + $0x212] sm:$0xff]  ;;  %v4706_v42 = vld [vmem:[#allocation2 + $0x21a] sm:$0xff] }
 0x449   :  { %v4708_v17 = vld [vmem:[#allocation2 + $0x232] sm:$0xff] }
 0x44c   :  { %9244 = vmatmul.mubr.msk.bf16.gmra.mrb[60].mxu1 %vm336_vm0, %v12764_v59 }
 0x44d   :  { %9247 = vmatprep.mubr.msk.bf16.mxu1 %vm336_vm0, %v12766_v32 }
 0x44f   :  { %9004 = vmatmul.mubr.msk.bf16.gmra.mrb[124].mxu0 %vm336_vm0, %v12438_v57  ;;  %v4703_v57 = vld [vmem:[#allocation2 + $0x1fa] sm:$0xff] }
 0x450   :  { %9007 = vmatprep.mubr.msk.bf16.mxu0 %vm336_vm0, %v12452_v33  ;;  %v12784_v33 = vpack.c.bf16 %v4702_v45, %v4701_v55  ;;  %v12786_v22 = vpack.c.bf16 %v4704_v27, %v4703_v57  ;;  %v12797_v27 = vpack.c.bf16 %v4706_v42, %v4705_v62  ;;  %v10419_v45 = vld [vmem:[%s14477_s4 + $0x38] sm:$0xff]  }
 0x451   :  { %v4713_v55 = vld [vmem:[#allocation2 + $0x272] sm:$0xff]  ;;  %v4714_v57 = vld [vmem:[#allocation2 + $0x27a] sm:$0xff] }
 0x452   :  { %v4716_v62 = vld [vmem:[#allocation2 + $0x292] sm:$0xff] }
 0x454   :  { %9248 = vmatmul.mubr.msk.bf16.gmra.mrb[64].mxu1 %vm336_vm0, %v4746_v30 }
 0x455   :  { %9251 = vmatprep.mubr.msk.bf16.mxu1 %vm336_vm0, %v12776_v39 }
 0x457   :  { %9008 = vmatmul.mubr.msk.bf16.gmra.mrb[128].mxu0 %vm336_vm0, %v12454_v48  ;;  %v4707_v48 = vld [vmem:[#allocation2 + $0x22a] sm:$0xff] }
 0x458   :  { %9015 = vmatprep.mubr.msk.bf16.mxu0 %vm336_vm0, %v3045_v6  ;;  %v12802_v30 = vpack.c.bf16 %v4708_v17, %v4707_v48  ;;  %v4717_v48 = vld [vmem:[#allocation2 + $0x2a2] sm:$0xff]  ;;  %v4718_v17 = vld [vmem:[#allocation2 + $0x2aa] sm:$0xff] }
 0x45c   :  { %9252 = vmatmul.mubr.msk.bf16.gmra.mrb[68].mxu1 %vm336_vm0, %v12784_v33 }
 0x45d   :  { %9255 = vmatprep.mubr.msk.bf16.mxu1 %vm336_vm0, %v12786_v22 }
 0x45f   :  { %9016 = vmatmul.mubr.msk.bf16.vlgmr.msra.gmra.mrb[68].mxu0 %vm336_vm0, %v12671_v24  ;;  %v4709_v24 = vld [vmem:[#allocation2 + $0x242] sm:$0xff] }
 0x460   :  { %9019 = vmatprep.mubr.msk.bf16.mxu0 %vm336_vm0, %v12681_v23  ;;  %9080 = vmatpush3.bf16.msra.mxu0 %v12602_v46  ;;  %v4710_v23 = vld [vmem:[#allocation2 + $0x24a] sm:$0xff]  ;;  %v4711_v46 = vld [vmem:[#allocation2 + $0x25a] sm:$0xff] }
 0x461   :  { %9081 = vmatprep.subr.bf16.mxu0 %v10419_v45  ;;  %v12812_v29 = vpack.c.bf16 %v4710_v23, %v4709_v24  ;;  %v12814_v6 = vpack.c.bf16 %v4712_v7, %v4711_v46  ;;  %v4721_v23 = vld [vmem:[#allocation2 + $0x2d2] sm:$0xff]  ;;  %v4722_v46 = vld [vmem:[#allocation2 + $0x2da] sm:$0xff]  ;;  %v4723_v7 = vld [vmem:[#allocation2 + $0x2ea] sm:$0xff] }
 0x464   :  { %9256 = vmatmul.mubr.msk.bf16.gmra.mrb[8].mxu1 %vm336_vm0, %v12797_v27  ;;  %9082 = vmatpush3.bf16.msra.mxu0 %v10419_v45  ;;  %v4720_v45 = vld [vmem:[#allocation2 + $0x2c2] sm:$0xff] }
 0x465   :  { %9259 = vmatprep.mubr.msk.bf16.mxu1 %vm336_vm0, %v12802_v30 }
 0x467   :  { %9020 = vmatmul.mubr.msk.bf16.gmra.mrb[72].mxu0 %vm336_vm0, %v12686_v34  ;;  %v4715_v34 = vld [vmem:[#allocation2 + $0x28a] sm:$0xff] }
 0x468   :  { %9023 = vmatprep.mubr.msk.bf16.mxu0 %vm336_vm0, %v12698_v49  ;;  %v12824_v49 = vpack.c.bf16 %v4714_v57, %v4713_v55  ;;  %v12826_v42 = vpack.c.bf16 %v4716_v62, %v4715_v34  ;;  %v4758_v55 = vpack.c.bf16 %v4722_v46, %v4721_v23  ;;  %v4725_v57 = vld [vmem:[#allocation2 + $0x302] sm:$0xff]  ;;  %v4726_v34 = vld [vmem:[#allocation2 + $0x30a] sm:$0xff]  ;;  %v4727_v62 = vld [vmem:[#allocation2 + $0x31a] sm:$0xff] }
 0x469   :  { %v3014_v23 = vld [vmem:[#allocation2 + $0x1ba] sm:$0xff]  ;;  %v3550_v46 = vld [vmem:[#allocation2 + $0x68] sm:$0xff] }
 0x46c   :  { %9260 = vmatmul.mubr.msk.bf16.gmra.mrb[12].mxu1 %vm336_vm0, %v12812_v29 }
 0x46d   :  { %9263 = vmatprep.mubr.msk.bf16.mxu1 %vm336_vm0, %v12814_v6 }
 0x46f   :  { %9024 = vmatmul.mubr.msk.bf16.gmra.mrb[76].mxu0 %vm336_vm0, %v12700_v3  ;;  %v4719_v3 = vld [vmem:[#allocation2 + $0x2ba] sm:$0xff] }
 0x470   :  { %9027 = vmatprep.mubr.msk.bf16.mxu0 %vm336_vm0, %v12710_v11  ;;  %v4756_v11 = vpack.c.bf16 %v4718_v17, %v4717_v48  ;;  %v12836_v24 = vpack.c.bf16 %v4720_v45, %v4719_v3  ;;  %v4728_v48 = vld [vmem:[#allocation2 + $0x322] sm:$0xff]  ;;  %v4730_v3 = vld [vmem:[#allocation2 + $0x33a] sm:$0xff]  ;;  %v3013_v45 = vld [vmem:[#allocation2 + $0x1b2] sm:$0xff] }
 0x471   :  { %v4761_v17 = vpack.c.bf16 %v4728_v48, %v4727_v62  ;;  %v5274_v62 = vld [vmem:[#allocation2 + $0x270] sm:$0xff]  ;;  %v5275_v48 = vld [vmem:[#allocation2 + $0x278] sm:$0xff] }
 0x474   :  { %9264 = vmatmul.mubr.msk.bf16.gmra.mrb[16].mxu1 %vm336_vm0, %v12824_v49 }
 0x475   :  { %9267 = vmatprep.mubr.msk.bf16.mxu1 %vm336_vm0, %v12826_v42 }
 0x477   :  { %9028 = vmatmul.mubr.msk.bf16.gmra.mrb[80].mxu0 %vm336_vm0, %v12712_v9  ;;  %v4724_v9 = vld [vmem:[#allocation2 + $0x2f2] sm:$0xff] }
 0x478   :  { %9031 = vmatprep.mubr.msk.bf16.mxu0 %vm336_vm0, %v12722_v21  ;;  %v4759_v21 = vpack.c.bf16 %v4724_v9, %v4723_v7  ;;  %v3551_v7 = vld [vmem:[#allocation2 + $0x78] sm:$0xff]  ;;  %v3552_v9 = vld [vmem:[#allocation2 + $0x80] sm:$0xff] }
 0x47c   :  { %9268 = vmatmul.mubr.msk.bf16.gmra.mrb[20].mxu1 %vm336_vm0, %v4756_v11 }
 0x47d   :  { %9271 = vmatprep.mubr.msk.bf16.mxu1 %vm336_vm0, %v12836_v24 }
 0x47f   :  { %9032 = vmatmul.mubr.msk.bf16.gmra.mrb[84].mxu0 %vm336_vm0, %v12724_v58  ;;  %v4760_v58 = vpack.c.bf16 %v4726_v34, %v4725_v57  ;;  %v5272_v57 = vld [vmem:[#allocation2 + $0x258] sm:$0xff]  ;;  %v5273_v34 = vld [vmem:[#allocation2 + $0x260] sm:$0xff] }
 0x480   :  { %9035 = vmatprep.mubr.msk.bf16.mxu0 %vm336_vm0, %v12734_v14  ;;  %v4729_v14 = vld [vmem:[#allocation2 + $0x332] sm:$0xff] }
 0x484   :  { %9272 = vmatmul.mubr.msk.bf16.gmra.mrb[24].mxu1 %vm336_vm0, %v4758_v55 }
 0x485   :  { %9275 = vmatprep.mubr.msk.bf16.mxu1 %vm336_vm0, %v4759_v21 }
 0x487   :  { %9036 = vmatmul.mubr.msk.bf16.gmra.mrb[88].mxu0 %vm336_vm0, %v12736_v20  ;;  %v4762_v20 = vpack.c.bf16 %v4730_v3, %v4729_v14  ;;  %v3553_v14 = vld [vmem:[#allocation2 + $0x90] sm:$0xff]  ;;  %v3554_v3 = vld [vmem:[#allocation2 + $0x98] sm:$0xff] }
 0x488   :  { %9039 = vmatprep.mubr.msk.bf16.mxu0 %vm336_vm0, %v12751_v18  ;;  %v3061_v18 = vpack.c.bf16 %v3014_v23, %v3013_v45  ;;  %v3556_v45 = vld [vmem:[#allocation2 + $0xb0] sm:$0xff]  ;;  %v3612_v23 = vpack.c.bf16 %v3554_v3, %v3553_v14  ;;  %v5291_v14 = vld [vmem:[#allocation2 + $0x338] sm:$0xff] }
 0x48c   :  { %9276 = vmatmul.mubr.msk.bf16.gmra.mrb[28].mxu1 %vm336_vm0, %v4760_v58 }
 0x48d   :  { %9279 = vmatprep.mubr.msk.bf16.mxu1 %vm336_vm0, %v4761_v17 }
 0x48f   :  { %9040 = vmatmul.mubr.msk.bf16.gmra.mrb[92].mxu0 %vm336_vm0, %v12754_v2  ;;  %v10411_v2 = vld [vmem:[%s14477_s4 + $0x78] sm:$0xff]  }
 0x490   :  { %9043 = vmatprep.mubr.msk.bf16.mxu0 %vm336_vm0, %v12764_v59 }
 0x494   :  { %9280 = vmatmul.mubr.msk.bf16.gmra.mrb[32].mxu1 %vm336_vm0, %v4762_v20  ;;  %v3555_v20 = vld [vmem:[#allocation2 + $0xa8] sm:$0xff] }
 0x495   :  { %9287 = vmatprep.mubr.msk.bf16.mxu1 %vm336_vm0, %v12588_v38  ;;  %v12906_v38 = vld [vmem:[%s14477_s4 + $0x80] sm:$0xff]  }
 0x497   :  { %9044 = vmatmul.mubr.msk.bf16.gmra.mrb[96].mxu0 %vm336_vm0, %v12766_v32  ;;  %v3545_v32 = vld [vmem:[#allocation2 + $0x30] sm:$0xff] }
 0x498   :  { %9047 = vmatprep.mubr.msk.bf16.mxu0 %vm336_vm0, %v3061_v18  ;;  %v3613_v18 = vpack.c.bf16 %v3556_v45, %v3555_v20  ;;  %v3569_v45 = vld [vmem:[#allocation2 + $0x150] sm:$0xff] }
 0x49c   :  { %9288 = vmatmul.mubr.msk.bf16.vlgmr.msra.gmra.mrb[36].mxu1 %vm336_vm0, %v12597_v37  ;;  %v5258_v37 = vld [vmem:[#allocation2 + $0x180] sm:$0xff] }
 0x49d   :  { %9291 = vmatprep.mubr.msk.bf16.mxu1 %vm336_vm0, %v12605_v60  ;;  %9352 = vmatpush3.bf16.msra.mxu1 %v12747_v13  ;;  %v5259_v60 = vld [vmem:[#allocation2 + $0x188] sm:$0xff] }
 0x49e   :  { %9353 = vmatprep.subr.bf16.mxu1 %v10411_v2 }
 0x49f   :  { %9048 = vmatmul.mubr.msk.bf16.gmra.mrb[100].mxu0 %vm336_vm0, %v12776_v39  ;;  %v3546_v39 = vld [vmem:[#allocation2 + $0x38] sm:$0xff] }
 0x4a0   :  { %9051 = vmatprep.mubr.msk.bf16.mxu0 %vm336_vm0, %v12784_v33  ;;  %v3547_v33 = vld [vmem:[#allocation2 + $0x48] sm:$0xff] }
 0x4a1   :  { %9354 = vmatpush3.bf16.msra.mxu1 %v10411_v2  ;;  %v5276_v2 = vld [vmem:[#allocation2 + $0x288] sm:$0xff] }
 0x4a2   :  { %9419 = vmatprep.subr.bf16.mxu1 %v12906_v38 }
 0x4a4   :  { %9292 = vmatmul.mubr.msk.bf16.gmra.mrb[40].mxu1 %vm336_vm0, %v12615_v4  ;;  %v12919_v4 = vpack.c.bf16 %v5259_v60, %v5258_v37  ;;  %v5277_v37 = vld [vmem:[#allocation2 + $0x290] sm:$0xff]  ;;  %v5278_v60 = vld [vmem:[#allocation2 + $0x2a0] sm:$0xff] }
 0x4a5   :  { %9295 = vmatprep.mubr.msk.bf16.mxu1 %vm336_vm0, %v12617_v28  ;;  %v5260_v28 = vld [vmem:[#allocation2 + $0x198] sm:$0xff] }
 0x4a7   :  { %9052 = vmatmul.mubr.msk.bf16.gmra.mrb[104].mxu0 %vm336_vm0, %v12786_v22  ;;  %v3548_v22 = vld [vmem:[#allocation2 + $0x50] sm:$0xff] }
 0x4a8   :  { %9055 = vmatprep.mubr.msk.bf16.mxu0 %vm336_vm0, %v12797_v27  ;;  %v3609_v27 = vpack.c.bf16 %v3548_v22, %v3547_v33  ;;  %v3561_v22 = vld [vmem:[#allocation2 + $0xf0] sm:$0xff] }
 0x4ac   :  { %9296 = vmatmul.mubr.msk.bf16.gmra.mrb[44].mxu1 %vm336_vm0, %v12627_v40  ;;  %v5261_v40 = vld [vmem:[#allocation2 + $0x1a0] sm:$0xff] }
 0x4ad   :  { %9299 = vmatprep.mubr.msk.bf16.mxu1 %vm336_vm0, %v12629_v12  ;;  %v5309_v12 = vpack.c.bf16 %v5261_v40, %v5260_v28  ;;  %v5279_v28 = vld [vmem:[#allocation2 + $0x2a8] sm:$0xff]  ;;  %v5317_v40 = vpack.c.bf16 %v5277_v37, %v5276_v2  ;;  %v3572_v2 = vld [vmem:[#allocation2 + $0x170] sm:$0xff] }
 0x4ae   :  { %v5292_v37 = vld [vmem:[#allocation2 + $0x348] sm:$0xff] }
 0x4af   :  { %9056 = vmatmul.mubr.msk.bf16.gmra.mrb[108].mxu0 %vm336_vm0, %v12802_v30  ;;  %v5268_v30 = vld [vmem:[#allocation2 + $0x228] sm:$0xff] }
 0x4b0   :  { %9059 = vmatprep.mubr.msk.bf16.mxu0 %vm336_vm0, %v12812_v29  ;;  %v5269_v29 = vld [vmem:[#allocation2 + $0x230] sm:$0xff] }
 0x4b4   :  { %9300 = vmatmul.mubr.msk.bf16.gmra.mrb[48].mxu1 %vm336_vm0, %v12639_v43  ;;  %v3543_v43 = vld [vmem:[#allocation2 + $0x18] sm:$0xff] }
 0x4b5   :  { %9303 = vmatprep.mubr.msk.bf16.mxu1 %vm336_vm0, %v12641_v1  ;;  %v3544_v1 = vld [vmem:[#allocation2 + $0x20] sm:$0xff] }
 0x4b7   :  { %9060 = vmatmul.mubr.msk.bf16.gmra.mrb[112].mxu0 %vm336_vm0, %v12814_v6  ;;  %v5270_v6 = vld [vmem:[#allocation2 + $0x240] sm:$0xff] }
 0x4b8   :  { %9063 = vmatprep.mubr.msk.bf16.mxu0 %vm336_vm0, %v12824_v49  ;;  %v5271_v49 = vld [vmem:[#allocation2 + $0x248] sm:$0xff] }
 0x4bc   :  { %9304 = vmatmul.mubr.msk.bf16.gmra.mrb[52].mxu1 %vm336_vm0, %v12651_v51  ;;  %v3607_v51 = vpack.c.bf16 %v3544_v1, %v3543_v43  ;;  %v3557_v43 = vld [vmem:[#allocation2 + $0xc0] sm:$0xff]  ;;  %v3558_v1 = vld [vmem:[#allocation2 + $0xc8] sm:$0xff] }
 0x4bd   :  { %9307 = vmatprep.mubr.msk.bf16.mxu1 %vm336_vm0, %v12653_v41  ;;  %v5264_v41 = vld [vmem:[#allocation2 + $0x1f8] sm:$0xff] }
 0x4bf   :  { %9064 = vmatmul.mubr.msk.bf16.gmra.mrb[116].mxu0 %vm336_vm0, %v12826_v42  ;;  %v5313_v42 = vpack.c.bf16 %v5269_v29, %v5268_v30  ;;  %v3564_v30 = vld [vmem:[#allocation2 + $0x110] sm:$0xff] }
 0x4c0   :  { %9067 = vmatprep.mubr.msk.bf16.mxu0 %vm336_vm0, %v4756_v11  ;;  %v5314_v11 = vpack.c.bf16 %v5271_v49, %v5270_v6  ;;  %v5284_v49 = vld [vmem:[#allocation2 + $0x2e8] sm:$0xff] }
 0x4c4   :  { %9308 = vmatmul.mubr.msk.bf16.gmra.mrb[56].mxu1 %vm336_vm0, %v12663_v16  ;;  %v5265_v16 = vld [vmem:[#allocation2 + $0x200] sm:$0xff] }
 0x4c5   :  { %9311 = vmatprep.mubr.msk.bf16.mxu1 %vm336_vm0, %v12665_v8  ;;  %v5266_v8 = vld [vmem:[#allocation2 + $0x210] sm:$0xff]  ;;  %v5311_v13 = vpack.c.bf16 %v5265_v16, %v5264_v41  ;;  %v3560_v41 = vld [vmem:[#allocation2 + $0xe0] sm:$0xff]  ;;  %v3614_v16 = vpack.c.bf16 %v3558_v1, %v3557_v43 }
 0x4c6   :  { %v5792_v43 = vld [vmem:[#allocation2 + $0x31] sm:$0xff]  ;;  %v5793_v1 = vld [vmem:[#allocation2 + $0x39] sm:$0xff] }
 0x4c7   :  { %9068 = vmatmul.mubr.msk.bf16.gmra.mrb[120].mxu0 %vm336_vm0, %v12836_v24  ;;  %v3549_v24 = vld [vmem:[#allocation2 + $0x60] sm:$0xff] }
 0x4c8   :  { %9071 = vmatprep.mubr.msk.bf16.mxu0 %vm336_vm0, %v4758_v55  ;;  %v3610_v55 = vpack.c.bf16 %v3550_v46, %v3549_v24  ;;  %v5287_v24 = vld [vmem:[#allocation2 + $0x308] sm:$0xff] }
 0x4cc   :  { %9312 = vmatmul.mubr.msk.bf16.gmra.mrb[60].mxu1 %vm336_vm0, %v12676_v36  ;;  %v5267_v36 = vld [vmem:[#allocation2 + $0x218] sm:$0xff] }
 0x4cd   :  { %9315 = vmatprep.mubr.msk.bf16.mxu1 %vm336_vm0, %v12919_v4  ;;  %v5312_v59 = vpack.c.bf16 %v5267_v36, %v5266_v8  ;;  %v5280_v36 = vld [vmem:[#allocation2 + $0x2b8] sm:$0xff] }
 0x4cf   :  { %9072 = vmatmul.mubr.msk.bf16.gmra.mrb[124].mxu0 %vm336_vm0, %v4759_v21  ;;  %v3611_v21 = vpack.c.bf16 %v3552_v9, %v3551_v7  ;;  %v3565_v9 = vld [vmem:[#allocation2 + $0x120] sm:$0xff] }
 0x4d0   :  { %9075 = vmatprep.mubr.msk.bf16.mxu0 %vm336_vm0, %v4760_v58  ;;  %v5315_v58 = vpack.c.bf16 %v5273_v34, %v5272_v57  ;;  %v3568_v57 = vld [vmem:[#allocation2 + $0x140] sm:$0xff] }
 0x4d4   :  { %9316 = vmatmul.mubr.msk.bf16.gmra.mrb[64].mxu1 %vm336_vm0, %v5309_v12  ;;  %v5318_v12 = vpack.c.bf16 %v5279_v28, %v5278_v60  ;;  %v5293_v60 = vld [vmem:[#allocation2 + $0x350] sm:$0xff] }
 0x4d5   :  { %9319 = vmatprep.mubr.msk.bf16.mxu1 %vm336_vm0, %v12693_v26  ;;  %v3608_v26 = vpack.c.bf16 %v3546_v39, %v3545_v32  ;;  %v5283_v32 = vld [vmem:[#allocation2 + $0x2d8] sm:$0xff] }
 0x4d7   :  { %9076 = vmatmul.mubr.msk.bf16.gmra.mrb[128].mxu0 %vm336_vm0, %v4761_v17  ;;  %v5316_v17 = vpack.c.bf16 %v5275_v48, %v5274_v62  ;;  %v5288_v48 = vld [vmem:[#allocation2 + $0x318] sm:$0xff] }
 0x4d8   :  { %9083 = vmatprep.mubr.msk.bf16.mxu0 %vm336_vm0, %v3607_v51  ;;  %v3559_v51 = vld [vmem:[#allocation2 + $0xd8] sm:$0xff] }
 0x4d9   :  { %v3615_v8 = vpack.c.bf16 %v3560_v41, %v3559_v51  ;;  %v5856_v51 = vpack.c.bf16 %v5793_v1, %v5792_v43  ;;  %v3575_v41 = vld [vmem:[#allocation2 + $0x1c8] sm:$0xff]  ;;  %v5819_v1 = vld [vmem:[#allocation2 + $0x171] sm:$0xff] }
 0x4da   :  { %v5818_v43 = vld [vmem:[#allocation2 + $0x169] sm:$0xff] }
 0x4dc   :  { %9320 = vmatmul.mubr.msk.bf16.gmra.mrb[68].mxu1 %vm336_vm0, %v5311_v13  ;;  %v5281_v13 = vld [vmem:[#allocation2 + $0x2c0] sm:$0xff] }
 0x4dd   :  { %9323 = vmatprep.mubr.msk.bf16.mxu1 %vm336_vm0, %v5312_v59  ;;  %v5282_v59 = vld [vmem:[#allocation2 + $0x2d0] sm:$0xff]  ;;  %v5319_v39 = vpack.c.bf16 %v5281_v13, %v5280_v36 }
 0x4de   :  { %v5320_v33 = vpack.c.bf16 %v5283_v32, %v5282_v59  ;;  %v5794_v36 = vld [vmem:[#allocation2 + $0x49] sm:$0xff]  ;;  %v5795_v13 = vld [vmem:[#allocation2 + $0x51] sm:$0xff]  ;;  %v5796_v59 = vld [vmem:[#allocation2 + $0x61] sm:$0xff] }
 0x4df   :  { %9084 = vmatmul.mubr.msk.bf16.vlgmr.msra.gmra.mrb[68].mxu0 %vm336_vm0, %v3608_v26  ;;  %v3562_v26 = vld [vmem:[#allocation2 + $0xf8] sm:$0xff]  ;;  %v5797_v32 = vld [vmem:[#allocation2 + $0x69] sm:$0xff] }
 0x4e0   :  { %9087 = vmatprep.mubr.msk.bf16.mxu0 %vm336_vm0, %v3609_v27  ;;  %v3563_v27 = vld [vmem:[#allocation2 + $0x108] sm:$0xff]  ;;  %v3616_v29 = vpack.c.bf16 %v3562_v26, %v3561_v22  ;;  %v5858_v22 = vpack.c.bf16 %v5797_v32, %v5796_v59  ;;  %v3577_v26 = vld [vmem:[#allocation2 + $0x1e0] sm:$0xff] }
 0x4e1   :  { %v3617_v6 = vpack.c.bf16 %v3564_v30, %v3563_v27  ;;  %v3578_v27 = vld [vmem:[#allocation2 + $0x1e8] sm:$0xff] }
 0x4e2   :  { %v3624_v30 = vpack.c.bf16 %v3578_v27, %v3577_v26  ;;  %v5824_v32 = vld [vmem:[#allocation2 + $0x1e1] sm:$0xff]  ;;  %v5828_v27 = vld [vmem:[#allocation2 + $0x211] sm:$0xff] }
 0x4e3   :  { %v5827_v26 = vld [vmem:[#allocation2 + $0x201] sm:$0xff] }
 0x4e4   :  { %9324 = vmatmul.mubr.msk.bf16.gmra.mrb[8].mxu1 %vm336_vm0, %v5313_v42  ;;  %v5285_v42 = vld [vmem:[#allocation2 + $0x2f0] sm:$0xff] }
 0x4e5   :  { %9327 = vmatprep.mubr.msk.bf16.mxu1 %vm336_vm0, %v5314_v11  ;;  %v5286_v11 = vld [vmem:[#allocation2 + $0x300] sm:$0xff]  ;;  %v5321_v46 = vpack.c.bf16 %v5285_v42, %v5284_v49  ;;  %v15023_v42 = vmov 1.0  }
 0x4e6   :  { %v5322_v7 = vpack.c.bf16 %v5287_v24, %v5286_v11  ;;  %v5801_v49 = vld [vmem:[#allocation2 + $0x99] sm:$0xff] }
 0x4e7   :  { %9088 = vmatmul.mubr.msk.bf16.gmra.mrb[72].mxu0 %vm336_vm0, %v3610_v55  ;;  %v3566_v55 = vld [vmem:[#allocation2 + $0x128] sm:$0xff] }
 0x4e8   :  { %9091 = vmatprep.mubr.msk.bf16.mxu0 %vm336_vm0, %v3611_v21  ;;  %v3567_v21 = vld [vmem:[#allocation2 + $0x138] sm:$0xff]  ;;  %v3618_v34 = vpack.c.bf16 %v3566_v55, %v3565_v9  ;;  %v5805_v9 = vld [vmem:[#allocation2 + $0xc9] sm:$0xff] }
 0x4e9   :  { %v3619_v62 = vpack.c.bf16 %v3568_v57, %v3567_v21  ;;  %v5806_v57 = vld [vmem:[#allocation2 + $0xd9] sm:$0xff] }
 0x4ec   :  { %9328 = vmatmul.mubr.msk.bf16.gmra.mrb[12].mxu1 %vm336_vm0, %v5315_v58  ;;  %v5289_v58 = vld [vmem:[#allocation2 + $0x320] sm:$0xff] }
 0x4ed   :  { %9331 = vmatprep.mubr.msk.bf16.mxu1 %vm336_vm0, %v5316_v17  ;;  %v5290_v17 = vld [vmem:[#allocation2 + $0x330] sm:$0xff]  ;;  %v5323_v3 = vpack.c.bf16 %v5289_v58, %v5288_v48  ;;  %v5809_v48 = vld [vmem:[#allocation2 + $0xf9] sm:$0xff] }
 0x4ee   :  { %v5324_v20 = vpack.c.bf16 %v5291_v14, %v5290_v17  ;;  %v5810_v14 = vld [vmem:[#allocation2 + $0x109] sm:$0xff] }
 0x4ef   :  { %9092 = vmatmul.mubr.msk.bf16.gmra.mrb[76].mxu0 %vm336_vm0, %v3612_v23  ;;  %v3570_v23 = vld [vmem:[#allocation2 + $0x158] sm:$0xff] }
 0x4f0   :  { %9095 = vmatprep.mubr.msk.bf16.mxu0 %vm336_vm0, %v3613_v18  ;;  %v3571_v18 = vld [vmem:[#allocation2 + $0x168] sm:$0xff]  ;;  %v3620_v28 = vpack.c.bf16 %v3570_v23, %v3569_v45 }
 0x4f1   :  { %v5813_v45 = vld [vmem:[#allocation2 + $0x129] sm:$0xff] }
 0x4f4   :  { %9332 = vmatmul.mubr.msk.bf16.gmra.mrb[16].mxu1 %vm336_vm0, %v5317_v40  ;;  %v3621_v40 = vpack.c.bf16 %v3572_v2, %v3571_v18  ;;  %v5814_v2 = vld [vmem:[#allocation2 + $0x139] sm:$0xff] }
 0x4f5   :  { %9335 = vmatprep.mubr.msk.bf16.mxu1 %vm336_vm0, %v5318_v12  ;;  %v5325_v12 = vpack.c.bf16 %v5293_v60, %v5292_v37  ;;  %v5815_v37 = vld [vmem:[#allocation2 + $0x141] sm:$0xff]  ;;  %v5816_v60 = vld [vmem:[#allocation2 + $0x151] sm:$0xff] }
 0x4f7   :  { %9096 = vmatmul.mubr.msk.bf16.gmra.mrb[80].mxu0 %vm336_vm0, %v3614_v16  ;;  %v3576_v16 = vld [vmem:[#allocation2 + $0x1d0] sm:$0xff] }
 0x4f8   :  { %9099 = vmatprep.mubr.msk.bf16.mxu0 %vm336_vm0, %v3615_v8  ;;  %v3623_v8 = vpack.c.bf16 %v3576_v16, %v3575_v41  ;;  %v5821_v41 = vld [vmem:[#allocation2 + $0x189] sm:$0xff]  ;;  %v5869_v16 = vpack.c.bf16 %v5819_v1, %v5818_v43  ;;  %v5847_v1 = vld [vmem:[#allocation2 + $0x2f1] sm:$0xff] }
 0x4f9   :  { %v5846_v43 = vld [vmem:[#allocation2 + $0x2e9] sm:$0xff] }
 0x4fc   :  { %9336 = vmatmul.mubr.msk.bf16.gmra.mrb[20].mxu1 %vm336_vm0, %v5319_v39  ;;  %v5857_v39 = vpack.c.bf16 %v5795_v13, %v5794_v36  ;;  %v5822_v36 = vld [vmem:[#allocation2 + $0x199] sm:$0xff]  ;;  %v5823_v13 = vld [vmem:[#allocation2 + $0x1a1] sm:$0xff] }
 0x4fd   :  { %9339 = vmatprep.mubr.msk.bf16.mxu1 %vm336_vm0, %v5320_v33  ;;  %v10413_v33 = vld [vmem:[%s14477_s4 + $0x88] sm:$0xff]   ;;  %v5871_v59 = vpack.c.bf16 %v5823_v13, %v5822_v36 }
 0x4ff   :  { %9100 = vmatmul.mubr.msk.bf16.gmra.mrb[84].mxu0 %vm336_vm0, %v3616_v29  ;;  %v5799_v29 = vld [vmem:[#allocation2 + $0x81] sm:$0xff] }
 0x500   :  { %9103 = vmatprep.mubr.msk.bf16.mxu0 %vm336_vm0, %v3617_v6  ;;  %v5800_v6 = vld [vmem:[#allocation2 + $0x91] sm:$0xff] }
 0x501   :  { %v5860_v24 = vpack.c.bf16 %v5801_v49, %v5800_v6  ;;  %v5830_v6 = vld [vmem:[#allocation2 + $0x229] sm:$0xff]  ;;  %v5831_v49 = vld [vmem:[#allocation2 + $0x231] sm:$0xff] }
 0x504   :  { %9340 = vmatmul.mubr.msk.bf16.gmra.mrb[24].mxu1 %vm336_vm0, %v5321_v46  ;;  %v5802_v46 = vld [vmem:[#allocation2 + $0xa9] sm:$0xff] }
 0x505   :  { %9343 = vmatprep.mubr.msk.bf16.mxu1 %vm336_vm0, %v5322_v7  ;;  %v5803_v7 = vld [vmem:[#allocation2 + $0xb1] sm:$0xff] }
 0x506   :  { %v5861_v55 = vpack.c.bf16 %v5803_v7, %v5802_v46  ;;  %v5875_v46 = vpack.c.bf16 %v5831_v49, %v5830_v6  ;;  %v5854_v49 = vld [vmem:[#allocation2 + $0x349] sm:$0xff] }
 0x507   :  { %9104 = vmatmul.mubr.msk.bf16.gmra.mrb[88].mxu0 %vm336_vm0, %v3618_v34  ;;  %v5807_v34 = vld [vmem:[#allocation2 + $0xe1] sm:$0xff] }
 0x508   :  { %9107 = vmatprep.mubr.msk.bf16.mxu0 %vm336_vm0, %v3619_v62  ;;  %v5808_v62 = vld [vmem:[#allocation2 + $0xf1] sm:$0xff]  ;;  %v5863_v58 = vpack.c.bf16 %v5807_v34, %v5806_v57 }
 0x509   :  { %v5864_v17 = vpack.c.bf16 %v5809_v48, %v5808_v62  ;;  %v5838_v62 = vld [vmem:[#allocation2 + $0x289] sm:$0xff]  ;;  %v5839_v48 = vld [vmem:[#allocation2 + $0x291] sm:$0xff] }
 0x50c   :  { %9344 = vmatmul.mubr.msk.bf16.gmra.mrb[28].mxu1 %vm336_vm0, %v5323_v3  ;;  %v5811_v3 = vld [vmem:[#allocation2 + $0x111] sm:$0xff] }
 0x50d   :  { %9347 = vmatprep.mubr.msk.bf16.mxu1 %vm336_vm0, %v5324_v20  ;;  %v5812_v20 = vld [vmem:[#allocation2 + $0x121] sm:$0xff]  ;;  %v5865_v23 = vpack.c.bf16 %v5811_v3, %v5810_v14  ;;  %v5879_v14 = vpack.c.bf16 %v5839_v48, %v5838_v62  ;;  %v6356_v62 = vld [vmem:[#allocation2 + $0x4a] sm:$0xff]  ;;  %v6357_v48 = vld [vmem:[#allocation2 + $0x52] sm:$0xff] }
 0x50e   :  { %v5866_v18 = vpack.c.bf16 %v5813_v45, %v5812_v20  ;;  %v5842_v20 = vld [vmem:[#allocation2 + $0x2b9] sm:$0xff]  ;;  %v5843_v45 = vld [vmem:[#allocation2 + $0x2c1] sm:$0xff] }
 0x50f   :  { %9108 = vmatmul.mubr.msk.bf16.gmra.mrb[92].mxu0 %vm336_vm0, %v3620_v28  ;;  %v5817_v28 = vld [vmem:[#allocation2 + $0x159] sm:$0xff] }
 0x510   :  { %9111 = vmatprep.mubr.msk.bf16.mxu0 %vm336_vm0, %v3621_v40  ;;  %v5867_v40 = vpack.c.bf16 %v5815_v37, %v5814_v2  ;;  %v5881_v2 = vpack.c.bf16 %v5843_v45, %v5842_v20 }
 0x514   :  { %9348 = vmatmul.mubr.msk.bf16.gmra.mrb[32].mxu1 %vm336_vm0, %v5325_v12  ;;  %v5868_v12 = vpack.c.bf16 %v5817_v28, %v5816_v60 }
 0x515   :  { %9355 = vmatprep.mubr.msk.bf16.mxu1 %vm336_vm0, %v5856_v51  ;;  %v5820_v51 = vld [vmem:[#allocation2 + $0x181] sm:$0xff] }
 0x517   :  { %9112 = vmatmul.mubr.msk.bf16.gmra.mrb[96].mxu0 %vm336_vm0, %v12919_v4  ;;  %v5798_v4 = vld [vmem:[#allocation2 + $0x79] sm:$0xff] }
 0x518   :  { %9115 = vmatprep.mubr.msk.bf16.mxu0 %vm336_vm0, %v3623_v8  ;;  %v5859_v11 = vpack.c.bf16 %v5799_v29, %v5798_v4  ;;  %v5870_v8 = vpack.c.bf16 %v5821_v41, %v5820_v51  ;;  %v5848_v51 = vld [vmem:[#allocation2 + $0x301] sm:$0xff]  ;;  %v5849_v41 = vld [vmem:[#allocation2 + $0x309] sm:$0xff] }
 0x51c   :  { %9356 = vmatmul.mubr.msk.bf16.vlgmr.msra.gmra.mrb[36].mxu1 %vm336_vm0, %v5857_v39  ;;  %v5825_v39 = vld [vmem:[#allocation2 + $0x1e9] sm:$0xff] }
 0x51d   :  { %9359 = vmatprep.mubr.msk.bf16.mxu1 %vm336_vm0, %v5858_v22  ;;  %9420 = vmatpush3.bf16.msra.mxu1 %v12906_v38  ;;  %v5804_v38 = vld [vmem:[#allocation2 + $0xc1] sm:$0xff]  ;;  %v5826_v22 = vld [vmem:[#allocation2 + $0x1f9] sm:$0xff] }
 0x51e   :  { %9421 = vmatprep.subr.bf16.mxu1 %v10413_v33  ;;  %v5862_v21 = vpack.c.bf16 %v5805_v9, %v5804_v38  ;;  %v5873_v4 = vpack.c.bf16 %v5827_v26, %v5826_v22  ;;  %v5834_v38 = vld [vmem:[#allocation2 + $0x259] sm:$0xff]  ;;  %v5835_v9 = vld [vmem:[#allocation2 + $0x261] sm:$0xff]  ;;  %v5852_v22 = vld [vmem:[#allocation2 + $0x331] sm:$0xff] }
 0x51f   :  { %9116 = vmatmul.mubr.msk.bf16.gmra.mrb[100].mxu0 %vm336_vm0, %v3624_v30  ;;  %v5829_v30 = vld [vmem:[#allocation2 + $0x219] sm:$0xff]  ;;  %v5877_v57 = vpack.c.bf16 %v5835_v9, %v5834_v38 }
 0x520   :  { %7052 = vmatprep.mubr.f32.mxu0 %v15023_v42  ;;  %v5874_v29 = vpack.c.bf16 %v5829_v30, %v5828_v27  ;;  %v5853_v26 = vld [vmem:[#allocation2 + $0x339] sm:$0xff] }
 0x521   :  { %9422 = vmatpush3.bf16.msra.mxu1 %v10413_v33  ;;  %v5872_v33 = vpack.c.bf16 %v5825_v39, %v5824_v32  ;;  %v5850_v39 = vld [vmem:[#allocation2 + $0x319] sm:$0xff]  ;;  %v5886_v30 = vpack.c.bf16 %v5853_v26, %v5852_v22  ;;  %v6364_v22 = vld [vmem:[#allocation2 + $0xaa] sm:$0xff] }
 0x522   :  { %v6355_v38 = vld [vmem:[#allocation2 + $0x3a] sm:$0xff]  ;;  %v6365_v26 = vld [vmem:[#allocation2 + $0xb2] sm:$0xff] }
 0x524   :  { %9360 = vmatmul.mubr.msk.bf16.gmra.mrb[40].mxu1 %vm336_vm0, %v5859_v11  ;;  %v5832_v11 = vld [vmem:[#allocation2 + $0x241] sm:$0xff] }
 0x525   :  { %9363 = vmatprep.mubr.msk.bf16.mxu1 %vm336_vm0, %v5860_v24  ;;  %v5833_v24 = vld [vmem:[#allocation2 + $0x249] sm:$0xff] }
 0x526   :  { %v5876_v7 = vpack.c.bf16 %v5833_v24, %v5832_v11  ;;  %v5855_v11 = vld [vmem:[#allocation2 + $0x351] sm:$0xff] }
 0x52c   :  { %9364 = vmatmul.mubr.msk.bf16.gmra.mrb[44].mxu1 %vm336_vm0, %v5861_v55  ;;  %v5836_v55 = vld [vmem:[#allocation2 + $0x271] sm:$0xff] }
 0x52d   :  { %9367 = vmatprep.mubr.msk.bf16.mxu1 %vm336_vm0, %v5862_v21  ;;  %v5837_v21 = vld [vmem:[#allocation2 + $0x279] sm:$0xff] }
 0x52e   :  { %v5878_v34 = vpack.c.bf16 %v5837_v21, %v5836_v55 }
 0x534   :  { %9368 = vmatmul.mubr.msk.bf16.gmra.mrb[48].mxu1 %vm336_vm0, %v5863_v58  ;;  %v5840_v58 = vld [vmem:[#allocation2 + $0x2a1] sm:$0xff] }
 0x535   :  { %9371 = vmatprep.mubr.msk.bf16.mxu1 %vm336_vm0, %v5864_v17  ;;  %v5841_v17 = vld [vmem:[#allocation2 + $0x2a9] sm:$0xff] }
 0x536   :  { %v5880_v3 = vpack.c.bf16 %v5841_v17, %v5840_v58  ;;  %v6358_v58 = vld [vmem:[#allocation2 + $0x62] sm:$0xff]  ;;  %v6359_v17 = vld [vmem:[#allocation2 + $0x6a] sm:$0xff] }
 0x53c   :  { %9372 = vmatmul.mubr.msk.bf16.gmra.mrb[52].mxu1 %vm336_vm0, %v5865_v23  ;;  %v5844_v23 = vld [vmem:[#allocation2 + $0x2d1] sm:$0xff] }
 0x53d   :  { %9375 = vmatprep.mubr.msk.bf16.mxu1 %vm336_vm0, %v5866_v18  ;;  %v5845_v18 = vld [vmem:[#allocation2 + $0x2d9] sm:$0xff] }
 0x53e   :  { %v5882_v37 = vpack.c.bf16 %v5845_v18, %v5844_v23 }
 0x544   :  { %9376 = vmatmul.mubr.msk.bf16.gmra.mrb[56].mxu1 %vm336_vm0, %v5867_v40 }
 0x545   :  { %9379 = vmatprep.mubr.msk.bf16.mxu1 %vm336_vm0, %v5868_v12 }
 0x54c   :  { %9380 = vmatmul.mubr.msk.bf16.gmra.mrb[60].mxu1 %vm336_vm0, %v5869_v16  ;;  %v5883_v16 = vpack.c.bf16 %v5847_v1, %v5846_v43  ;;  %v6362_v43 = vld [vmem:[#allocation2 + $0x92] sm:$0xff]  ;;  %v6363_v1 = vld [vmem:[#allocation2 + $0x9a] sm:$0xff] }
 0x54d   :  { %9383 = vmatprep.mubr.msk.bf16.mxu1 %vm336_vm0, %v5870_v8  ;;  %v5884_v8 = vpack.c.bf16 %v5849_v41, %v5848_v51  ;;  %v6422_v41 = vpack.c.bf16 %v6363_v1, %v6362_v43 }
 0x554   :  { %9384 = vmatmul.mubr.msk.bf16.gmra.mrb[64].mxu1 %vm336_vm0, %v5871_v59 }
 0x555   :  { %9387 = vmatprep.mubr.msk.bf16.mxu1 %vm336_vm0, %v5872_v33  ;;  %v5851_v33 = vld [vmem:[#allocation2 + $0x321] sm:$0xff] }
 0x556   :  { %v5885_v27 = vpack.c.bf16 %v5851_v33, %v5850_v39 }
 0x55c   :  { %9388 = vmatmul.mubr.msk.bf16.gmra.mrb[68].mxu1 %vm336_vm0, %v5873_v4 }
 0x55d   :  { %9391 = vmatprep.mubr.msk.bf16.mxu1 %vm336_vm0, %v5874_v29 }
 0x564   :  { %9392 = vmatmul.mubr.msk.bf16.gmra.mrb[8].mxu1 %vm336_vm0, %v5875_v46  ;;  %v5887_v46 = vpack.c.bf16 %v5855_v11, %v5854_v49  ;;  %v6423_v49 = vpack.c.bf16 %v6365_v26, %v6364_v22  ;;  %v6374_v22 = vld [vmem:[#allocation2 + $0x122] sm:$0xff]  ;;  %v6375_v26 = vld [vmem:[#allocation2 + $0x12a] sm:$0xff] }
 0x565   :  { %9395 = vmatprep.mubr.msk.bf16.mxu1 %vm336_vm0, %v5876_v7  ;;  %v6354_v7 = vld [vmem:[#allocation2 + $0x32] sm:$0xff] }
 0x566   :  { %v6418_v9 = vpack.c.bf16 %v6355_v38, %v6354_v7 }
 0x56c   :  { %9396 = vmatmul.mubr.msk.bf16.gmra.mrb[12].mxu1 %vm336_vm0, %v5877_v57 }
 0x56d   :  { %9399 = vmatprep.mubr.msk.bf16.mxu1 %vm336_vm0, %v5878_v34 }
 0x574   :  { %9400 = vmatmul.mubr.msk.bf16.gmra.mrb[16].mxu1 %vm336_vm0, %v5879_v14  ;;  %v6419_v14 = vpack.c.bf16 %v6357_v48, %v6356_v62  ;;  %v6368_v62 = vld [vmem:[#allocation2 + $0xda] sm:$0xff]  ;;  %v6369_v48 = vld [vmem:[#allocation2 + $0xe2] sm:$0xff] }
 0x575   :  { %9403 = vmatprep.mubr.msk.bf16.mxu1 %vm336_vm0, %v5880_v3  ;;  %v6420_v3 = vpack.c.bf16 %v6359_v17, %v6358_v58  ;;  %v6370_v58 = vld [vmem:[#allocation2 + $0xf2] sm:$0xff]  ;;  %v6371_v17 = vld [vmem:[#allocation2 + $0xfa] sm:$0xff] }
 0x57a   :  { %v12995_v60 = vpop.f32.mrb[104].mxu0 }
 0x57b   :  { %v12998_v28 = vpop.f32.mrb[105].mxu0 }
 0x57c   :  { %9404 = vmatmul.mubr.msk.bf16.gmra.mrb[20].mxu1 %vm336_vm0, %v5881_v2  ;;  %v13001_v40 = vpop.f32.mrb[106].mxu0  ;;  %v6360_v2 = vld [vmem:[#allocation2 + $0x7a] sm:$0xff] }
 0x57d   :  { %9407 = vmatprep.mubr.msk.bf16.mxu1 %vm336_vm0, %v5882_v37  ;;  %v13003_v12 = vpop.f32.mrb[107].mxu0  ;;  %v6361_v37 = vld [vmem:[#allocation2 + $0x82] sm:$0xff] }
 0x57e   :  { %v6421_v51 = vpack.c.bf16 %v6361_v37, %v6360_v2 }
 0x582   :  { %v13005_v36 = vpop.f32.mrb[108].mxu0 }
 0x583   :  { %v13008_v13 = vpop.f32.mrb[109].mxu0 }
 0x584   :  { %9408 = vmatmul.mubr.msk.bf16.gmra.mrb[24].mxu1 %vm336_vm0, %v5883_v16  ;;  %v13011_v59 = vpop.f32.mrb[110].mxu0 }
 0x585   :  { %9411 = vmatprep.mubr.msk.bf16.mxu1 %vm336_vm0, %v5884_v8  ;;  %v13013_v32 = vpop.f32.mrb[111].mxu0 }
 0x58a   :  { %v13015_v4 = vpop.f32.mrb[112].mxu0 }
 0x58b   :  { %v13018_v29 = vpop.f32.mrb[113].mxu0 }
 0x58c   :  { %9412 = vmatmul.mubr.msk.bf16.gmra.mrb[28].mxu1 %vm336_vm0, %v5885_v27  ;;  %v13021_v6 = vpop.f32.mrb[114].mxu0  ;;  %v6366_v27 = vld [vmem:[#allocation2 + $0xc2] sm:$0xff] }
 0x58d   :  { %9415 = vmatprep.mubr.msk.bf16.mxu1 %vm336_vm0, %v5886_v30  ;;  %v13023_v24 = vpop.f32.mrb[115].mxu0  ;;  %v6367_v30 = vld [vmem:[#allocation2 + $0xca] sm:$0xff] }
 0x58e   :  { %15024 = vst [vmem:[#allocation54_spill] sm:$0xff] %v13023_v24  ;;  %v6424_v11 = vpack.c.bf16 %v6367_v30, %v6366_v27  ;;  %v6428_v30 = vpack.c.bf16 %v6375_v26, %v6374_v22  ;;  %v6415_v24 = vld [vmem:[#allocation2 + $0x33a] sm:$0xff] }
 0x592   :  { %v13025_v55 = vpop.f32.mrb[116].mxu0 }
 0x593   :  { %15025 = vst [vmem:[#allocation53_spill] sm:$0xff] %v13025_v55  ;;  %v13028_v21 = vpop.f32.mrb[117].mxu0  ;;  %v6414_v55 = vld [vmem:[#allocation2 + $0x332] sm:$0xff] }
 0x594   :  { %9416 = vmatmul.mubr.msk.bf16.gmra.mrb[32].mxu1 %vm336_vm0, %v5887_v46  ;;  %15026 = vst [vmem:[#allocation51_spill] sm:$0xff] %v13028_v21  ;;  %v13031_v57 = vpop.f32.mrb[118].mxu0  ;;  %v6413_v21 = vld [vmem:[#allocation2 + $0x322] sm:$0xff] }
 0x595   :  { %9423 = vmatprep.mubr.msk.bf16.mxu1 %vm336_vm0, %v6418_v9  ;;  %15027 = vst [vmem:[#allocation48_spill] sm:$0xff] %v13031_v57  ;;  %v13033_v34 = vpop.f32.mrb[119].mxu0  ;;  %v6412_v57 = vld [vmem:[#allocation2 + $0x31a] sm:$0xff] }
 0x596   :  { %15028 = vst [vmem:[#allocation75_spill] sm:$0xff] %v13033_v34 }
 0x59a   :  { %v13035_v20 = vpop.f32.mrb[120].mxu0 }
 0x59b   :  { %15029 = vst [vmem:[#allocation76_spill] sm:$0xff] %v13035_v20  ;;  %v13038_v45 = vpop.f32.mrb[121].mxu0 }
 0x59c   :  { %9424 = vmatmul.mubr.msk.bf16.vlgmr.msra.gmra.mrb[36].mxu1 %vm336_vm0, %v6419_v14  ;;  %15030 = vst [vmem:[#allocation77_spill] sm:$0xff] %v13038_v45  ;;  %v13041_v23 = vpop.f32.mrb[122].mxu0  ;;  %v6425_v14 = vpack.c.bf16 %v6369_v48, %v6368_v62  ;;  %v6407_v45 = vld [vmem:[#allocation2 + $0x2da] sm:$0xff] }
 0x59d   :  { %9427 = vmatprep.mubr.msk.bf16.mxu1 %vm336_vm0, %v6420_v3  ;;  %15031 = vst [vmem:[#allocation78_spill] sm:$0xff] %v13041_v23  ;;  %v13043_v18 = vpop.f32.mrb[123].mxu0  ;;  %v6426_v3 = vpack.c.bf16 %v6371_v17, %v6370_v58  ;;  %v6376_v58 = vld [vmem:[#allocation2 + $0x13a] sm:$0xff]  ;;  %v6377_v17 = vld [vmem:[#allocation2 + $0x142] sm:$0xff]  ;;  %v6406_v23 = vld [vmem:[#allocation2 + $0x2d2] sm:$0xff] }
 0x59e   :  { %15032 = vst [vmem:[#allocation79_spill] sm:$0xff] %v13043_v18  ;;  %v6429_v53 = vpack.c.bf16 %v6377_v17, %v6376_v58  ;;  %v6444_v34 = vpack.c.bf16 %v6407_v45, %v6406_v23  ;;  %v6448_v45 = vpack.c.bf16 %v6415_v24, %v6414_v55 }
 0x5a2   :  { %v13045_v16 = vpop.f32.mrb[124].mxu0 }
 0x5a3   :  { %15033 = vst [vmem:[#allocation80_spill] sm:$0xff] %v13045_v16  ;;  %v13048_v8 = vpop.f32.mrb[125].mxu0 }
 0x5a4   :  { %9428 = vmatmul.mubr.msk.bf16.gmra.mrb[40].mxu1 %vm336_vm0, %v6421_v51  ;;  %15034 = vst [vmem:[#allocation81_spill] sm:$0xff] %v13048_v8  ;;  %v13051_v39 = vpop.f32.mrb[126].mxu0  ;;  %v6372_v51 = vld [vmem:[#allocation2 + $0x10a] sm:$0xff] }
 0x5a5   :  { %9431 = vmatprep.mubr.msk.bf16.mxu1 %vm336_vm0, %v6422_v41  ;;  %15035 = vst [vmem:[#allocation82_spill] sm:$0xff] %v13051_v39  ;;  %v13053_v33 = vpop.f32.mrb[127].mxu0  ;;  %v6373_v41 = vld [vmem:[#allocation2 + $0x112] sm:$0xff]  ;;  %v6402_v39 = vld [vmem:[#allocation2 + $0x2a2] sm:$0xff]  ;;  %v6403_v8 = vld [vmem:[#allocation2 + $0x2aa] sm:$0xff] }
 0x5a6   :  { %15036 = vst [vmem:[#allocation83_spill] sm:$0xff] %v13053_v33  ;;  %v6427_v27 = vpack.c.bf16 %v6373_v41, %v6372_v51  ;;  %v6442_v18 = vpack.c.bf16 %v6403_v8, %v6402_v39  ;;  %v6408_v8 = vld [vmem:[#allocation2 + $0x2ea] sm:$0xff]  ;;  %v6410_v39 = vld [vmem:[#allocation2 + $0x302] sm:$0xff] }
 0x5aa   :  { %v13055_v46 = vpop.f32.mrb[128].mxu0 }
 0x5ab   :  { %15037 = vst [vmem:[#allocation84_spill] sm:$0xff] %v13055_v46  ;;  %v13058_v7 = vpop.f32.mrb[129].mxu0 }
 0x5ac   :  { %9432 = vmatmul.mubr.msk.bf16.gmra.mrb[44].mxu1 %vm336_vm0, %v6423_v49  ;;  %15038 = vst [vmem:[#allocation85_spill] sm:$0xff] %v13058_v7  ;;  %v13061_v38 = vpop.f32.mrb[130].mxu0  ;;  %v6399_v7 = vld [vmem:[#allocation2 + $0x27a] sm:$0xff] }
 0x5ad   :  { %9435 = vmatprep.mubr.msk.bf16.mxu1 %vm336_vm0, %v6424_v11  ;;  %15039 = vst [vmem:[#allocation86_spill] sm:$0xff] %v13061_v38  ;;  %v13063_v9 = vpop.f32.mrb[131].mxu0  ;;  %v6398_v38 = vld [vmem:[#allocation2 + $0x272] sm:$0xff] }
 0x5ae   :  { %15040 = vst [vmem:[#allocation87_spill] sm:$0xff] %v13063_v9  ;;  %v6438_v9 = vpack.c.bf16 %v6395_v31, %v6394_v5  ;;  %v6440_v33 = vpack.c.bf16 %v6399_v7, %v6398_v38  ;;  %v6404_v38 = vld [vmem:[#allocation2 + $0x2ba] sm:$0xff] }
 0x5b2   :  { %v13065_v2 = vpop.f32.mrb[68].mxu0 }
 0x5b3   :  { %v13068_v37 = vpop.f32.mrb[69].mxu0 }
 0x5b4   :  { %9436 = vmatmul.mubr.msk.bf16.gmra.mrb[48].mxu1 %vm336_vm0, %v6425_v14  ;;  %v13071_v43 = vpop.f32.mrb[70].mxu0  ;;  %v6378_v14 = vld [vmem:[#allocation2 + $0x152] sm:$0xff] }
 0x5b5   :  { %9439 = vmatprep.mubr.msk.bf16.mxu1 %vm336_vm0, %v6426_v3  ;;  %v13073_v1 = vpop.f32.mrb[71].mxu0  ;;  %v6379_v3 = vld [vmem:[#allocation2 + $0x15a] sm:$0xff] }
 0x5b6   :  { %v6430_v10 = vpack.c.bf16 %v6379_v3, %v6378_v14  ;;  %v6385_v14 = vld [vmem:[#allocation2 + $0x1a2] sm:$0xff] }
 0x5ba   :  { %v13075_v49 = vpop.f32.mrb[72].mxu0 }
 0x5bb   :  { %v13078_v11 = vpop.f32.mrb[73].mxu0 }
 0x5bc   :  { %9440 = vmatmul.mubr.msk.bf16.gmra.mrb[52].mxu1 %vm336_vm0, %v6427_v27  ;;  %v13081_v62 = vpop.f32.mrb[74].mxu0  ;;  %v6380_v27 = vld [vmem:[#allocation2 + $0x16a] sm:$0xff] }
 0x5bd   :  { %9443 = vmatprep.mubr.msk.bf16.mxu1 %vm336_vm0, %v6428_v30  ;;  %v13083_v48 = vpop.f32.mrb[75].mxu0  ;;  %v6381_v30 = vld [vmem:[#allocation2 + $0x172] sm:$0xff] }
 0x5be   :  { %v6431_v25 = vpack.c.bf16 %v6381_v30, %v6380_v27  ;;  %v6389_v30 = vld [vmem:[#allocation2 + $0x202] sm:$0xff] }
 0x5c2   :  { %v13085_v51 = vpop.f32.mrb[76].mxu0 }
 0x5c3   :  { %v13088_v41 = vpop.f32.mrb[77].mxu0 }
 0x5c4   :  { %9444 = vmatmul.mubr.msk.bf16.gmra.mrb[56].mxu1 %vm336_vm0, %v6429_v53  ;;  %v13091_v22 = vpop.f32.mrb[78].mxu0 }
 0x5c5   :  { %9447 = vmatprep.mubr.msk.bf16.mxu1 %vm336_vm0, %v6430_v10  ;;  %v13093_v26 = vpop.f32.mrb[79].mxu0  ;;  %v6384_v10 = vld [vmem:[#allocation2 + $0x19a] sm:$0xff] }
 0x5c6   :  { %v6433_v63 = vpack.c.bf16 %v6385_v14, %v6384_v10  ;;  %v6435_v10 = vpack.c.bf16 %v6389_v30, %v6388_v0  ;;  %v6436_v14 = vpack.c.bf16 %v6391_v50, %v6390_v56 }
 0x5ca   :  { %v13095_v58 = vpop.f32.mrb[80].mxu0 }
 0x5cb   :  { %v13098_v17 = vpop.f32.mrb[81].mxu0 }
 0x5cc   :  { %9448 = vmatmul.mubr.msk.bf16.gmra.mrb[60].mxu1 %vm336_vm0, %v6431_v25  ;;  %v13101_v53 = vpop.f32.mrb[82].mxu0 }
 0x5cd   :  { %9451 = vmatprep.mubr.msk.bf16.mxu1 %vm336_vm0, %v6432_v61  ;;  %v13103_v3 = vpop.f32.mrb[83].mxu0 }
 0x5d2   :  { %v13105_v27 = vpop.f32.mrb[84].mxu0 }
 0x5d3   :  { %v13108_v52 = vpop.f32.mrb[85].mxu0 }
 0x5d4   :  { %9452 = vmatmul.mubr.msk.bf16.gmra.mrb[64].mxu1 %vm336_vm0, %v6433_v63  ;;  %v13111_v25 = vpop.f32.mrb[86].mxu0  ;;  %v6392_v63 = vld [vmem:[#allocation2 + $0x22a] sm:$0xff] }
 0x5d5   :  { %9455 = vmatprep.mubr.msk.bf16.mxu1 %vm336_vm0, %v6434_v54  ;;  %v13113_v61 = vpop.f32.mrb[87].mxu0  ;;  %v6437_v35 = vpack.c.bf16 %v6393_v19, %v6392_v63  ;;  %v6401_v63 = vld [vmem:[#allocation2 + $0x292] sm:$0xff] }
 0x5da   :  { %v13115_v44 = vpop.f32.mrb[88].mxu0 }
 0x5db   :  { %v13118_v15 = vpop.f32.mrb[89].mxu0 }
 0x5dc   :  { %9456 = vmatmul.mubr.msk.bf16.gmra.mrb[68].mxu1 %vm336_vm0, %v6435_v10  ;;  %v13121_v47 = vpop.f32.mrb[90].mxu0  ;;  %v6396_v10 = vld [vmem:[#allocation2 + $0x25a] sm:$0xff] }
 0x5dd   :  { %9459 = vmatprep.mubr.msk.bf16.mxu1 %vm336_vm0, %v6436_v14  ;;  %v13123_v54 = vpop.f32.mrb[91].mxu0  ;;  %v6397_v14 = vld [vmem:[#allocation2 + $0x262] sm:$0xff] }
 0x5de   :  { %v6439_v46 = vpack.c.bf16 %v6397_v14, %v6396_v10  ;;  %v6405_v14 = vld [vmem:[#allocation2 + $0x2c2] sm:$0xff] }
 0x5df   :  { %v6443_v20 = vpack.c.bf16 %v6405_v14, %v6404_v38  ;;  %v6447_v38 = vpack.c.bf16 %v6413_v21, %v6412_v57 }
 0x5e2   :  { %v13125_v0 = vpop.f32.mrb[92].mxu0 }
 0x5e3   :  { %v13128_v50 = vpop.f32.mrb[93].mxu0 }
 0x5e4   :  { %9460 = vmatmul.mubr.msk.bf16.gmra.mrb[8].mxu1 %vm336_vm0, %v6437_v35  ;;  %v13131_v56 = vpop.f32.mrb[94].mxu0 }
 0x5e5   :  { %9463 = vmatprep.mubr.msk.bf16.mxu1 %vm336_vm0, %v6438_v9  ;;  %v13133_v30 = vpop.f32.mrb[95].mxu0  ;;  %v6400_v9 = vld [vmem:[#allocation2 + $0x28a] sm:$0xff] }
 0x5e6   :  { %v6441_v16 = vpack.c.bf16 %v6401_v63, %v6400_v9  ;;  %v6411_v9 = vld [vmem:[#allocation2 + $0x30a] sm:$0xff] }
 0x5ea   :  { %v13135_v19 = vpop.f32.mrb[96].mxu0 }
 0x5eb   :  { %v13138_v31 = vpop.f32.mrb[97].mxu0 }
 0x5ec   :  { %9464 = vmatmul.mubr.msk.bf16.gmra.mrb[12].mxu1 %vm336_vm0, %v6439_v46  ;;  %v13141_v35 = vpop.f32.mrb[98].mxu0 }
 0x5ed   :  { %9467 = vmatprep.mubr.msk.bf16.mxu1 %vm336_vm0, %v6440_v33  ;;  %v13143_v5 = vpop.f32.mrb[99].mxu0 }
 0x5f2   :  { %v13145_v10 = vpop.f32.mrb[100].mxu0 }
 0x5f3   :  { %v13148_v7 = vpop.f32.mrb[101].mxu0 }
 0x5f4   :  { %9468 = vmatmul.mubr.msk.bf16.gmra.mrb[16].mxu1 %vm336_vm0, %v6441_v16  ;;  %v13151_v46 = vpop.f32.mrb[102].mxu0  ;;  %v6409_v16 = vld [vmem:[#allocation2 + $0x2f2] sm:$0xff] }
 0x5f5   :  { %9471 = vmatprep.mubr.msk.bf16.mxu1 %vm336_vm0, %v6442_v18  ;;  %v13153_v33 = vpop.f32.mrb[103].mxu0  ;;  %v6445_v63 = vpack.c.bf16 %v6409_v16, %v6408_v8  ;;  %v6446_v18 = vpack.c.bf16 %v6411_v9, %v6410_v39 }
 0x5fc   :  { %9472 = vmatmul.mubr.msk.bf16.gmra.mrb[20].mxu1 %vm336_vm0, %v6443_v20  ;;  %v6417_v20 = vld [vmem:[#allocation2 + $0x352] sm:$0xff] }
 0x5fd   :  { %9475 = vmatprep.mubr.msk.bf16.mxu1 %vm336_vm0, %v6444_v34  ;;  %v6416_v34 = vld [vmem:[#allocation2 + $0x34a] sm:$0xff] }
 0x5fe   :  { %v6449_v23 = vpack.c.bf16 %v6417_v20, %v6416_v34 }
 0x604   :  { %9476 = vmatmul.mubr.msk.bf16.gmra.mrb[24].mxu1 %vm336_vm0, %v6445_v63 }
 0x605   :  { %9479 = vmatprep.mubr.msk.bf16.mxu1 %vm336_vm0, %v6446_v18 }
 0x60c   :  { %9480 = vmatmul.mubr.msk.bf16.gmra.mrb[28].mxu1 %vm336_vm0, %v6447_v38 }
 0x60d   :  { %9483 = vmatprep.mubr.msk.bf16.mxu1 %vm336_vm0, %v6448_v45 }
 0x614   :  { %9484 = vmatmul.mubr.msk.bf16.gmra.mrb[32].mxu1 %vm336_vm0, %v6449_v23 }
 0x615   :  { %6982 = vmatprep.mubr.f32.mxu1 %v15023_v42 }
 0x66f   :  { %v9425_v14 = vpop.f32.mrb[36].mxu1 }
 0x670   :  { %v13164_v8 = vadd.f32 %v9425_v14, %v13065_v2  ;;  %v6597_v16 = vpop.f32.mrb[37].mxu1 }
 0x671   :  { %v13167_v39 = vadd.f32 %v6597_v16, %v13068_v37  ;;  %v9426_v24 = vpop.f32.mrb[38].mxu1 }
 0x672   :  { %v13170_v55 = vadd.f32 %v9426_v24, %v13071_v43  ;;  %v6600_v21 = vpop.f32.mrb[39].mxu1 }
 0x673   :  { %v13173_v57 = vadd.f32 %v6600_v21, %v13073_v1 }
 0x677   :  { %v9429_v9 = vpop.f32.mrb[40].mxu1 }
 0x678   :  { %v13176_v63 = vadd.f32 %v9429_v9, %v13075_v49  ;;  %v6613_v18 = vpop.f32.mrb[41].mxu1 }
 0x679   :  { %v13179_v2 = vadd.f32 %v6613_v18, %v13078_v11  ;;  %v9430_v38 = vpop.f32.mrb[42].mxu1 }
 0x67a   :  { %v13182_v37 = vadd.f32 %v9430_v38, %v13081_v62  ;;  %v6616_v45 = vpop.f32.mrb[43].mxu1 }
 0x67b   :  { %v13185_v43 = vadd.f32 %v6616_v45, %v13083_v48 }
 0x67f   :  { %v9433_v34 = vpop.f32.mrb[44].mxu1 }
 0x680   :  { %v13188_v1 = vadd.f32 %v9433_v34, %v13085_v51  ;;  %v6629_v20 = vpop.f32.mrb[45].mxu1 }
 0x681   :  { %v13191_v49 = vadd.f32 %v6629_v20, %v13088_v41  ;;  %v9434_v23 = vpop.f32.mrb[46].mxu1  ;;  %v9617_v20 = vpack.c.bf16 %v13173_v57, %v13167_v39 }
 0x682   :  { %v13194_v11 = vadd.f32 %v9434_v23, %v13091_v22  ;;  %v6632_v14 = vpop.f32.mrb[47].mxu1 }
 0x683   :  { %v13197_v62 = vadd.f32 %v6632_v14, %v13093_v26 }
 0x687   :  { %v9437_v16 = vpop.f32.mrb[48].mxu1 }
 0x688   :  { %v13200_v48 = vadd.f32 %v9437_v16, %v13095_v58  ;;  %v6645_v24 = vpop.f32.mrb[49].mxu1  ;;  %v9621_v16 = vpack.c.bf16 %v13170_v55, %v13164_v8 }
 0x689   :  { %v13203_v51 = vadd.f32 %v6645_v24, %v13098_v17  ;;  %v9438_v21 = vpop.f32.mrb[50].mxu1 }
 0x68a   :  { %15041 = vst [vmem:[#allocation88_spill] sm:$0xff] %v13200_v48  ;;  %v13206_v41 = vadd.f32 %v9438_v21, %v13101_v53  ;;  %v6648_v9 = vpop.f32.mrb[51].mxu1 }
 0x68b   :  { %v13209_v22 = vadd.f32 %v6648_v9, %v13103_v3 }
 0x68f   :  { %v9441_v18 = vpop.f32.mrb[52].mxu1 }
 0x690   :  { %v13212_v26 = vadd.f32 %v9441_v18, %v13105_v27  ;;  %v6661_v38 = vpop.f32.mrb[53].mxu1 }
 0x691   :  { %v13215_v58 = vadd.f32 %v6661_v38, %v13108_v52  ;;  %v9442_v45 = vpop.f32.mrb[54].mxu1 }
 0x692   :  { %v13218_v17 = vadd.f32 %v9442_v45, %v13111_v25  ;;  %v6664_v34 = vpop.f32.mrb[55].mxu1 }
 0x693   :  { %v13221_v53 = vadd.f32 %v6664_v34, %v13113_v61 }
 0x694   :  { %v9619_v52 = vpack.c.bf16 %v13218_v17, %v13212_v26 }
 0x695   :  { %15042 = vst [vmem:[#allocation89_spill] sm:$0xff] %v13221_v53  ;;  %v9615_v3 = vpack.c.bf16 %v13221_v53, %v13215_v58 }
 0x697   :  { %v9445_v27 = vpop.f32.mrb[56].mxu1  ;;  %9616 = vmatprep.subr.bf16.mxu1 %v9615_v3  ;;  %v9629_v3 = vpack.c.bf16 %v13182_v37, %v13176_v63 }
 0x698   :  { %v13230_v23 = vadd.f32 %v9445_v27, %v13115_v44  ;;  %v6677_v25 = vpop.f32.mrb[57].mxu1  ;;  %9618 = vmatpush3.bf16.msra.mxu1 %v9617_v20 }
 0x699   :  { %v13233_v14 = vadd.f32 %v6677_v25, %v13118_v15  ;;  %v9446_v61 = vpop.f32.mrb[58].mxu1  ;;  %9620 = vmatprep.subr.bf16.mxu1 %v9619_v52  ;;  %v9625_v15 = vpack.c.bf16 %v13185_v43, %v13179_v2 }
 0x69a   :  { %v13238_v24 = vadd.f32 %v9446_v61, %v13121_v47  ;;  %v6680_v21 = vpop.f32.mrb[59].mxu1 }
 0x69b   :  { %v13241_v9 = vadd.f32 %v6680_v21, %v13123_v54 }
 0x69c   :  { %15043 = vst [vmem:[#allocation90_spill] sm:$0xff] %v13238_v24  ;;  %9622 = vmatpush3.bf16.msra.mxu1 %v9621_v16  ;;  %v9627_v38 = vpack.c.bf16 %v13238_v24, %v13230_v23 }
 0x69d   :  { %v9623_v44 = vpack.c.bf16 %v13241_v9, %v13233_v14 }
 0x69f   :  { %v9449_v18 = vpop.f32.mrb[60].mxu1  ;;  %9624 = vmatprep.subr.bf16.mxu1 %v9623_v44  ;;  %v9637_v44 = vpack.c.bf16 %v13194_v11, %v13188_v1 }
 0x6a0   :  { %v13250_v45 = vadd.f32 %v9449_v18, %v13125_v0  ;;  %v6693_v47 = vpop.f32.mrb[61].mxu1  ;;  %9626 = vmatpush3.bf16.msra.mxu1 %v9625_v15 }
 0x6a1   :  { %v13253_v54 = vadd.f32 %v6693_v47, %v13128_v50  ;;  %v9450_v34 = vpop.f32.mrb[62].mxu1  ;;  %9628 = vmatprep.subr.bf16.mxu1 %v9627_v38  ;;  %v9633_v50 = vpack.c.bf16 %v13197_v62, %v13191_v49 }
 0x6a2   :  { %v13258_v20 = vadd.f32 %v9450_v34, %v13131_v56  ;;  %v6696_v27 = vpop.f32.mrb[63].mxu1 }
 0x6a3   :  { %v13261_v52 = vadd.f32 %v6696_v27, %v13133_v30 }
 0x6a4   :  { %9630 = vmatpush3.bf16.msra.mxu1 %v9629_v3  ;;  %v9635_v61 = vpack.c.bf16 %v13258_v20, %v13250_v45 }
 0x6a5   :  { %v9631_v0 = vpack.c.bf16 %v13261_v52, %v13253_v54 }
 0x6a7   :  { %v9453_v25 = vpop.f32.mrb[64].mxu1  ;;  %9632 = vmatprep.subr.bf16.mxu1 %v9631_v0  ;;  %v9645_v0 = vpack.c.bf16 %v13206_v41, %v13200_v48 }
 0x6a8   :  { %v13270_v16 = vadd.f32 %v9453_v25, %v13135_v19  ;;  %v6709_v56 = vpop.f32.mrb[65].mxu1  ;;  %9634 = vmatpush3.bf16.msra.mxu1 %v9633_v50 }
 0x6a9   :  { %v13273_v30 = vadd.f32 %v6709_v56, %v13138_v31  ;;  %v9454_v21 = vpop.f32.mrb[66].mxu1  ;;  %9636 = vmatprep.subr.bf16.mxu1 %v9635_v61  ;;  %v9641_v31 = vpack.c.bf16 %v13209_v22, %v13203_v51 }
 0x6aa   :  { %15044 = vst [vmem:[#allocation91_spill] sm:$0xff] %v13270_v16  ;;  %v13278_v15 = vadd.f32 %v9454_v21, %v13141_v35  ;;  %v6712_v18 = vpop.f32.mrb[67].mxu1 }
 0x6ab   :  { %v13281_v38 = vadd.f32 %v6712_v18, %v13143_v5 }
 0x6ac   :  { %15045 = vst [vmem:[#allocation92_spill] sm:$0xff] %v13278_v15  ;;  %9638 = vmatpush3.bf16.msra.mxu1 %v9637_v44  ;;  %v9643_v34 = vpack.c.bf16 %v13278_v15, %v13270_v16 }
 0x6ad   :  { %15046 = vst [vmem:[#allocation93_spill] sm:$0xff] %v13281_v38  ;;  %v9639_v19 = vpack.c.bf16 %v13281_v38, %v13273_v30 }
 0x6af   :  { %v9457_v47 = vpop.f32.mrb[68].mxu1  ;;  %9640 = vmatprep.subr.bf16.mxu1 %v9639_v19 }
 0x6b0   :  { %v13290_v3 = vadd.f32 %v9457_v47, %v13145_v10  ;;  %v6725_v35 = vpop.f32.mrb[69].mxu1  ;;  %9642 = vmatpush3.bf16.msra.mxu1 %v9641_v31 }
 0x6b1   :  { %v13293_v5 = vadd.f32 %v6725_v35, %v13148_v7  ;;  %v9458_v27 = vpop.f32.mrb[70].mxu1  ;;  %9644 = vmatprep.subr.bf16.mxu1 %v9643_v34 }
 0x6b2   :  { %15047 = vst [vmem:[#allocation94_spill] sm:$0xff] %v13290_v3  ;;  %v13298_v50 = vadd.f32 %v9458_v27, %v13151_v46  ;;  %v6728_v25 = vpop.f32.mrb[71].mxu1 }
 0x6b3   :  { %15048 = vst [vmem:[#allocation95_spill] sm:$0xff] %v13293_v5  ;;  %v13301_v61 = vadd.f32 %v6728_v25, %v13153_v33 }
 0x6b4   :  { %9646 = vmatpush3.bf16.msra.mxu1 %v9645_v0 }
 0x6b5   :  { %15049 = vst [vmem:[#allocation96_spill] sm:$0xff] %v13301_v61 }
 0x6b7   :  { %v9461_v10 = vpop.f32.mrb[8].mxu1  ;;  %6983 = vmatmul.mubr.f32.vlgmr.msra.gmra.mrb[6].mxu1 %v15023_v42 }
 0x6b8   :  { %v13305_v56 = vadd.f32 %v9461_v10, %v12995_v60  ;;  %v6741_v7 = vpop.f32.mrb[9].mxu1 }
 0x6b9   :  { %v13308_v21 = vadd.f32 %v6741_v7, %v12998_v28  ;;  %v9462_v44 = vpop.f32.mrb[10].mxu1  ;;  %v15055_v7 = vld [vmem:[#allocation54_spill] sm:$0xff] }
 0x6ba   :  { %15050 = vst [vmem:[#allocation97_spill] sm:$0xff] %v13305_v56  ;;  %v13311_v18 = vadd.f32 %v9462_v44, %v13001_v40  ;;  %v6744_v46 = vpop.f32.mrb[11].mxu1 }
 0x6bb   :  { %15051 = vst [vmem:[#allocation98_spill] sm:$0xff] %v13308_v21  ;;  %v13314_v19 = vadd.f32 %v6744_v46, %v13003_v12  ;;  %v15056_v46 = vld [vmem:[#allocation53_spill] sm:$0xff] }
 0x6bd   :  { %15052 = vst [vmem:[#allocation99_spill] sm:$0xff] %v13314_v19 }
 0x6bf   :  { %v9465_v33 = vpop.f32.mrb[12].mxu1 }
 0x6c0   :  { %v13317_v31 = vadd.f32 %v9465_v33, %v13005_v36  ;;  %v6757_v47 = vpop.f32.mrb[13].mxu1 }
 0x6c1   :  { %v13320_v60 = vadd.f32 %v6757_v47, %v13008_v13  ;;  %v9466_v34 = vpop.f32.mrb[14].mxu1  ;;  %v15058_v47 = vld [vmem:[#allocation51_spill] sm:$0xff] }
 0x6c2   :  { %v13323_v28 = vadd.f32 %v9466_v34, %v13011_v59  ;;  %v6760_v35 = vpop.f32.mrb[15].mxu1 }
 0x6c3   :  { %15053 = vst [vmem:[#allocation100_spill] sm:$0xff] %v13320_v60  ;;  %v13326_v40 = vadd.f32 %v6760_v35, %v13013_v32  ;;  %v15060_v35 = vld [vmem:[#allocation48_spill] sm:$0xff] }
 0x6c5   :  { %15054 = vst [vmem:[#allocation101_spill] sm:$0xff] %v13326_v40 }
 0x6c7   :  { %v9469_v27 = vpop.f32.mrb[16].mxu1 }
 0x6c8   :  { %v13329_v12 = vadd.f32 %v9469_v27, %v13015_v4  ;;  %v6773_v0 = vpop.f32.mrb[17].mxu1 }
 0x6c9   :  { %v13332_v36 = vadd.f32 %v6773_v0, %v13018_v29  ;;  %v9470_v25 = vpop.f32.mrb[18].mxu1  ;;  %v15062_v0 = vld [vmem:[#allocation75_spill] sm:$0xff] }
 0x6ca   :  { %v13335_v13 = vadd.f32 %v9470_v25, %v13021_v6  ;;  %v6776_v10 = vpop.f32.mrb[19].mxu1 }
 0x6cb   :  { %v13338_v59 = vadd.f32 %v6776_v10, %v15055_v7  ;;  %v9649_v10 = vpack.c.bf16 %v13301_v61, %v13293_v5  ;;  %v15070_v61 = vld [vmem:[#allocation79_spill] sm:$0xff] }
 0x6cf   :  { %v9473_v44 = vpop.f32.mrb[20].mxu1 }
 0x6d0   :  { %v13341_v32 = vadd.f32 %v9473_v44, %v15056_v46  ;;  %v6789_v33 = vpop.f32.mrb[21].mxu1  ;;  %v15064_v46 = vld [vmem:[#allocation76_spill] sm:$0xff] }
 0x6d1   :  { %v13344_v4 = vadd.f32 %v6789_v33, %v15058_v47  ;;  %v9474_v34 = vpop.f32.mrb[22].mxu1 }
 0x6d2   :  { %15057 = vst [vmem:[#allocation54_spill] sm:$0xff] %v13341_v32  ;;  %v13347_v29 = vadd.f32 %v9474_v34, %v15060_v35  ;;  %v6792_v27 = vpop.f32.mrb[23].mxu1  ;;  %v15066_v34 = vld [vmem:[#allocation77_spill] sm:$0xff] }
 0x6d3   :  { %15059 = vst [vmem:[#allocation53_spill] sm:$0xff] %v13344_v4  ;;  %v13350_v6 = vadd.f32 %v6792_v27, %v15062_v0  ;;  %v9653_v0 = vpack.c.bf16 %v13298_v50, %v13290_v3 }
 0x6d4   :  { %15061 = vst [vmem:[#allocation51_spill] sm:$0xff] %v13347_v29  ;;  %v9651_v44 = vpack.c.bf16 %v13347_v29, %v13341_v32 }
 0x6d5   :  { %15063 = vst [vmem:[#allocation48_spill] sm:$0xff] %v13350_v6  ;;  %v9647_v25 = vpack.c.bf16 %v13350_v6, %v13344_v4  ;;  %v15068_v4 = vld [vmem:[#allocation78_spill] sm:$0xff] }
 0x6d7   :  { %v9477_v7 = vpop.f32.mrb[24].mxu1  ;;  %9648 = vmatprep.subr.bf16.mxu0 %v9647_v25 }
 0x6d8   :  { %v13359_v33 = vadd.f32 %v9477_v7, %v15064_v46  ;;  %v6805_v47 = vpop.f32.mrb[25].mxu1  ;;  %9650 = vmatpush3.bf16.msra.mxu0 %v9649_v10  ;;  %v9657_v10 = vpack.c.bf16 %v13314_v19, %v13308_v21  ;;  %v15078_v19 = vld [vmem:[#allocation83_spill] sm:$0xff] }
 0x6d9   :  { %v13362_v35 = vadd.f32 %v6805_v47, %v15066_v34  ;;  %v9478_v27 = vpop.f32.mrb[26].mxu1  ;;  %9652 = vmatprep.subr.bf16.mxu0 %v9651_v44  ;;  %v15072_v47 = vld [vmem:[#allocation80_spill] sm:$0xff] }
 0x6da   :  { %15065 = vst [vmem:[#allocation75_spill] sm:$0xff] %v13359_v33  ;;  %v13367_v5 = vadd.f32 %v9478_v27, %v15068_v4  ;;  %v6808_v25 = vpop.f32.mrb[27].mxu1  ;;  %v15074_v27 = vld [vmem:[#allocation81_spill] sm:$0xff] }
 0x6db   :  { %15067 = vst [vmem:[#allocation76_spill] sm:$0xff] %v13362_v35  ;;  %v13370_v48 = vadd.f32 %v6808_v25, %v15070_v61  ;;  %v9661_v25 = vpack.c.bf16 %v13311_v18, %v13305_v56 }
 0x6dc   :  { %15069 = vst [vmem:[#allocation77_spill] sm:$0xff] %v13367_v5  ;;  %9654 = vmatpush3.bf16.msra.mxu0 %v9653_v0  ;;  %v9659_v44 = vpack.c.bf16 %v13367_v5, %v13359_v33 }
 0x6dd   :  { %15071 = vst [vmem:[#allocation78_spill] sm:$0xff] %v13370_v48  ;;  %v9655_v7 = vpack.c.bf16 %v13370_v48, %v13362_v35  ;;  %v15076_v35 = vld [vmem:[#allocation82_spill] sm:$0xff] }
 0x6df   :  { %v9481_v46 = vpop.f32.mrb[28].mxu1  ;;  %9656 = vmatprep.subr.bf16.mxu0 %v9655_v7 }
 0x6e0   :  { %v13379_v34 = vadd.f32 %v9481_v46, %v15072_v47  ;;  %v6821_v4 = vpop.f32.mrb[29].mxu1  ;;  %9658 = vmatpush3.bf16.msra.mxu0 %v9657_v10  ;;  %v9665_v10 = vpack.c.bf16 %v13326_v40, %v13320_v60  ;;  %v15086_v40 = vld [vmem:[#allocation87_spill] sm:$0xff] }
 0x6e1   :  { %v13382_v61 = vadd.f32 %v6821_v4, %v15074_v27  ;;  %v9482_v0 = vpop.f32.mrb[30].mxu1  ;;  %9660 = vmatprep.subr.bf16.mxu0 %v9659_v44  ;;  %v15080_v4 = vld [vmem:[#allocation84_spill] sm:$0xff] }
 0x6e2   :  { %15073 = vst [vmem:[#allocation79_spill] sm:$0xff] %v13379_v34  ;;  %v13387_v21 = vadd.f32 %v9482_v0, %v15076_v35  ;;  %v6824_v7 = vpop.f32.mrb[31].mxu1  ;;  %v15082_v0 = vld [vmem:[#allocation85_spill] sm:$0xff] }
 0x6e3   :  { %15075 = vst [vmem:[#allocation80_spill] sm:$0xff] %v13382_v61  ;;  %v13390_v3 = vadd.f32 %v6824_v7, %v15078_v19  ;;  %v9669_v7 = vpack.c.bf16 %v13323_v28, %v13317_v31 }
 0x6e4   :  { %15077 = vst [vmem:[#allocation81_spill] sm:$0xff] %v13387_v21  ;;  %9662 = vmatpush3.bf16.msra.mxu0 %v9661_v25  ;;  %v9667_v44 = vpack.c.bf16 %v13387_v21, %v13379_v34 }
 0x6e5   :  { %15079 = vst [vmem:[#allocation82_spill] sm:$0xff] %v13390_v3  ;;  %v9663_v46 = vpack.c.bf16 %v13390_v3, %v13382_v61  ;;  %v15084_v61 = vld [vmem:[#allocation86_spill] sm:$0xff] }
 0x6e7   :  { %v9485_v47 = vpop.f32.mrb[32].mxu1  ;;  %9664 = vmatprep.subr.bf16.mxu0 %v9663_v46 }
 0x6e8   :  { %v13399_v27 = vadd.f32 %v9485_v47, %v15080_v4  ;;  %v6837_v35 = vpop.f32.mrb[33].mxu1  ;;  %9666 = vmatpush3.bf16.msra.mxu0 %v9665_v10  ;;  %v9673_v10 = vpack.c.bf16 %v13338_v59, %v13332_v36 }
 0x6e9   :  { %v13402_v19 = vadd.f32 %v6837_v35, %v15082_v0  ;;  %v9486_v25 = vpop.f32.mrb[34].mxu1  ;;  %9668 = vmatprep.subr.bf16.mxu0 %v9667_v44  ;;  %v7076_v44 = vmul.f32 %v13221_v53, %v13221_v53  ;;  %v9677_v35 = vpack.c.bf16 %v13335_v13, %v13329_v12  ;;  %v7078_v0 = vmul.f32 %v13218_v17, %v13218_v17 }
 0x6ea   :  { %15081 = vst [vmem:[#allocation83_spill] sm:$0xff] %v13399_v27  ;;  %v13407_v60 = vadd.f32 %v9486_v25, %v15084_v61  ;;  %v6840_v46 = vpop.f32.mrb[35].mxu1  ;;  %v7075_v61 = vmul.f32 %v13215_v58, %v13215_v58 }
 0x6eb   :  { %15083 = vst [vmem:[#allocation84_spill] sm:$0xff] %v13402_v19  ;;  %v13410_v56 = vadd.f32 %v6840_v46, %v15086_v40  ;;  %v7060_v40 = vmul.f32 %v13173_v57, %v13173_v57  ;;  %v7077_v46 = vmul.f32 %v13212_v26, %v13212_v26 }
 0x6ec   :  { %15085 = vst [vmem:[#allocation85_spill] sm:$0xff] %v13407_v60  ;;  %9670 = vmatpush3.bf16.msra.mxu0 %v9669_v7  ;;  %v9675_v4 = vpack.c.bf16 %v13407_v60, %v13399_v27  ;;  %v9679_v25 = vpack.c.bf16 %v7076_v44, %v7075_v61  ;;  %v7059_v7 = vmul.f32 %v13167_v39, %v13167_v39 }
 0x6ed   :  { %15087 = vst [vmem:[#allocation86_spill] sm:$0xff] %v13410_v56  ;;  %v9671_v47 = vpack.c.bf16 %v13410_v56, %v13402_v19  ;;  %v9683_v53 = vpack.c.bf16 %v7078_v0, %v7077_v46  ;;  %v7061_v44 = vmul.f32 %v13164_v8, %v13164_v8  ;;  %v7079_v61 = vmul.f32 %v13233_v14, %v13233_v14 }
 0x6ee   :  { %v7063_v0 = vmul.f32 %v13179_v2, %v13179_v2  ;;  %v7081_v46 = vmul.f32 %v13230_v23, %v13230_v23 }
 0x6ef   :  { %9672 = vmatprep.subr.bf16.mxu0 %v9671_v47  ;;  %v7062_v47 = vmul.f32 %v13170_v55, %v13170_v55 }
 0x6f0   :  { %9674 = vmatpush3.bf16.msra.mxu0 %v9673_v10  ;;  %v9681_v10 = vpack.c.bf16 %v7060_v40, %v7059_v7  ;;  %v7064_v40 = vmul.f32 %v13185_v43, %v13185_v43 }
 0x6f1   :  { %9676 = vmatprep.subr.bf16.mxu0 %v9675_v4  ;;  %v7080_v4 = vmul.f32 %v13241_v9, %v13241_v9 }
 0x6f3   :  { %v9687_v7 = vpack.c.bf16 %v7080_v4, %v7079_v61  ;;  %v7083_v4 = vmul.f32 %v13253_v54, %v13253_v54 }
 0x6f4   :  { %9678 = vmatpush3.bf16.msra.mxu0 %v9677_v35  ;;  %v9685_v35 = vpack.c.bf16 %v7062_v47, %v7061_v44  ;;  %v7084_v47 = vmul.f32 %v13261_v52, %v13261_v52 }
 0x6f5   :  { %9680 = vmatprep.subr.bf16.mxu0 %v9679_v25  ;;  %v7082_v25 = vmul.f32 %v13238_v24, %v13238_v24  ;;  %v7065_v24 = vmul.f32 %v13176_v63, %v13176_v63 }
 0x6f7   :  { %7053 = vmatmul.mubr.f32.vlgmr.msra.gmra.mrb[66].mxu0 %v15023_v42  ;;  %v9691_v44 = vpack.c.bf16 %v7082_v25, %v7081_v46  ;;  %v7085_v25 = vmul.f32 %v13250_v45, %v13250_v45  ;;  %v7070_v46 = vmul.f32 %v13194_v11, %v13194_v11 }
 0x6f8   :  { %9682 = vmatpush3.bf16.msra.mxu0 %v9681_v10  ;;  %7187 = vmatprep.mubr.f32.mxu0 %v15023_v42  ;;  %v7066_v10 = vmul.f32 %v13182_v37, %v13182_v37 }
 0x6f9   :  { %9684 = vmatprep.subr.bf16.mxu0 %v9683_v53  ;;  %v9689_v53 = vpack.c.bf16 %v7064_v40, %v7063_v0  ;;  %v9695_v40 = vpack.c.bf16 %v7084_v47, %v7083_v4  ;;  %v7067_v0 = vmul.f32 %v13191_v49, %v13191_v49  ;;  %v7087_v47 = vmul.f32 %v13273_v30, %v13273_v30 }
 0x6fa   :  { %v9693_v61 = vpack.c.bf16 %v7066_v10, %v7065_v24  ;;  %v7088_v24 = vmul.f32 %v13281_v38, %v13281_v38  ;;  %v15090_v38 = vld [vmem:[#allocation96_spill] sm:$0xff] }
 0x6fc   :  { %9686 = vmatpush3.bf16.msra.mxu0 %v9685_v35  ;;  %v7068_v35 = vmul.f32 %v13197_v62, %v13197_v62 }
 0x6fd   :  { %9688 = vmatprep.subr.bf16.mxu0 %v9687_v7  ;;  %v7086_v7 = vmul.f32 %v13258_v20, %v13258_v20 }
 0x6ff   :  { %v9699_v10 = vpack.c.bf16 %v7086_v7, %v7085_v25  ;;  %v7089_v7 = vmul.f32 %v13270_v16, %v13270_v16  ;;  %v7074_v25 = vmul.f32 %v13206_v41, %v13206_v41  ;;  %v7110_v16 = vmul.f32 %v13347_v29, %v13347_v29  ;;  %v15094_v29 = vld [vmem:[#allocation99_spill] sm:$0xff] }
 0x700   :  { %9690 = vmatpush3.bf16.msra.mxu0 %v9689_v53  ;;  %v9697_v53 = vpack.c.bf16 %v7068_v35, %v7067_v0  ;;  %v9703_v35 = vpack.c.bf16 %v7088_v24, %v7087_v47  ;;  %v7071_v0 = vmul.f32 %v13203_v51, %v13203_v51  ;;  %v15089_v24 = vld [vmem:[#allocation53_spill] sm:$0xff] }
 0x701   :  { %9692 = vmatprep.subr.bf16.mxu0 %v9691_v44  ;;  %v7069_v44 = vmul.f32 %v13188_v1, %v13188_v1  ;;  %v7107_v47 = vmul.f32 %v15089_v24, %v15089_v24  ;;  %v15098_v24 = vld [vmem:[#allocation101_spill] sm:$0xff] }
 0x703   :  { %v9701_v4 = vpack.c.bf16 %v7070_v46, %v7069_v44  ;;  %v7108_v46 = vmul.f32 %v13350_v6, %v13350_v6  ;;  %v15088_v44 = vld [vmem:[#allocation88_spill] sm:$0xff] }
 0x704   :  { %9694 = vmatpush3.bf16.msra.mxu0 %v9693_v61  ;;  %v7072_v61 = vmul.f32 %v13209_v22, %v13209_v22 }
 0x705   :  { %9696 = vmatprep.subr.bf16.mxu0 %v9695_v40  ;;  %v7090_v40 = vmul.f32 %v13278_v15, %v13278_v15  ;;  %v7073_v15 = vmul.f32 %v15088_v44, %v15088_v44 }
 0x708   :  { %9698 = vmatpush3.bf16.msra.mxu0 %v9697_v53  ;;  %v9705_v53 = vpack.c.bf16 %v7072_v61, %v7071_v0  ;;  %v9711_v61 = vpack.c.bf16 %v7108_v46, %v7107_v47  ;;  %v15091_v0 = vld [vmem:[#allocation95_spill] sm:$0xff]  ;;  %v15093_v47 = vld [vmem:[#allocation76_spill] sm:$0xff] }
 0x709   :  { %9700 = vmatprep.subr.bf16.mxu0 %v9699_v10  ;;  %v9707_v10 = vpack.c.bf16 %v7090_v40, %v7089_v7  ;;  %v7091_v6 = vmul.f32 %v15091_v0, %v15091_v0  ;;  %v7109_v40 = vmul.f32 %v13341_v32, %v13341_v32  ;;  %v7094_v7 = vmul.f32 %v13298_v50, %v13298_v50  ;;  %v15095_v32 = vld [vmem:[#allocation98_spill] sm:$0xff] }
 0x70c   :  { %9702 = vmatpush3.bf16.msra.mxu0 %v9701_v4  ;;  %v9709_v4 = vpack.c.bf16 %v7074_v25, %v7073_v15  ;;  %v7112_v15 = vmul.f32 %v13370_v48, %v13370_v48  ;;  %v9715_v25 = vpack.c.bf16 %v7110_v16, %v7109_v40  ;;  %v7095_v16 = vmul.f32 %v15095_v32, %v15095_v32 }
 0x70d   :  { %9704 = vmatprep.subr.bf16.mxu0 %v9703_v35  ;;  %v7092_v35 = vmul.f32 %v15090_v38, %v15090_v38  ;;  %v7113_v40 = vmul.f32 %v13359_v33, %v13359_v33  ;;  %v7118_v33 = vmul.f32 %v13387_v21, %v13387_v21 }
 0x710   :  { %9706 = vmatpush3.bf16.msra.mxu0 %v9705_v53  ;;  %v9713_v53 = vpack.c.bf16 %v7092_v35, %v7091_v6  ;;  %v7096_v6 = vmul.f32 %v15094_v29, %v15094_v29  ;;  %v7114_v35 = vmul.f32 %v13367_v5, %v13367_v5 }
 0x711   :  { %9708 = vmatprep.subr.bf16.mxu0 %v9707_v10  ;;  %v15092_v10 = vld [vmem:[#allocation94_spill] sm:$0xff] }
 0x712   :  { %v7093_v46 = vmul.f32 %v15092_v10, %v15092_v10 }
 0x714   :  { %9710 = vmatpush3.bf16.msra.mxu0 %v9709_v4  ;;  %v7111_v4 = vmul.f32 %v15093_v47, %v15093_v47  ;;  %v15096_v47 = vld [vmem:[#allocation97_spill] sm:$0xff] }
 0x715   :  { %9712 = vmatprep.subr.bf16.mxu0 %v9711_v61  ;;  %v9717_v61 = vpack.c.bf16 %v7094_v7, %v7093_v46  ;;  %v7116_v7 = vmul.f32 %v13390_v3, %v13390_v3  ;;  %v9723_v46 = vpack.c.bf16 %v7114_v35, %v7113_v40  ;;  %v7097_v5 = vmul.f32 %v15096_v47, %v15096_v47 }
 0x716   :  { %v9719_v48 = vpack.c.bf16 %v7112_v15, %v7111_v4  ;;  %v15097_v15 = vld [vmem:[#allocation80_spill] sm:$0xff]  ;;  %v7117_v35 = vmul.f32 %v13379_v34, %v13379_v34  ;;  %v7102_v40 = vmul.f32 %v13323_v28, %v13323_v28 }
 0x717   :  { %7188 = vmatmul.mubr.f32.vlgmr.msra.gmra.mrb[132].mxu0 %v15023_v42  ;;  %v7115_v4 = vmul.f32 %v15097_v15, %v15097_v15 }
 0x718   :  { %9714 = vmatpush3.bf16.msra.mxu0 %v9713_v53  ;;  %7257 = vmatprep.mubr.f32.mxu0 %v15023_v42  ;;  %v7098_v53 = vmul.f32 %v13311_v18, %v13311_v18 }
 0x719   :  { %9716 = vmatprep.subr.bf16.mxu0 %v9715_v25  ;;  %v9721_v25 = vpack.c.bf16 %v7096_v6, %v7095_v16  ;;  %v9727_v6 = vpack.c.bf16 %v7116_v7, %v7115_v4  ;;  %v15099_v16 = vld [vmem:[#allocation100_spill] sm:$0xff]  ;;  %v7119_v7 = vmul.f32 %v13402_v19, %v13402_v19 }
 0x71a   :  { %v7099_v3 = vmul.f32 %v15099_v16, %v15099_v16 }
 0x71c   :  { %9718 = vmatpush3.bf16.msra.mxu0 %v9717_v61  ;;  %v9725_v61 = vpack.c.bf16 %v7098_v53, %v7097_v5  ;;  %v7120_v5 = vmul.f32 %v13410_v56, %v13410_v56  ;;  %v9731_v53 = vpack.c.bf16 %v7118_v33, %v7117_v35  ;;  %v7121_v33 = vmul.f32 %v13399_v27, %v13399_v27 }
 0x71d   :  { %9720 = vmatprep.subr.bf16.mxu0 %v9719_v48  ;;  %v7100_v48 = vmul.f32 %v15098_v24, %v15098_v24  ;;  %v7106_v35 = vmul.f32 %v13335_v13, %v13335_v13 }
 0x720   :  { %9722 = vmatpush3.bf16.msra.mxu0 %v9721_v25  ;;  %v9729_v25 = vpack.c.bf16 %v7100_v48, %v7099_v3  ;;  %v9735_v3 = vpack.c.bf16 %v7120_v5, %v7119_v7  ;;  %v7103_v48 = vmul.f32 %v13332_v36, %v13332_v36 }
 0x721   :  { %9724 = vmatprep.subr.bf16.mxu0 %v9723_v46  ;;  %v7101_v46 = vmul.f32 %v13317_v31, %v13317_v31 }
 0x723   :  { %v9733_v4 = vpack.c.bf16 %v7102_v40, %v7101_v46 }
 0x724   :  { %9726 = vmatpush3.bf16.msra.mxu0 %v9725_v61  ;;  %v7104_v61 = vmul.f32 %v13338_v59, %v13338_v59 }
 0x725   :  { %9728 = vmatprep.subr.bf16.mxu0 %v9727_v6  ;;  %v7122_v6 = vmul.f32 %v13407_v60, %v13407_v60 }
 0x727   :  { %v9739_v40 = vpack.c.bf16 %v7122_v6, %v7121_v33 }
 0x728   :  { %9730 = vmatpush3.bf16.msra.mxu0 %v9729_v25  ;;  %v9737_v25 = vpack.c.bf16 %v7104_v61, %v7103_v48 }
 0x729   :  { %9732 = vmatprep.subr.bf16.mxu0 %v9731_v53  ;;  %v7105_v53 = vmul.f32 %v13329_v12, %v13329_v12 }
 0x72b   :  { %v9741_v46 = vpack.c.bf16 %v7106_v35, %v7105_v53 }
 0x72c   :  { %9734 = vmatpush3.bf16.msra.mxu0 %v9733_v4 }
 0x72d   :  { %9736 = vmatprep.subr.bf16.mxu0 %v9735_v3 }
 0x730   :  { %9738 = vmatpush3.bf16.msra.mxu0 %v9737_v25 }
 0x731   :  { %9740 = vmatprep.subr.bf16.mxu0 %v9739_v40 }
 0x734   :  { %9742 = vmatpush3.bf16.msra.mxu0 %v9741_v46 }
 0x737   :  { %7258 = vmatmul.mubr.f32.vlgmr.msra.gmra.mrb[134].mxu0 %v15023_v42  ;;  %v6916_v42 = vld [vmem:[%s14478_s5 + $0x1] sm:$0x1]  ;;  %s10446_s5 = smov [#allocation3]  }
 0x78a   :  { %v8631_v5 = vpop.f32.mrb[6].mxu1 }
 0x78b   :  { %v8632_v7 = vpop.f32.mrb[7].mxu1 }
 0x78c   :  { %v8633_v4 = vadd.f32 %v8632_v7, %v8631_v5 }
 0x7ca   :  { %v8666_v60 = vpop.f32.mrb[66].mxu0 }
 0x7cb   :  { %v8667_v27 = vpop.f32.mrb[67].mxu0 }
 0x7cc   :  { %v8668_v3 = vadd.f32 %v8667_v27, %v8666_v60 }
 0x7ce   :  { %v7055_v56 = vadd.f32 %v8668_v3, %v8633_v4 }
 0x7d0   :  { %v7058_v33 = vmul.f32 0.001953125, %v7055_v56 }
 0x7d2   :  { %v7264_v40 = vmul.f32 %v7058_v33, %v7058_v33 }
 0x7ea   :  { %v8701_v19 = vpop.f32.mrb[132].mxu0 }
 0x7eb   :  { %v8702_v21 = vpop.f32.mrb[133].mxu0 }
 0x7ec   :  { %v8703_v61 = vadd.f32 %v8702_v21, %v8701_v19  ;;  %v6917_v21 = vld [vmem:[%s14479_s6 + $0x1] sm:$0x1]  ;;  %v15100_v19 = vld [vmem:[#allocation47_spill] sm:$0xff]  ;;  %s7604_s6 = sshll.u32 %s10446_s5, 4  ;;  %s7605_s6 = int_to_ptr.vmem [resolvable:$true] %s7604_s6 }
 0x7ed   :  { %s10420_s27 = scalar_lea.vmem %s7605_s6, 8192  ;;  %p10425_p1 = scmp.lt.s32.totalorder %s7605_s6, %s7605_s6 }
 0x7ee   :  { %p10421_p0 = scmp.ne.s32.totalorder %s7605_s6, %s10420_s27  ;;  %p10426_p2 = scmp.lt.s32.totalorder %s10420_s27, %s10420_s27 }
 0x7f0   :  { %p10427_p3 = por %p10426_p2, %p10425_p1 }
 0x7f2   :  { %p10428_p4 = pnand %p10427_p3, %p10421_p0 }
 0x80a   :  { %v8736_v6 = vpop.f32.mrb[134].mxu0 }
 0x80b   :  { %v8737_v48 = vpop.f32.mrb[135].mxu0 }
 0x80c   :  { %v8738_v34 = vadd.f32 %v8737_v48, %v8736_v6 }
 0x80e   :  { %v7260_v25 = vadd.f32 %v8738_v34, %v8703_v61 }
 0x810   :  { %v7263_v35 = vmul.f32 0.001953125, %v7260_v25 }
 0x812   :  { %v7265_v53 = vsub.f32 %v7263_v35, %v7264_v40  ;;  %v15102_v40 = vld [vmem:[#allocation90_spill] sm:$0xff] }
 0x814   :  { %v7266_v46 = vadd.f32 32.0, %v7265_v53  ;;  %v15103_v53 = vld [vmem:[#allocation93_spill] sm:$0xff] }
 0x816   :  { %10416 = vrsqrt.f32 %v7266_v46  ;;  %v15104_v46 = vld [vmem:[#allocation91_spill] sm:$0xff] }
 0x820   :  { %v10417_v5 = vpop.eup %10416 }
 0x821   :  { %v7268_v60 = vmul.f32 %v10417_v5, %v6916_v42  ;;  %v15105_v42 = vld [vmem:[#allocation92_spill] sm:$0xff] }
 0x823   :  { %v7269_v27 = vmul.f32 %v7268_v60, %v7058_v33  ;;  %v13560_v56 = vrot.slane %v7268_v60, %v15100_v19  ;;  %v15101_v33 = vld [vmem:[#allocation89_spill] sm:$0xff] }
 0x825   :  { %v7270_v34 = vsub.f32 %v6917_v21, %v7269_v27  ;;  %v13564_v7 = vmul.f32 %v13167_v39, %v13560_v56  ;;  %v13568_v4 = vmul.f32 %v13173_v57, %v13560_v56  ;;  %v13572_v3 = vmul.f32 %v13164_v8, %v13560_v56  ;;  %v15106_v27 = vld [vmem:[#allocation53_spill] sm:$0xff] }
 0x826   :  { %v13576_v61 = vmul.f32 %v13170_v55, %v13560_v56  ;;  %v13580_v6 = vmul.f32 %v13179_v2, %v13560_v56  ;;  %v13584_v39 = vmul.f32 %v13185_v43, %v13560_v56  ;;  %v13588_v57 = vmul.f32 %v13176_v63, %v13560_v56 }
 0x827   :  { %v13591_v48 = vrot.slane %v7270_v34, %v15100_v19  ;;  %v13595_v8 = vmul.f32 %v13182_v37, %v13560_v56  ;;  %v13599_v55 = vmul.f32 %v13191_v49, %v13560_v56  ;;  %v13603_v2 = vmul.f32 %v13197_v62, %v13560_v56  ;;  %v15107_v19 = vld [vmem:[#allocation48_spill] sm:$0xff]  ;;  %v15108_v34 = vld [vmem:[#allocation54_spill] sm:$0xff] }
 0x828   :  { %v13607_v43 = vmul.f32 %v13188_v1, %v13560_v56  ;;  %v13611_v63 = vmul.f32 %v13194_v11, %v13560_v56  ;;  %v13615_v37 = vmul.f32 %v13203_v51, %v13560_v56  ;;  %v13619_v49 = vmul.f32 %v13209_v22, %v13560_v56 }
 0x829   :  { %v13623_v62 = vmul.f32 %v15088_v44, %v13560_v56  ;;  %v13627_v1 = vmul.f32 %v13206_v41, %v13560_v56  ;;  %v13631_v11 = vmul.f32 %v13215_v58, %v13560_v56  ;;  %v13635_v51 = vmul.f32 %v15101_v33, %v13560_v56  ;;  %v15109_v33 = vld [vmem:[#allocation51_spill] sm:$0xff] }
 0x82a   :  { %v13639_v22 = vmul.f32 %v13212_v26, %v13560_v56  ;;  %v13643_v44 = vmul.f32 %v13218_v17, %v13560_v56  ;;  %v13647_v41 = vmul.f32 %v13233_v14, %v13560_v56  ;;  %v13651_v58 = vmul.f32 %v13241_v9, %v13560_v56 }
 0x82b   :  { %v13655_v25 = vmul.f32 %v13230_v23, %v13560_v56  ;;  %v13659_v26 = vmul.f32 %v15102_v40, %v13560_v56  ;;  %v13663_v17 = vmul.f32 %v13253_v54, %v13560_v56  ;;  %v13667_v14 = vmul.f32 %v13261_v52, %v13560_v56  ;;  %v15111_v40 = vld [vmem:[#allocation76_spill] sm:$0xff] }
 0x82c   :  { %v13671_v9 = vmul.f32 %v13250_v45, %v13560_v56  ;;  %v13675_v23 = vmul.f32 %v13258_v20, %v13560_v56  ;;  %v13679_v35 = vmul.f32 %v13273_v30, %v13560_v56  ;;  %v13683_v54 = vmul.f32 %v15103_v53, %v13560_v56  ;;  %v15113_v53 = vld [vmem:[#allocation78_spill] sm:$0xff] }
 0x82d   :  { %v13687_v52 = vmul.f32 %v15104_v46, %v13560_v56  ;;  %v13691_v45 = vmul.f32 %v15105_v42, %v13560_v56  ;;  %v13695_v20 = vmul.f32 %v15091_v0, %v13560_v56  ;;  %v13699_v30 = vmul.f32 %v15090_v38, %v13560_v56  ;;  %v15115_v42 = vld [vmem:[#allocation75_spill] sm:$0xff] }
 0x82e   :  { %v13703_v5 = vmul.f32 %v15092_v10, %v13560_v56  ;;  %v13707_v60 = vmul.f32 %v13298_v50, %v13560_v56  ;;  %v13711_v21 = vmul.f32 %v15095_v32, %v13560_v56  ;;  %v13715_v0 = vmul.f32 %v15094_v29, %v13560_v56 }
 0x82f   :  { %v13719_v38 = vmul.f32 %v15096_v47, %v13560_v56  ;;  %v13723_v10 = vmul.f32 %v13311_v18, %v13560_v56  ;;  %v13727_v50 = vmul.f32 %v15099_v16, %v13560_v56  ;;  %v13731_v32 = vmul.f32 %v15098_v24, %v13560_v56 }
 0x830   :  { %v13735_v29 = vmul.f32 %v13317_v31, %v13560_v56  ;;  %v13739_v47 = vmul.f32 %v13323_v28, %v13560_v56  ;;  %v13743_v18 = vmul.f32 %v13332_v36, %v13560_v56  ;;  %v13747_v16 = vmul.f32 %v13338_v59, %v13560_v56 }
 0x831   :  { %v13751_v24 = vmul.f32 %v13329_v12, %v13560_v56  ;;  %v13755_v31 = vmul.f32 %v13335_v13, %v13560_v56  ;;  %v13759_v28 = vmul.f32 %v15106_v27, %v13560_v56  ;;  %v13763_v36 = vmul.f32 %v15107_v19, %v13560_v56  ;;  %v15117_v19 = vld [vmem:[#allocation77_spill] sm:$0xff] }
 0x832   :  { %v13767_v59 = vmul.f32 %v15108_v34, %v13560_v56  ;;  %v13771_v12 = vmul.f32 %v15109_v33, %v13560_v56  ;;  %v13775_v13 = vmul.f32 %v15111_v40, %v13560_v56  ;;  %v13779_v46 = vmul.f32 %v15113_v53, %v13560_v56 }
 0x833   :  { %v13783_v27 = vmul.f32 %v15115_v42, %v13560_v56  ;;  %v13787_v34 = vmul.f32 %v15117_v19, %v13560_v56  ;;  %v13791_v33 = vmul.f32 %v15097_v15, %v13560_v56 }
 0x834   :  { %15110 = vst [vmem:[#allocation87_spill] sm:$0xff] %v13771_v12  ;;  %15112 = vst [vmem:[#allocation88_spill] sm:$0xff] %v13775_v13  ;;  %v15120_v12 = vld [vmem:[#allocation82_spill] sm:$0xff]  ;;  %v15122_v13 = vld [vmem:[#allocation79_spill] sm:$0xff] }
 0x835   :  { %15114 = vst [vmem:[#allocation96_spill] sm:$0xff] %v13779_v46  ;;  %15116 = vst [vmem:[#allocation95_spill] sm:$0xff] %v13783_v27  ;;  %v13795_v40 = vmul.f32 %v15120_v12, %v13560_v56  ;;  %v13799_v53 = vmul.f32 %v15122_v13, %v13560_v56  ;;  %v15123_v46 = vld [vmem:[#allocation81_spill] sm:$0xff]  ;;  %v15124_v27 = vld [vmem:[#allocation84_spill] sm:$0xff] }
 0x836   :  { %15118 = vst [vmem:[#allocation94_spill] sm:$0xff] %v13787_v34  ;;  %15119 = vst [vmem:[#allocation99_spill] sm:$0xff] %v13791_v33  ;;  %v13803_v42 = vmul.f32 %v15123_v46, %v13560_v56  ;;  %v13807_v19 = vmul.f32 %v15124_v27, %v13560_v56  ;;  %v15125_v34 = vld [vmem:[#allocation86_spill] sm:$0xff]  ;;  %v15126_v33 = vld [vmem:[#allocation83_spill] sm:$0xff]  ;;  %v13823_v46 = vadd.f32 %v13591_v48, %v13564_v7 }
 0x837   :  { %15121 = vst [vmem:[#allocation98_spill] sm:$0xff] %v13795_v40  ;;  %v13811_v15 = vmul.f32 %v15125_v34, %v13560_v56  ;;  %v13815_v12 = vmul.f32 %v15126_v33, %v13560_v56  ;;  %v15127_v40 = vld [vmem:[#allocation85_spill] sm:$0xff]  ;;  %v13827_v27 = vadd.f32 %v13591_v48, %v13568_v4  ;;  %v13831_v34 = vadd.f32 %v13591_v48, %v13572_v3 }
 0x838   :  { %v13819_v13 = vmul.f32 %v15127_v40, %v13560_v56  ;;  %v13835_v33 = vadd.f32 %v13591_v48, %v13576_v61  ;;  %v13839_v56 = vadd.f32 %v13591_v48, %v13580_v6  ;;  %v13843_v7 = vadd.f32 %v13591_v48, %v13584_v39 }
 0x839   :  { %v13847_v4 = vadd.f32 %v13591_v48, %v13588_v57  ;;  %v13851_v3 = vadd.f32 %v13591_v48, %v13595_v8  ;;  %v13855_v61 = vadd.f32 %v13591_v48, %v13599_v55  ;;  %v13859_v6 = vadd.f32 %v13591_v48, %v13603_v2 }
 0x83a   :  { %v13863_v39 = vadd.f32 %v13591_v48, %v13607_v43  ;;  %v13867_v57 = vadd.f32 %v13591_v48, %v13611_v63  ;;  %v13871_v8 = vadd.f32 %v13591_v48, %v13615_v37  ;;  %v13875_v55 = vadd.f32 %v13591_v48, %v13619_v49 }
 0x83b   :  { %v13879_v2 = vadd.f32 %v13591_v48, %v13623_v62  ;;  %v13883_v43 = vadd.f32 %v13591_v48, %v13627_v1  ;;  %v13887_v63 = vadd.f32 %v13591_v48, %v13631_v11  ;;  %v13891_v37 = vadd.f32 %v13591_v48, %v13635_v51  ;;  %v15138_v40 = vld [vmem:[#allocation87_spill] sm:$0xff] }
 0x83c   :  { %v13895_v49 = vadd.f32 %v13591_v48, %v13639_v22  ;;  %v13899_v62 = vadd.f32 %v13591_v48, %v13643_v44  ;;  %v13903_v1 = vadd.f32 %v13591_v48, %v13647_v41  ;;  %v13907_v11 = vadd.f32 %v13591_v48, %v13651_v58 }
 0x83d   :  { %v13911_v51 = vadd.f32 %v13591_v48, %v13655_v25  ;;  %v13915_v22 = vadd.f32 %v13591_v48, %v13659_v26  ;;  %v13919_v44 = vadd.f32 %v13591_v48, %v13663_v17  ;;  %v13923_v41 = vadd.f32 %v13591_v48, %v13667_v14 }
 0x83e   :  { %v13927_v58 = vadd.f32 %v13591_v48, %v13671_v9  ;;  %v13931_v25 = vadd.f32 %v13591_v48, %v13675_v23  ;;  %v13935_v26 = vadd.f32 %v13591_v48, %v13679_v35  ;;  %v13939_v17 = vadd.f32 %v13591_v48, %v13683_v54 }
 0x83f   :  { %v13943_v14 = vadd.f32 %v13591_v48, %v13687_v52  ;;  %v13947_v9 = vadd.f32 %v13591_v48, %v13691_v45  ;;  %v13951_v23 = vadd.f32 %v13591_v48, %v13695_v20  ;;  %v13955_v35 = vadd.f32 %v13591_v48, %v13699_v30 }
 0x840   :  { %v13959_v54 = vadd.f32 %v13591_v48, %v13703_v5  ;;  %v13963_v52 = vadd.f32 %v13591_v48, %v13707_v60  ;;  %v13967_v45 = vadd.f32 %v13591_v48, %v13711_v21  ;;  %v13971_v20 = vadd.f32 %v13591_v48, %v13715_v0 }
 0x841   :  { %v13975_v30 = vadd.f32 %v13591_v48, %v13719_v38  ;;  %v13979_v5 = vadd.f32 %v13591_v48, %v13723_v10  ;;  %v13983_v60 = vadd.f32 %v13591_v48, %v13727_v50  ;;  %v13987_v21 = vadd.f32 %v13591_v48, %v13731_v32 }
 0x842   :  { %15128 = vst [vmem:[#allocation97_spill] sm:$0xff] %v13967_v45  ;;  %15129 = vst [vmem:[#allocation80_spill] sm:$0xff] %v13971_v20  ;;  %v13991_v0 = vadd.f32 %v13591_v48, %v13735_v29  ;;  %v13995_v38 = vadd.f32 %v13591_v48, %v13739_v47  ;;  %v13999_v10 = vadd.f32 %v13591_v48, %v13743_v18  ;;  %v15172_v45 = vld [vmem:[#allocation57_spill] sm:$0xff] }
 0x843   :  { %15130 = vst [vmem:[#allocation101_spill] sm:$0xff] %v13975_v30  ;;  %15131 = vst [vmem:[#allocation100_spill] sm:$0xff] %v13979_v5  ;;  %v14003_v50 = vadd.f32 %v13591_v48, %v13747_v16  ;;  %v14007_v32 = vadd.f32 %v13591_v48, %v13751_v24  ;;  %v14011_v29 = vadd.f32 %v13591_v48, %v13755_v31 }
 0x844   :  { %15132 = vst [vmem:[#allocation47_spill] sm:$0xff] %v13983_v60  ;;  %v14015_v47 = vadd.f32 %v13591_v48, %v13759_v28  ;;  %v14019_v18 = vadd.f32 %v13591_v48, %v13763_v36  ;;  %v14023_v16 = vadd.f32 %v13591_v48, %v13767_v59  ;;  %v14027_v24 = vadd.f32 %v13591_v48, %v15138_v40 }
 0x845   :  { %15133 = vst [vmem:[#allocation89_spill] sm:$0xff] %v14007_v32  ;;  %15134 = vst [vmem:[#allocation90_spill] sm:$0xff] %v14011_v29  ;;  %v15140_v32 = vld [vmem:[#allocation88_spill] sm:$0xff] }
 0x846   :  { %15135 = vst [vmem:[#allocation93_spill] sm:$0xff] %v14015_v47  ;;  %15136 = vst [vmem:[#allocation91_spill] sm:$0xff] %v14019_v18  ;;  %v14031_v31 = vadd.f32 %v13591_v48, %v15140_v32  ;;  %v15141_v29 = vld [vmem:[#allocation96_spill] sm:$0xff]  ;;  %v15143_v47 = vld [vmem:[#allocation95_spill] sm:$0xff] }
 0x847   :  { %15137 = vst [vmem:[#allocation92_spill] sm:$0xff] %v14023_v16  ;;  %15139 = vst [vmem:[#allocation53_spill] sm:$0xff] %v14027_v24  ;;  %v14035_v28 = vadd.f32 %v13591_v48, %v15141_v29  ;;  %v14039_v36 = vadd.f32 %v13591_v48, %v15143_v47  ;;  %v15144_v18 = vld [vmem:[#allocation94_spill] sm:$0xff]  ;;  %v15146_v16 = vld [vmem:[#allocation99_spill] sm:$0xff]  ;;  %v14055_v29 = vadd.f32 %v13591_v48, %v13799_v53 }
 0x848   :  { %v14043_v59 = vadd.f32 %v13591_v48, %v15144_v18  ;;  %v14047_v40 = vadd.f32 %v13591_v48, %v15146_v16  ;;  %v15148_v24 = vld [vmem:[#allocation98_spill] sm:$0xff]  ;;  %v14059_v47 = vadd.f32 %v13591_v48, %v13803_v42  ;;  %v14063_v18 = vadd.f32 %v13591_v48, %v13807_v19  ;;  %v15175_v42 = vld [vmem:[#allocation56_spill] sm:$0xff] }
 0x849   :  { %15142 = vst [vmem:[#allocation48_spill] sm:$0xff] %v14035_v28  ;;  %v14051_v32 = vadd.f32 %v13591_v48, %v15148_v24  ;;  %15149 = vst [vmem:[#allocation76_spill] sm:$0xff] %v14055_v29  ;;  %v14067_v16 = vadd.f32 %v13591_v48, %v13811_v15  ;;  %v14071_v24 = vadd.f32 %v13591_v48, %v13815_v12  ;;  %v15166_v28 = vld [vmem:[#allocation50_spill] sm:$0xff]  ;;  %v15168_v15 = vmax.f32 %v13823_v46, 0.0 }
 0x84a   :  { %15145 = vst [vmem:[#allocation54_spill] sm:$0xff] %v14043_v59  ;;  %15147 = vst [vmem:[#allocation51_spill] sm:$0xff] %v14047_v40  ;;  %v14075_v53 = vadd.f32 %v13591_v48, %v13819_v13  ;;  %v15162_v20 = vmov %v14059_v47  ;;  %v15171_v12 = vmax.f32 %v13827_v27, 0.0  ;;  %v15173_v48 = vmax.f32 %v15172_v45, 0.0 }
 0x84b   :  { %15150 = vst [vmem:[#allocation78_spill] sm:$0xff] %v14059_v47  ;;  %15151 = vst [vmem:[#allocation75_spill] sm:$0xff] %v14063_v18  ;;  %v15165_v60 = vmov %v14071_v24  ;;  %v15167_v18 = vmax.f32 %v15166_v28, 0.0  ;;  %v15174_v13 = vmax.f32 %v13831_v34, 0.0  ;;  %v15176_v5 = vmax.f32 %v15175_v42, 0.0 }
 0x84c   :  { %15152 = vst [vmem:[#allocation77_spill] sm:$0xff] %v14067_v16  ;;  %15153 = vst [vmem:[#allocation82_spill] sm:$0xff] %v14071_v24  ;;  %v15155_v29 = vld [vmem:[#allocation89_spill] sm:$0xff]  ;;  %v15169_v16 = vld [vmem:[#allocation58_spill] sm:$0xff]  ;;  %v15177_v47 = vmax.f32 %v13835_v33, 0.0  ;;  %v15180_v46 = vmax.f32 %v13839_v56, 0.0 }
 0x84d   :  { %15154 = vst [vmem:[#allocation79_spill] sm:$0xff] %v14075_v53  ;;  %v7471_v59 = vadd.f32 %v15168_v15, %v15167_v18  ;;  %v15170_v40 = vmax.f32 %v15169_v16, 0.0  ;;  %v7473_v30 = vadd.f32 %v15174_v13, %v15173_v48  ;;  %v15178_v53 = vld [vmem:[#allocation55_spill] sm:$0xff]  ;;  %v15183_v27 = vmax.f32 %v13843_v7, 0.0  ;;  %v15187_v13 = vld [vmem:[#allocation6_spill] sm:$0xff] }
 0x84e   :  { %v7474_v19 = vadd.f32 %v15177_v47, %v15176_v5  ;;  %v15179_v28 = vmax.f32 %v15178_v53, 0.0  ;;  %v15181_v15 = vld [vmem:[#allocation7_spill] sm:$0xff]  ;;  %v15186_v34 = vmax.f32 %v13847_v4, 0.0  ;;  %v15188_v42 = vmax.f32 %v15187_v13, 0.0  ;;  %v15190_v47 = vld [vmem:[#allocation8_spill] sm:$0xff]  ;;  %v15196_v4 = vld [vmem:[#allocation13_spill] sm:$0xff] }
 0x84f   :  { %v7472_v24 = vadd.f32 %v15171_v12, %v15170_v40  ;;  %v15182_v16 = vmax.f32 %v15181_v15, 0.0  ;;  %v15184_v12 = vld [vmem:[#allocation9_spill] sm:$0xff]  ;;  %v15189_v33 = vmax.f32 %v13851_v3, 0.0  ;;  %v15191_v53 = vmax.f32 %v15190_v47, 0.0  ;;  %7535 = vst.msk [vmem:[#allocation3] sm:$0xff] %vm336_vm0, %v7471_v59  ;;  %7537 = vst.msk [vmem:[#allocation3 + $0x10] sm:$0xff] %vm336_vm0, %v7473_v30 }
 0x850   :  { %v7475_v18 = vadd.f32 %v15180_v46, %v15179_v28  ;;  %v15185_v45 = vmax.f32 %v15184_v12, 0.0  ;;  %v15192_v56 = vmax.f32 %v13855_v61, 0.0  ;;  %v15193_v46 = vld [vmem:[#allocation11_spill] sm:$0xff]  ;;  %v15195_v7 = vmax.f32 %v13859_v6, 0.0  ;;  %7538 = vst.msk [vmem:[#allocation3 + $0x18] sm:$0xff] %vm336_vm0, %v7474_v19 }
 0x851   :  { %v7476_v40 = vadd.f32 %v15183_v27, %v15182_v16  ;;  %v7478_v5 = vadd.f32 %v15189_v33, %v15188_v42  ;;  %v15194_v15 = vmax.f32 %v15193_v46, 0.0  ;;  %7536 = vst.msk [vmem:[#allocation3 + $0x8] sm:$0xff] %vm336_vm0, %v7472_v24  ;;  %v15197_v27 = vmax.f32 %v15196_v4, 0.0  ;;  %v15202_v42 = vld [vmem:[#allocation12_spill] sm:$0xff]  ;;  %v15217_v19 = vld [vmem:[#allocation19_spill] sm:$0xff] }
 0x852   :  { %v7477_v48 = vadd.f32 %v15186_v34, %v15185_v45  ;;  %v7479_v28 = vadd.f32 %v15192_v56, %v15191_v53  ;;  %v15198_v12 = vmax.f32 %v13863_v39, 0.0  ;;  %v15199_v45 = vld [vmem:[#allocation10_spill] sm:$0xff]  ;;  %v15201_v13 = vmax.f32 %v13867_v57, 0.0  ;;  %v15205_v53 = vld [vmem:[#allocation15_spill] sm:$0xff]  ;;  %7539 = vst.msk [vmem:[#allocation3 + $0x20] sm:$0xff] %vm336_vm0, %v7475_v18  ;;  %v15208_v39 = vld [vmem:[#allocation17_spill] sm:$0xff] }
 0x853   :  { %v7480_v16 = vadd.f32 %v15195_v7, %v15194_v15  ;;  %v15200_v34 = vmax.f32 %v15199_v45, 0.0  ;;  %v15203_v33 = vmax.f32 %v15202_v42, 0.0  ;;  %v15204_v47 = vmax.f32 %v13871_v8, 0.0  ;;  %7540 = vst.msk [vmem:[#allocation3 + $0x28] sm:$0xff] %vm336_vm0, %v7476_v40  ;;  %v15211_v8 = vld [vmem:[#allocation14_spill] sm:$0xff]  ;;  %7542 = vst.msk [vmem:[#allocation3 + $0x38] sm:$0xff] %vm336_vm0, %v7478_v5 }
 0x854   :  { %v7481_v3 = vadd.f32 %v15198_v12, %v15197_v27  ;;  %v15206_v56 = vmax.f32 %v15205_v53, 0.0  ;;  %v15207_v59 = vmax.f32 %v13875_v55, 0.0  ;;  %v15209_v57 = vmax.f32 %v15208_v39, 0.0  ;;  %v15214_v55 = vld [vmem:[#allocation16_spill] sm:$0xff]  ;;  %7541 = vst.msk [vmem:[#allocation3 + $0x30] sm:$0xff] %vm336_vm0, %v7477_v48  ;;  %7543 = vst.msk [vmem:[#allocation3 + $0x40] sm:$0xff] %vm336_vm0, %v7479_v28 }
 0x855   :  { %v7482_v61 = vadd.f32 %v15201_v13, %v15200_v34  ;;  %v7483_v6 = vadd.f32 %v15204_v47, %v15203_v33  ;;  %v15210_v46 = vmax.f32 %v13879_v2, 0.0  ;;  %v15212_v7 = vmax.f32 %v15211_v8, 0.0  ;;  %7544 = vst.msk [vmem:[#allocation3 + $0x48] sm:$0xff] %vm336_vm0, %v7480_v16  ;;  %v15220_v2 = vld [vmem:[#allocation21_spill] sm:$0xff]  ;;  %v15229_v5 = vld [vmem:[#allocation23_spill] sm:$0xff] }
 0x856   :  { %v7484_v24 = vadd.f32 %v15207_v59, %v15206_v56  ;;  %v15213_v4 = vmax.f32 %v13883_v43, 0.0  ;;  %v15215_v12 = vmax.f32 %v15214_v55, 0.0  ;;  %v15216_v30 = vmax.f32 %v13887_v63, 0.0  ;;  %v15223_v63 = vld [vmem:[#allocation18_spill] sm:$0xff]  ;;  %7545 = vst.msk [vmem:[#allocation3 + $0x50] sm:$0xff] %vm336_vm0, %v7481_v3 }
 0x857   :  { %v7485_v15 = vadd.f32 %v15210_v46, %v15209_v57  ;;  %v15218_v34 = vmax.f32 %v15217_v19, 0.0  ;;  %v15219_v18 = vmax.f32 %v13891_v37, 0.0  ;;  %v15221_v43 = vmax.f32 %v15220_v2, 0.0  ;;  %v15226_v37 = vld [vmem:[#allocation20_spill] sm:$0xff]  ;;  %7546 = vst.msk [vmem:[#allocation3 + $0x58] sm:$0xff] %vm336_vm0, %v7482_v61  ;;  %7547 = vst.msk [vmem:[#allocation3 + $0x60] sm:$0xff] %vm336_vm0, %v7483_v6 }
 0x858   :  { %v7486_v27 = vadd.f32 %v15213_v4, %v15212_v7  ;;  %v7487_v45 = vadd.f32 %v15216_v30, %v15215_v12  ;;  %v15222_v13 = vmax.f32 %v13895_v49, 0.0  ;;  %v15224_v33 = vmax.f32 %v15223_v63, 0.0  ;;  %7548 = vst.msk [vmem:[#allocation3 + $0x68] sm:$0xff] %vm336_vm0, %v7484_v24  ;;  %v15232_v49 = vld [vmem:[#allocation25_spill] sm:$0xff]  ;;  %v15241_v61 = vld [vmem:[#allocation27_spill] sm:$0xff] }
 0x859   :  { %v7488_v40 = vadd.f32 %v15219_v18, %v15218_v34  ;;  %v15225_v47 = vmax.f32 %v13899_v62, 0.0  ;;  %v15227_v56 = vmax.f32 %v15226_v37, 0.0  ;;  %v15228_v48 = vmax.f32 %v13903_v1, 0.0  ;;  %v15235_v1 = vld [vmem:[#allocation22_spill] sm:$0xff]  ;;  %7549 = vst.msk [vmem:[#allocation3 + $0x70] sm:$0xff] %vm336_vm0, %v7485_v15 }
 0x85a   :  { %v7489_v42 = vadd.f32 %v15222_v13, %v15221_v43  ;;  %v15230_v39 = vmax.f32 %v15229_v5, 0.0  ;;  %v15231_v28 = vmax.f32 %v13907_v11, 0.0  ;;  %v15233_v62 = vmax.f32 %v15232_v49, 0.0  ;;  %v15238_v11 = vld [vmem:[#allocation24_spill] sm:$0xff]  ;;  %7550 = vst.msk [vmem:[#allocation3 + $0x78] sm:$0xff] %vm336_vm0, %v7486_v27  ;;  %7551 = vst.msk [vmem:[#allocation3 + $0x80] sm:$0xff] %vm336_vm0, %v7487_v45 }
 0x85b   :  { %v7490_v53 = vadd.f32 %v15225_v47, %v15224_v33  ;;  %v7491_v59 = vadd.f32 %v15228_v48, %v15227_v56  ;;  %v15234_v57 = vmax.f32 %v13911_v51, 0.0  ;;  %v15236_v8 = vmax.f32 %v15235_v1, 0.0  ;;  %7552 = vst.msk [vmem:[#allocation3 + $0x88] sm:$0xff] %vm336_vm0, %v7488_v40  ;;  %v15244_v51 = vld [vmem:[#allocation29_spill] sm:$0xff]  ;;  %v15253_v27 = vld [vmem:[#allocation31_spill] sm:$0xff] }
 0x85c   :  { %v7492_v16 = vadd.f32 %v15231_v28, %v15230_v39  ;;  %v15237_v7 = vmax.f32 %v13915_v22, 0.0  ;;  %v15239_v55 = vmax.f32 %v15238_v11, 0.0  ;;  %v15240_v3 = vmax.f32 %v13919_v44, 0.0  ;;  %v15247_v44 = vld [vmem:[#allocation26_spill] sm:$0xff]  ;;  %7553 = vst.msk [vmem:[#allocation3 + $0x90] sm:$0xff] %vm336_vm0, %v7489_v42 }
 0x85d   :  { %v7493_v46 = vadd.f32 %v15234_v57, %v15233_v62  ;;  %v15242_v30 = vmax.f32 %v15241_v61, 0.0  ;;  %v15243_v6 = vmax.f32 %v13923_v41, 0.0  ;;  %v15245_v22 = vmax.f32 %v15244_v51, 0.0  ;;  %v15250_v41 = vld [vmem:[#allocation28_spill] sm:$0xff]  ;;  %7554 = vst.msk [vmem:[#allocation3 + $0x98] sm:$0xff] %vm336_vm0, %v7490_v53  ;;  %7555 = vst.msk [vmem:[#allocation3 + $0xa0] sm:$0xff] %vm336_vm0, %v7491_v59 }
 0x85e   :  { %v7494_v4 = vadd.f32 %v15237_v7, %v15236_v8  ;;  %v7495_v12 = vadd.f32 %v15240_v3, %v15239_v55  ;;  %v15246_v19 = vmax.f32 %v13927_v58, 0.0  ;;  %v15248_v18 = vmax.f32 %v15247_v44, 0.0  ;;  %7556 = vst.msk [vmem:[#allocation3 + $0xa8] sm:$0xff] %vm336_vm0, %v7492_v16  ;;  %v15256_v58 = vld [vmem:[#allocation33_spill] sm:$0xff]  ;;  %v15265_v53 = vld [vmem:[#allocation35_spill] sm:$0xff] }
 0x85f   :  { %v7496_v24 = vadd.f32 %v15243_v6, %v15242_v30  ;;  %v15249_v2 = vmax.f32 %v13931_v25, 0.0  ;;  %v15251_v13 = vmax.f32 %v15250_v41, 0.0  ;;  %v15252_v15 = vmax.f32 %v13935_v26, 0.0  ;;  %v15259_v26 = vld [vmem:[#allocation30_spill] sm:$0xff]  ;;  %7557 = vst.msk [vmem:[#allocation3 + $0xb0] sm:$0xff] %vm336_vm0, %v7493_v46  ;;  %v15276_v55 = vld [vmem:[#allocation97_spill] sm:$0xff] }
 0x860   :  { %v7497_v34 = vadd.f32 %v15246_v19, %v15245_v22  ;;  %v15254_v33 = vmax.f32 %v15253_v27, 0.0  ;;  %v15255_v45 = vmax.f32 %v13939_v17, 0.0  ;;  %v15257_v25 = vmax.f32 %v15256_v58, 0.0  ;;  %v15262_v17 = vld [vmem:[#allocation32_spill] sm:$0xff]  ;;  %7558 = vst.msk [vmem:[#allocation3 + $0xb8] sm:$0xff] %vm336_vm0, %v7494_v4  ;;  %7559 = vst.msk [vmem:[#allocation3 + $0xc0] sm:$0xff] %vm336_vm0, %v7495_v12 }
 0x861   :  { %v7498_v43 = vadd.f32 %v15249_v2, %v15248_v18  ;;  %v7499_v63 = vadd.f32 %v15252_v15, %v15251_v13  ;;  %v15258_v47 = vmax.f32 %v13943_v14, 0.0  ;;  %v15260_v56 = vmax.f32 %v15259_v26, 0.0  ;;  %7560 = vst.msk [vmem:[#allocation3 + $0xc8] sm:$0xff] %vm336_vm0, %v7496_v24  ;;  %v15268_v14 = vld [vmem:[#allocation37_spill] sm:$0xff]  ;;  %v15278_v4 = vld [vmem:[#allocation39_spill] sm:$0xff]  ;;  %v15280_v12 = vld [vmem:[#allocation80_spill] sm:$0xff] }
 0x862   :  { %v7500_v40 = vadd.f32 %v15255_v45, %v15254_v33  ;;  %v15261_v48 = vmax.f32 %v13947_v9, 0.0  ;;  %v15263_v39 = vmax.f32 %v15262_v17, 0.0  ;;  %v15264_v42 = vmax.f32 %v13951_v23, 0.0  ;;  %v15271_v23 = vld [vmem:[#allocation34_spill] sm:$0xff]  ;;  %7561 = vst.msk [vmem:[#allocation3 + $0xd0] sm:$0xff] %vm336_vm0, %v7497_v34  ;;  %v15284_v24 = vld [vmem:[#allocation101_spill] sm:$0xff] }
 0x863   :  { %v7501_v37 = vadd.f32 %v15258_v47, %v15257_v25  ;;  %v15266_v49 = vmax.f32 %v15265_v53, 0.0  ;;  %v15267_v59 = vmax.f32 %v13955_v35, 0.0  ;;  %v15269_v9 = vmax.f32 %v15268_v14, 0.0  ;;  %v15274_v35 = vld [vmem:[#allocation36_spill] sm:$0xff]  ;;  %7562 = vst.msk [vmem:[#allocation3 + $0xd8] sm:$0xff] %vm336_vm0, %v7498_v43  ;;  %7563 = vst.msk [vmem:[#allocation3 + $0xe0] sm:$0xff] %vm336_vm0, %v7499_v63 }
 0x864   :  { %v7502_v5 = vadd.f32 %v15261_v48, %v15260_v56  ;;  %v7503_v28 = vadd.f32 %v15264_v42, %v15263_v39  ;;  %v15270_v62 = vmax.f32 %v13959_v54, 0.0  ;;  %v15272_v1 = vmax.f32 %v15271_v23, 0.0  ;;  %7564 = vst.msk [vmem:[#allocation3 + $0xe8] sm:$0xff] %vm336_vm0, %v7500_v40  ;;  %v15282_v54 = vld [vmem:[#allocation41_spill] sm:$0xff]  ;;  %v15286_v19 = vld [vmem:[#allocation38_spill] sm:$0xff]  ;;  %v15288_v18 = vld [vmem:[#allocation100_spill] sm:$0xff] }
 0x865   :  { %v7504_v16 = vadd.f32 %v15267_v59, %v15266_v49  ;;  %v15273_v8 = vmax.f32 %v13963_v52, 0.0  ;;  %v15275_v11 = vmax.f32 %v15274_v35, 0.0  ;;  %v15277_v46 = vmax.f32 %v15276_v55, 0.0  ;;  %v15290_v13 = vld [vmem:[#allocation40_spill] sm:$0xff]  ;;  %v15292_v27 = vld [vmem:[#allocation47_spill] sm:$0xff]  ;;  %v15294_v43 = vld [vmem:[#allocation42_spill] sm:$0xff] }
 0x866   :  { %v7505_v57 = vadd.f32 %v15270_v62, %v15269_v9  ;;  %v15279_v61 = vmax.f32 %v15278_v4, 0.0  ;;  %v15281_v30 = vmax.f32 %v15280_v12, 0.0  ;;  %v15283_v52 = vmax.f32 %v15282_v54, 0.0  ;;  %7565 = vst.msk [vmem:[#allocation3 + $0xf0] sm:$0xff] %vm336_vm0, %v7501_v37  ;;  %7566 = vst.msk [vmem:[#allocation3 + $0xf8] sm:$0xff] %vm336_vm0, %v7502_v5  ;;  %v15297_v58 = vld [vmem:[#allocation46_spill] sm:$0xff] }
 0x867   :  { %v7506_v7 = vadd.f32 %v15273_v8, %v15272_v1  ;;  %v7507_v3 = vadd.f32 %v15277_v46, %v15275_v11  ;;  %v15285_v51 = vmax.f32 %v15284_v24, 0.0  ;;  %v15287_v44 = vmax.f32 %v15286_v19, 0.0  ;;  %7567 = vst.msk [vmem:[#allocation3 + $0x100] sm:$0xff] %vm336_vm0, %v7503_v28  ;;  %7568 = vst.msk [vmem:[#allocation3 + $0x108] sm:$0xff] %vm336_vm0, %v7504_v16  ;;  %v15300_v56 = vld [vmem:[#allocation43_spill] sm:$0xff]  ;;  %v15306_v5 = vld [vmem:[#allocation52_spill] sm:$0xff] }
 0x868   :  { %v7508_v6 = vadd.f32 %v15281_v30, %v15279_v61  ;;  %v15289_v2 = vmax.f32 %v15288_v18, 0.0  ;;  %v15291_v15 = vmax.f32 %v15290_v13, 0.0  ;;  %v15293_v34 = vmax.f32 %v15292_v27, 0.0  ;;  %7569 = vst.msk [vmem:[#allocation3 + $0x110] sm:$0xff] %vm336_vm0, %v7505_v57  ;;  %v15314_v62 = vld [vmem:[#allocation90_spill] sm:$0xff]  ;;  %v15318_v35 = vld [vmem:[#allocation93_spill] sm:$0xff] }
 0x869   :  { %v7509_v22 = vadd.f32 %v15285_v51, %v15283_v52  ;;  %v15295_v45 = vmax.f32 %v15294_v43, 0.0  ;;  %v15296_v63 = vmax.f32 %v13987_v21, 0.0  ;;  %v15298_v25 = vmax.f32 %v15297_v58, 0.0  ;;  %v15303_v21 = vld [vmem:[#allocation49_spill] sm:$0xff]  ;;  %7570 = vst.msk [vmem:[#allocation3 + $0x118] sm:$0xff] %vm336_vm0, %v7506_v7  ;;  %7571 = vst.msk [vmem:[#allocation3 + $0x120] sm:$0xff] %vm336_vm0, %v7507_v3 }
 0x86a   :  { %v7510_v41 = vadd.f32 %v15289_v2, %v15287_v44  ;;  %v7511_v33 = vadd.f32 %v15293_v34, %v15291_v15  ;;  %v15299_v47 = vmax.f32 %v13991_v0, 0.0  ;;  %v15301_v48 = vmax.f32 %v15300_v56, 0.0  ;;  %7572 = vst.msk [vmem:[#allocation3 + $0x128] sm:$0xff] %vm336_vm0, %v7508_v6  ;;  %v15309_v0 = vld [vmem:[#allocation60_spill] sm:$0xff]  ;;  %v15320_v7 = vld [vmem:[#allocation61_spill] sm:$0xff]  ;;  %v15322_v46 = vld [vmem:[#allocation91_spill] sm:$0xff] }
 0x86b   :  { %v7512_v40 = vadd.f32 %v15296_v63, %v15295_v45  ;;  %v15302_v17 = vmax.f32 %v13995_v38, 0.0  ;;  %v15304_v42 = vmax.f32 %v15303_v21, 0.0  ;;  %v15305_v37 = vmax.f32 %v13999_v10, 0.0  ;;  %v15312_v10 = vld [vmem:[#allocation62_spill] sm:$0xff]  ;;  %7573 = vst.msk [vmem:[#allocation3 + $0x130] sm:$0xff] %vm336_vm0, %v7509_v22  ;;  %v15326_v12 = vld [vmem:[#allocation92_spill] sm:$0xff] }
 0x86c   :  { %v7513_v26 = vadd.f32 %v15299_v47, %v15298_v25  ;;  %v15307_v49 = vmax.f32 %v15306_v5, 0.0  ;;  %v15308_v28 = vmax.f32 %v14003_v50, 0.0  ;;  %v15310_v38 = vmax.f32 %v15309_v0, 0.0  ;;  %v15316_v50 = vld [vmem:[#allocation59_spill] sm:$0xff]  ;;  %7574 = vst.msk [vmem:[#allocation3 + $0x138] sm:$0xff] %vm336_vm0, %v7510_v41  ;;  %7575 = vst.msk [vmem:[#allocation3 + $0x140] sm:$0xff] %vm336_vm0, %v7511_v33 }
 0x86d   :  { %v7514_v39 = vadd.f32 %v15302_v17, %v15301_v48  ;;  %v7515_v53 = vadd.f32 %v15305_v37, %v15304_v42  ;;  %v15311_v16 = vmax.f32 %v15155_v29, 0.0  ;;  %v15313_v9 = vmax.f32 %v15312_v10, 0.0  ;;  %7576 = vst.msk [vmem:[#allocation3 + $0x148] sm:$0xff] %vm336_vm0, %v7512_v40  ;;  %v15324_v29 = vld [vmem:[#allocation64_spill] sm:$0xff]  ;;  %v15330_v24 = vld [vmem:[#allocation53_spill] sm:$0xff]  ;;  %v15332_v44 = vld [vmem:[#allocation63_spill] sm:$0xff] }
 0x86e   :  { %v7516_v59 = vadd.f32 %v15308_v28, %v15307_v49  ;;  %v15315_v23 = vmax.f32 %v15314_v62, 0.0  ;;  %v15317_v8 = vmax.f32 %v15316_v50, 0.0  ;;  %v15319_v57 = vmax.f32 %v15318_v35, 0.0  ;;  %v15328_v54 = vld [vmem:[#allocation68_spill] sm:$0xff]  ;;  %v15335_v41 = vld [vmem:[#allocation65_spill] sm:$0xff]  ;;  %7577 = vst.msk [vmem:[#allocation3 + $0x150] sm:$0xff] %vm336_vm0, %v7513_v26 }
 0x86f   :  { %v7517_v14 = vadd.f32 %v15311_v16, %v15310_v38  ;;  %v15321_v55 = vmax.f32 %v15320_v7, 0.0  ;;  %v15323_v3 = vmax.f32 %v15322_v46, 0.0  ;;  %v15325_v61 = vmax.f32 %v15324_v29, 0.0  ;;  %v15337_v15 = vld [vmem:[#allocation48_spill] sm:$0xff]  ;;  %7578 = vst.msk [vmem:[#allocation3 + $0x158] sm:$0xff] %vm336_vm0, %v7514_v39  ;;  %7579 = vst.msk [vmem:[#allocation3 + $0x160] sm:$0xff] %vm336_vm0, %v7515_v53 }
 0x870   :  { %v7518_v1 = vadd.f32 %v15315_v23, %v15313_v9  ;;  %v7519_v11 = vadd.f32 %v15319_v57, %v15317_v8  ;;  %v15327_v30 = vmax.f32 %v15326_v12, 0.0  ;;  %v15329_v52 = vmax.f32 %v15328_v54, 0.0  ;;  %7580 = vst.msk [vmem:[#allocation3 + $0x168] sm:$0xff] %vm336_vm0, %v7516_v59  ;;  %v15339_v33 = vld [vmem:[#allocation70_spill] sm:$0xff]  ;;  %v15342_v63 = vld [vmem:[#allocation72_spill] sm:$0xff]  ;;  %v15346_v56 = vld [vmem:[#allocation69_spill] sm:$0xff] }
 0x871   :  { %v7520_v4 = vadd.f32 %v15323_v3, %v15321_v55  ;;  %v15331_v51 = vmax.f32 %v15330_v24, 0.0  ;;  %v15333_v18 = vmax.f32 %v15332_v44, 0.0  ;;  %v15334_v22 = vmax.f32 %v14031_v31, 0.0  ;;  %v15344_v58 = vld [vmem:[#allocation54_spill] sm:$0xff]  ;;  %v15348_v48 = vld [vmem:[#allocation51_spill] sm:$0xff]  ;;  %7581 = vst.msk [vmem:[#allocation3 + $0x170] sm:$0xff] %vm336_vm0, %v7517_v14 }
 0x872   :  { %v7521_v6 = vadd.f32 %v15327_v30, %v15325_v61  ;;  %v15336_v13 = vmax.f32 %v15335_v41, 0.0  ;;  %v15338_v27 = vmax.f32 %v15337_v15, 0.0  ;;  %v15340_v43 = vmax.f32 %v15339_v33, 0.0  ;;  %v15350_v21 = vld [vmem:[#allocation71_spill] sm:$0xff]  ;;  %7582 = vst.msk [vmem:[#allocation3 + $0x178] sm:$0xff] %vm336_vm0, %v7518_v1  ;;  %7583 = vst.msk [vmem:[#allocation3 + $0x180] sm:$0xff] %vm336_vm0, %v7519_v11 }
 0x873   :  { %v7522_v19 = vadd.f32 %v15331_v51, %v15329_v52  ;;  %v7523_v2 = vadd.f32 %v15334_v22, %v15333_v18  ;;  %v15341_v31 = vmax.f32 %v14039_v36, 0.0  ;;  %v15343_v40 = vmax.f32 %v15342_v63, 0.0  ;;  %7584 = vst.msk [vmem:[#allocation3 + $0x188] sm:$0xff] %vm336_vm0, %v7520_v4  ;;  %v15353_v36 = vld [vmem:[#allocation73_spill] sm:$0xff]  ;;  %v15355_v49 = vld [vmem:[#allocation76_spill] sm:$0xff]  ;;  %v15357_v0 = vld [vmem:[#allocation74_spill] sm:$0xff] }
 0x874   :  { %v7524_v34 = vadd.f32 %v15338_v27, %v15336_v13  ;;  %v15345_v25 = vmax.f32 %v15344_v58, 0.0  ;;  %v15347_v26 = vmax.f32 %v15346_v56, 0.0  ;;  %v15349_v17 = vmax.f32 %v15348_v48, 0.0  ;;  %v15362_v62 = vld [vmem:[#allocation75_spill] sm:$0xff]  ;;  %v15364_v1 = vld [vmem:[#allocation66_spill] sm:$0xff]  ;;  %v15366_v8 = vld [vmem:[#allocation77_spill] sm:$0xff] }
 0x875   :  { %v7525_v45 = vadd.f32 %v15341_v31, %v15340_v43  ;;  %v15351_v42 = vmax.f32 %v15350_v21, 0.0  ;;  %v15352_v37 = vmax.f32 %v14051_v32, 0.0  ;;  %v15354_v5 = vmax.f32 %v15353_v36, 0.0  ;;  %v15360_v32 = vld [vmem:[#allocation67_spill] sm:$0xff]  ;;  %7585 = vst.msk [vmem:[#allocation3 + $0x190] sm:$0xff] %vm336_vm0, %v7521_v6  ;;  %7586 = vst.msk [vmem:[#allocation3 + $0x198] sm:$0xff] %vm336_vm0, %v7522_v19 }
 0x876   :  { %v7526_v47 = vadd.f32 %v15345_v25, %v15343_v40  ;;  %v7527_v39 = vadd.f32 %v15349_v17, %v15347_v26  ;;  %v15356_v28 = vmax.f32 %v15355_v49, 0.0  ;;  %v15358_v38 = vmax.f32 %v15357_v0, 0.0  ;;  %7587 = vst.msk [vmem:[#allocation3 + $0x1a0] sm:$0xff] %vm336_vm0, %v7523_v2  ;;  %7588 = vst.msk [vmem:[#allocation3 + $0x1a8] sm:$0xff] %vm336_vm0, %v7524_v34  ;;  %v15371_v46 = vld [vmem:[#allocation44_spill] sm:$0xff]  ;;  %v15373_v4 = vld [vmem:[#allocation79_spill] sm:$0xff] }
 0x877   :  { %v7528_v53 = vadd.f32 %v15352_v37, %v15351_v42  ;;  %v15359_v16 = vmax.f32 %v15162_v20, 0.0  ;;  %v15361_v9 = vmax.f32 %v15360_v32, 0.0  ;;  %v15363_v14 = vmax.f32 %v15362_v62, 0.0  ;;  %v15368_v20 = vld [vmem:[#allocation45_spill] sm:$0xff]  ;;  %7589 = vst.msk [vmem:[#allocation3 + $0x1b0] sm:$0xff] %vm336_vm0, %v7525_v45 }
 0x878   :  { %v7529_v59 = vadd.f32 %v15356_v28, %v15354_v5  ;;  %v15365_v50 = vmax.f32 %v15364_v1, 0.0  ;;  %v15367_v35 = vmax.f32 %v15366_v8, 0.0  ;;  %v15369_v11 = vmax.f32 %v15368_v20, 0.0  ;;  %7590 = vst.msk [vmem:[#allocation3 + $0x1b8] sm:$0xff] %vm336_vm0, %v7526_v47  ;;  %7591 = vst.msk [vmem:[#allocation3 + $0x1c0] sm:$0xff] %vm336_vm0, %v7527_v39 }
 0x879   :  { %v7530_v10 = vadd.f32 %v15359_v16, %v15358_v38  ;;  %v7531_v23 = vadd.f32 %v15363_v14, %v15361_v9  ;;  %v15370_v7 = vmax.f32 %v15165_v60, 0.0  ;;  %v15372_v3 = vmax.f32 %v15371_v46, 0.0  ;;  %7592 = vst.msk [vmem:[#allocation3 + $0x1c8] sm:$0xff] %vm336_vm0, %v7528_v53 }
 0x87a   :  { %v7532_v57 = vadd.f32 %v15367_v35, %v15365_v50  ;;  %v15374_v29 = vmax.f32 %v15373_v4, 0.0  ;;  %7593 = vst.msk [vmem:[#allocation3 + $0x1d0] sm:$0xff] %vm336_vm0, %v7529_v59 }
 0x87b   :  { %v7533_v55 = vadd.f32 %v15370_v7, %v15369_v11  ;;  %7594 = vst.msk [vmem:[#allocation3 + $0x1d8] sm:$0xff] %vm336_vm0, %v7530_v10  ;;  %7595 = vst.msk [vmem:[#allocation3 + $0x1e0] sm:$0xff] %vm336_vm0, %v7531_v23 }
 0x87c   :  { %v7534_v61 = vadd.f32 %v15374_v29, %v15372_v3  ;;  %7596 = vst.msk [vmem:[#allocation3 + $0x1e8] sm:$0xff] %vm336_vm0, %v7532_v57 }
 0x87d   :  { %7597 = vst.msk [vmem:[#allocation3 + $0x1f0] sm:$0xff] %vm336_vm0, %v7533_v55 }
 0x87e   :  { %7598 = vst.msk [vmem:[#allocation3 + $0x1f8] sm:$0xff] %vm336_vm0, %v7534_v61 }
 0x87f   :  { %10431 = shalt.err (!%p10428_p4)
}
 0x880   :  { %s10432_s29 = scalar_lea.hbm %s14480_s7, 8192 }
 0x881   :  { %p10433_p5 = scmp.ne.s32.totalorder %s14480_s7, %s10432_s29  ;;  %p10436_p6 = scmp.lt.u32.totalorder %s10432_s29, %s14480_s7 }
 0x883   :  { %p10438_p7 = pnand %p10436_p6, %p10433_p5 }
 0x885   :  { %10441 = shalt.err (!%p10438_p7)
}
 0x886   :  { %s10447_s9 = smov 128   ;;  %s10448_s10 = smov 8  }
 0x887   :  { %7610 = dma.vmem_to_hbm [thread:$0]  %s7605_s6, 8192, %s14480_s7, [#allocation4], %s10447_s9, %s10447_s9, %s10448_s10  }
 0x888   :  { %10442 = dma.done.wait [#allocation4], 8192  }
 0x889   :  { %10443 = vsyncadd [#allocation4], 4294959104 }
 0x88a   :  { %7614 = vsyncpa [#allocation4], 1 }

</bundles_post_ra>
